<compile_context>
chip_gen: v7x
topology: tpu7x:2x2x1
jax: 0.10.0
libtpu: 0.0.40
codegen_flags: <defaults>
</compile_context>

<pallas_src>
import functools

import jax
import jax.numpy as jnp
from jax import lax
from jax.experimental import pallas as pl
from jax.experimental.pallas import tpu as pltpu


def _round_up(x, m):
    return (x + m - 1) // m * m


def _gru_decoder_kernel(
    enc_ref,      # (Bt, S, 2H)  f32  encoder outputs (batch tile)
    wa_e_ref,     # (1, 2H)      f32  alignment weight, encoder part
    b_a_ref,      # (1, 1)       f32  alignment bias (SMEM scalar)
    embed_ref,    # (Vp, Hp)     f32  embedding table (zero padded)
    wl_emb_ref,   # (Hp, Hp)     f32  linear weight, embedding rows (transposed)
    wl_ctx_ref,   # (2H, Hp)     f32  linear weight, context rows (transposed)
    b_lin_ref,    # (1, Hp)      f32
    wi_ref,       # (Hp, 3*Hp)   f32  GRU W_ih^T, lane-aligned gate blocks [r|z|n]
    wh_ref,       # (Hp, 4*Hp)   f32  GRU W_hh^T + folded wa_h column at lane 3*Hp
    b_i_ref,      # (1, 3*Hp)    f32
    b_h_ref,      # (1, 4*Hp)    f32
    wout_ref,     # (Hp, Vp)     f32  out_proj^T (zero padded)
    b_out_ref,    # (1, Vp)      f32  padded vocab columns = -1e30
    out_ref,      # (Bt, T, Vp)  f32  T = max_len + 1
):
    f32 = jnp.float32
    Bt, S, twoH = enc_ref.shape
    Hp = embed_ref.shape[1]
    T, Vp = out_ref.shape[1], out_ref.shape[2]
    max_len = T - 1

    enc = enc_ref[...]                                   # single f32 copy in VMEM

    lane_v = lax.broadcasted_iota(jnp.int32, (Bt, Vp), 1)

    # outputs[0] = one-hot of token 0; lane-dense store (Vp % 128 == 0).
    out_ref[:, 0, :] = (lane_v == 0).astype(f32)

    # Hidden-independent part of the alignment score, hoisted out of the loop.
    b_a = b_a_ref[0, 0]
    scores_e = jnp.sum(enc * wa_e_ref[...][None, :, :], axis=-1) + b_a    # (Bt, S)

    embed = embed_ref[...]
    wl_emb = wl_emb_ref[...]
    wl_ctx = wl_ctx_ref[...]
    b_lin = b_lin_ref[...]
    wi = wi_ref[...]
    wh = wh_ref[...]
    b_i = b_i_ref[...]
    b_h = b_h_ref[...]
    wout = wout_ref[...]
    b_out = b_out_ref[...]

    def step(t, carry):
        h, tok = carry                                   # (Bt, Hp) f32, (Bt, 1) i32

        # gh first (depends only on h); the 4th Hp block's first column carries
        # the folded hidden alignment score h . wa_h (rides the MXU for free).
        gh = jnp.dot(h, wh, preferred_element_type=f32) + b_h             # (Bt, 4Hp)
        score_h = gh[:, 3 * Hp:3 * Hp + 1]                                # (Bt, 1)

        # Attention softmax over source positions (exact f32 for greedy parity).
        s = scores_e + score_h
        s = s - jnp.max(s, axis=-1, keepdims=True)
        e = jnp.exp(s)
        attn = e / jnp.sum(e, axis=-1, keepdims=True)                     # (Bt, S)
        # Context: VPU multiply + sublane reduce (best for small S; swap to a
        # batched MXU einsum for large S on v6e/v7x).
        context = jnp.sum(enc * attn[:, :, None], axis=1)                 # (Bt, 2H)

        # Embed previous greedy token via one-hot matmul (exact at small vocab).
        # TODO(synk): for realistic vocab sizes replace with a DMA row gather
        # from an HBM-resident table (memory_space=pl.ANY + make_async_copy).
        onehot = (lane_v == tok).astype(f32)                              # (Bt, Vp)
        emb = jnp.dot(onehot, embed, preferred_element_type=f32)          # (Bt, Hp)

        # linear([emb | ctx]) split into two matmuls (no per-step concat
        # relayout); ReLU; dropout = identity in eval mode.
        x = jnp.maximum(
            jnp.dot(emb, wl_emb, preferred_element_type=f32)
            + jnp.dot(context, wl_ctx, preferred_element_type=f32)
            + b_lin, 0.0)                                                 # (Bt, Hp)

        # GRU cell (PyTorch gate order r, z, n); gate blocks are lane-aligned.
        gi = jnp.dot(x, wi, preferred_element_type=f32) + b_i             # (Bt, 3Hp)
        r = jax.nn.sigmoid(gi[:, 0:Hp] + gh[:, 0:Hp])
        z = jax.nn.sigmoid(gi[:, Hp:2 * Hp] + gh[:, Hp:2 * Hp])
        n = jnp.tanh(gi[:, 2 * Hp:3 * Hp] + r * gh[:, 2 * Hp:3 * Hp])
        h_new = (1.0 - z) * n + z * h                                     # (Bt, Hp)

        # Output projection; padded vocab columns carry a -1e30 bias.
        logits = jnp.dot(h_new, wout, preferred_element_type=f32) + b_out # (Bt, Vp)
        out_ref[:, pl.ds(t + 1, 1), :] = logits[:, None, :]

        # Greedy argmax (first-max tie rule) while logits are still in vregs;
        # the loop carry stays slim: (Bt, Hp) hidden + (Bt, 1) token index.
        mx = jnp.max(logits, axis=-1, keepdims=True)
        cand = jnp.where(logits == mx, lane_v, Vp)
        tok_new = jnp.min(cand, axis=-1, keepdims=True)                   # (Bt, 1)
        return (h_new, tok_new)

    h0 = jnp.zeros((Bt, Hp), f32)
    tok0 = jnp.zeros((Bt, 1), jnp.int32)       # argmax of the initial one-hot == 0

    if max_len <= 8:
        # Full static unroll: store offsets become compile-time constants.
        carry = (h0, tok0)
        for t in range(max_len):
            carry = step(t, carry)
    else:
        # Strict recurrence: partial unroll keeps vreg pressure bounded while
        # giving the LLO scheduler visibility.
        lax.fori_loop(0, max_len, step, (h0, tok0), unroll=4)


def gru_decoder_forward(encoder_outputs, params, *, max_len, b_tile=None):
    """Greedy decode (tgt_seq=None, eval mode). Returns (B, max_len+1, V) f32."""
    B, S, twoH = encoder_outputs.shape
    H = twoH // 2
    V = params["embed"].shape[0]
    Hp = _round_up(H, 128)
    Vp = _round_up(V, 128)
    T = max_len + 1
    f32 = jnp.float32

    # v5e/v6e: single TensorCore -> keep b_tile = B (one program, weights staged
    # once).  v7x: pass b_tile = B // 2 (multiple of 8) so the 2nd TC gets work.
    if b_tile is None:
        b_tile = B
    assert B % b_tile == 0
    assert b_tile == B or b_tile % 8 == 0
    nb = B // b_tile

    # ---- map PyTorch-layout params to padded, kernel-layout operands (f32) ----
    wa = params["align_w"].astype(f32)                   # (1, 3H), input = [enc(2H) | h(H)]
    wa_e = wa[:, :twoH]                                  # (1, 2H)
    wa_h = wa[0, twoH:]                                  # (H,)
    b_a = params["align_b"].reshape(1, 1).astype(f32)    # SMEM scalar

    embed = jnp.zeros((Vp, Hp), f32).at[:V, :H].set(params["embed"].astype(f32))

    lw = params["lin_w"].astype(f32)                     # (H, 3H), cols = [emb | ctx]
    wl_emb = jnp.zeros((Hp, Hp), f32).at[:H, :H].set(lw[:, :H].T)
    wl_ctx = jnp.zeros((twoH, Hp), f32).at[:, :H].set(lw[:, H:].T)
    b_lin = jnp.zeros((1, Hp), f32).at[0, :H].set(params["lin_b"].astype(f32))

    w_ih = params["gru_w_ih"].astype(f32)                # (3H, H), gate order r,z,n
    w_hh = params["gru_w_hh"].astype(f32)
    b_ih = params["gru_b_ih"].astype(f32)
    b_hh = params["gru_b_hh"].astype(f32)
    wi = jnp.zeros((Hp, 3 * Hp), f32)
    wh = jnp.zeros((Hp, 4 * Hp), f32)                    # 4th Hp block: folded wa_h column
    b_i = jnp.zeros((1, 3 * Hp), f32)
    b_h = jnp.zeros((1, 4 * Hp), f32)
    for g in range(3):                                   # lane-align each gate block to Hp
        wi = wi.at[:H, g * Hp:g * Hp + H].set(w_ih[g * H:(g + 1) * H, :].T)
        wh = wh.at[:H, g * Hp:g * Hp + H].set(w_hh[g * H:(g + 1) * H, :].T)
        b_i = b_i.at[0, g * Hp:g * Hp + H].set(b_ih[g * H:(g + 1) * H])
        b_h = b_h.at[0, g * Hp:g * Hp + H].set(b_hh[g * H:(g + 1) * H])
    wh = wh.at[:H, 3 * Hp].set(wa_h)                     # h.wa_h rides the gh matmul

    wout = jnp.zeros((Hp, Vp), f32).at[:H, :V].set(params["out_w"].astype(f32).T)
    b_out = jnp.full((1, Vp), -1e30, f32).at[0, :V].set(params["out_b"].astype(f32))

    enc = encoder_outputs.astype(f32)
    inputs = (enc, wa_e, b_a, embed, wl_emb, wl_ctx, b_lin,
              wi, wh, b_i, b_h, wout, b_out)

    def const_spec(a):
        nd = a.ndim
        return pl.BlockSpec(a.shape, lambda b, nd=nd: (0,) * nd)

    in_specs = [
        pl.BlockSpec((b_tile, S, twoH), lambda b: (b, 0, 0)),     # encoder tile
        const_spec(wa_e),
        pl.BlockSpec(memory_space=pltpu.MemorySpace.SMEM),        # alignment bias scalar
        const_spec(embed),
        const_spec(wl_emb),
        const_spec(wl_ctx),
        const_spec(b_lin),
        const_spec(wi),
        const_spec(wh),
        const_spec(b_i),
        const_spec(b_h),
        const_spec(wout),
        const_spec(b_out),
    ]

    # Rough VMEM budget (double-buffered blocks): only raise the scoped limit
    # above the 32 MiB default when needed (matters on v7x at production H/V).
    # TODO(synk): at production V, additionally tile wout / the output slab over
    # the vocab axis instead of keeping them fully VMEM resident.
    weight_bytes = 4 * sum(int(a.size) for a in inputs[1:])
    block_bytes = 4 * (b_tile * S * twoH + T * b_tile * Vp)
    vmem_est = 2 * (block_bytes + weight_bytes) + (2 << 20)
    vmem_limit = int(vmem_est) if vmem_est > (32 << 20) else None

    out = pl.pallas_call(
        _gru_decoder_kernel,
        out_shape=jax.ShapeDtypeStruct((B, T, Vp), f32),  # (B, T, V) layout directly
        grid=(nb,),
        in_specs=in_specs,
        out_specs=pl.BlockSpec((b_tile, T, Vp), lambda b: (b, 0, 0)),
        compiler_params=pltpu.CompilerParams(
            dimension_semantics=("parallel",),
            vmem_limit_bytes=vmem_limit,
        ),
    )(*inputs)

    return out[:, :, :V] if Vp != V else out


def gru_decoder_reference(encoder_outputs, params, *, max_len):
    """Pure-JAX mirror of the PyTorch greedy-decode forward (eval mode)."""
    B, S, twoH = encoder_outputs.shape
    H = twoH // 2
    V = params["embed"].shape[0]
    f32 = jnp.float32

    wa = params["align_w"].astype(f32)[0]
    b_a = params["align_b"].astype(f32)[0]
    embed = params["embed"].astype(f32)
    lw, lb = params["lin_w"].astype(f32), params["lin_b"].astype(f32)
    w_ih, w_hh = params["gru_w_ih"].astype(f32), params["gru_w_hh"].astype(f32)
    b_ih, b_hh = params["gru_b_ih"].astype(f32), params["gru_b_hh"].astype(f32)
    ow, ob = params["out_w"].astype(f32), params["out_b"].astype(f32)

    h = jnp.zeros((B, H), f32)
    tok = jnp.zeros((B,), jnp.int32)
    outs = [jnp.zeros((B, V), f32).at[:, 0].set(1.0)]
    for _ in range(max_len):
        align_in = jnp.concatenate(
            [encoder_outputs, jnp.broadcast_to(h[:, None, :], (B, S, H))], axis=-1)
        attn = jax.nn.softmax(align_in @ wa + b_a, axis=-1)
        context = jnp.sum(encoder_outputs * attn[:, :, None], axis=1)
        x = jnp.concatenate([embed[tok], context], axis=-1)
        x = jnp.maximum(x @ lw.T + lb, 0.0)
        gi = x @ w_ih.T + b_ih
        gh = h @ w_hh.T + b_hh
        r = jax.nn.sigmoid(gi[:, :H] + gh[:, :H])
        z = jax.nn.sigmoid(gi[:, H:2 * H] + gh[:, H:2 * H])
        n = jnp.tanh(gi[:, 2 * H:] + r * gh[:, 2 * H:])
        h = (1.0 - z) * n + z * h
        logits = h @ ow.T + ob
        outs.append(logits)
        tok = jnp.argmax(logits, axis=-1).astype(jnp.int32)
    return jnp.stack(outs, axis=1)


def make_params(key, hidden_size, out_size):
    """PyTorch-layout parameters for the GRUDecoder module."""
    H, V = hidden_size, out_size
    ks = jax.random.split(key, 12)
    s = 0.1

    def rnd(k, shape):
        return (s * jax.random.normal(k, shape)).astype(jnp.float32)

    return {
        "align_w": rnd(ks[0], (1, 3 * H)),    # alignment = Linear(3H, 1)
        "align_b": rnd(ks[1], (1,)),
        "embed": rnd(ks[2], (V, H)),          # Embedding(V, H)
        "lin_w": rnd(ks[3], (H, 3 * H)),      # linear = Linear(3H, H)
        "lin_b": rnd(ks[4], (H,)),
        "gru_w_ih": rnd(ks[5], (3 * H, H)),   # GRU weight_ih_l0 (gate order r,z,n)
        "gru_w_hh": rnd(ks[6], (3 * H, H)),   # GRU weight_hh_l0
        "gru_b_ih": rnd(ks[7], (3 * H,)),
        "gru_b_hh": rnd(ks[8], (3 * H,)),
        "out_w": rnd(ks[9], (V, H)),          # out_proj = Linear(H, V)
        "out_b": rnd(ks[10], (V,)),
    }


if __name__ == "__main__":
    B, S, H, V, MAX_LEN = 2, 8, 32, 16, 6

    key = jax.random.PRNGKey(0)
    k_enc, k_par = jax.random.split(key)
    encoder_outputs = jax.random.normal(k_enc, (B, S, 2 * H), dtype=jnp.float32)
    params = make_params(k_par, H, V)

    fwd = jax.jit(functools.partial(gru_decoder_forward, max_len=MAX_LEN))
    out = fwd(encoder_outputs, params)
    jax.block_until_ready(out)

    assert out.shape == (B, MAX_LEN + 1, V), out.shape
    assert bool(jnp.all(jnp.isfinite(out)))

    ref = gru_decoder_reference(encoder_outputs, params, max_len=MAX_LEN)
    err = float(jnp.max(jnp.abs(out - ref)))
    assert bool(jnp.allclose(out, ref, atol=1e-3, rtol=1e-3)), err
    print("KERNEL_OK")
</pallas_src>

<mosaic_0001>
module attributes {stable_mosaic.version = 11 : i64} {
  func.func @_gru_decoder_kernel(%arg0: i32, %arg1: memref<2x8x64xf32, #tpu.memory_space<vmem>>, %arg2: memref<1x64xf32, #tpu.memory_space<vmem>>, %arg3: memref<1x1xf32, #tpu.memory_space<smem>>, %arg4: memref<128x128xf32, #tpu.memory_space<vmem>>, %arg5: memref<128x128xf32, #tpu.memory_space<vmem>>, %arg6: memref<64x128xf32, #tpu.memory_space<vmem>>, %arg7: memref<1x128xf32, #tpu.memory_space<vmem>>, %arg8: memref<128x384xf32, #tpu.memory_space<vmem>>, %arg9: memref<128x512xf32, #tpu.memory_space<vmem>>, %arg10: memref<1x384xf32, #tpu.memory_space<vmem>>, %arg11: memref<1x512xf32, #tpu.memory_space<vmem>>, %arg12: memref<128x128xf32, #tpu.memory_space<vmem>>, %arg13: memref<1x128xf32, #tpu.memory_space<vmem>>, %arg14: memref<2x7x128xf32, #tpu.memory_space<vmem>>) attributes {dimension_semantics = [#tpu.dimension_semantics<parallel>], iteration_bounds = array<i64: 1>, scalar_prefetch = 0 : i64, scratch_operands = 0 : i64, tpu.core_type = #tpu.core_type<tc>, window_params = [{transform_indices = @transform_0, window_bounds = array<i64: 2, 8, 64>}, {pipeline_mode = #tpu.pipeline_mode<synchronous>, transform_indices = @transform_1, window_bounds = array<i64: 1, 64>}, {transform_indices = @transform_2, window_bounds = array<i64: 1, 1>}, {pipeline_mode = #tpu.pipeline_mode<synchronous>, transform_indices = @transform_3, window_bounds = array<i64: 128, 128>}, {pipeline_mode = #tpu.pipeline_mode<synchronous>, transform_indices = @transform_4, window_bounds = array<i64: 128, 128>}, {pipeline_mode = #tpu.pipeline_mode<synchronous>, transform_indices = @transform_5, window_bounds = array<i64: 64, 128>}, {pipeline_mode = #tpu.pipeline_mode<synchronous>, transform_indices = @transform_6, window_bounds = array<i64: 1, 128>}, {pipeline_mode = #tpu.pipeline_mode<synchronous>, transform_indices = @transform_7, window_bounds = array<i64: 128, 384>}, {pipeline_mode = #tpu.pipeline_mode<synchronous>, transform_indices = @transform_8, window_bounds = array<i64: 128, 512>}, {pipeline_mode = #tpu.pipeline_mode<synchronous>, transform_indices = @transform_9, window_bounds = array<i64: 1, 384>}, {pipeline_mode = #tpu.pipeline_mode<synchronous>, transform_indices = @transform_10, window_bounds = array<i64: 1, 512>}, {pipeline_mode = #tpu.pipeline_mode<synchronous>, transform_indices = @transform_11, window_bounds = array<i64: 128, 128>}, {pipeline_mode = #tpu.pipeline_mode<synchronous>, transform_indices = @transform_12, window_bounds = array<i64: 1, 128>}, {transform_indices = @transform_13, window_bounds = array<i64: 2, 7, 128>}]} {
    %c0 = arith.constant 0 : index
    %c0_0 = arith.constant 0 : index
    %c0_1 = arith.constant 0 : index
    %0 = vector.load %arg1[%c0, %c0_0, %c0_1] : memref<2x8x64xf32, #tpu.memory_space<vmem>>, vector<2x8x64xf32>
    %1 = tpu.iota {dimensions = array<i32: 1>} : vector<2x128xi32>
    %c0_i32 = arith.constant 0 : i32
    %2 = vector.broadcast %c0_i32 : i32 to vector<2x128xi32>
    %3 = arith.cmpi eq, %1, %2 : vector<2x128xi32>
    %4 = arith.extui %3 : vector<2x128xi1> to vector<2x128xi32>
    %5 = arith.sitofp %4 : vector<2x128xi32> to vector<2x128xf32>
    %c0_2 = arith.constant 0 : index
    %c0_3 = arith.constant 0 : index
    %c0_4 = arith.constant 0 : index
    %6 = vector.load %arg14[%c0_2, %c0_3, %c0_4] : memref<2x7x128xf32, #tpu.memory_space<vmem>>, vector<2x1x128xf32>
    %7 = vector.shape_cast %6 : vector<2x1x128xf32> to vector<2x128xf32>
    %8 = vector.shape_cast %5 : vector<2x128xf32> to vector<2x1x128xf32>
    tpu.vector_store %arg14[%c0_2, %c0_3, %c0_4], %8 {strides = array<i32>} : memref<2x7x128xf32, #tpu.memory_space<vmem>>, vector<2x1x128xf32>,
    %c0_5 = arith.constant 0 : index
    %c0_6 = arith.constant 0 : index
    %9 = memref.load %arg3[%c0_5, %c0_6] : memref<1x1xf32, #tpu.memory_space<smem>>
    %c0_7 = arith.constant 0 : index
    %c0_8 = arith.constant 0 : index
    %10 = vector.load %arg2[%c0_7, %c0_8] : memref<1x64xf32, #tpu.memory_space<vmem>>, vector<1x64xf32>
    %11 = vector.shape_cast %10 : vector<1x64xf32> to vector<1x1x64xf32>
    %12 = vector.broadcast %11 : vector<1x1x64xf32> to vector<2x8x64xf32>
    %13 = arith.mulf %0, %12 : vector<2x8x64xf32>
    %cst = arith.constant dense<0.000000e+00> : vector<2x8xf32>
    %14 = vector.multi_reduction <add>, %13, %cst [2] : vector<2x8x64xf32> to vector<2x8xf32>
    %15 = vector.broadcast %9 : f32 to vector<2x8xf32>
    %16 = arith.addf %14, %15 : vector<2x8xf32>
    %c0_9 = arith.constant 0 : index
    %c0_10 = arith.constant 0 : index
    %17 = vector.load %arg4[%c0_9, %c0_10] : memref<128x128xf32, #tpu.memory_space<vmem>>, vector<128x128xf32>
    %c0_11 = arith.constant 0 : index
    %c0_12 = arith.constant 0 : index
    %18 = vector.load %arg5[%c0_11, %c0_12] : memref<128x128xf32, #tpu.memory_space<vmem>>, vector<128x128xf32>
    %c0_13 = arith.constant 0 : index
    %c0_14 = arith.constant 0 : index
    %19 = vector.load %arg6[%c0_13, %c0_14] : memref<64x128xf32, #tpu.memory_space<vmem>>, vector<64x128xf32>
    %c0_15 = arith.constant 0 : index
    %c0_16 = arith.constant 0 : index
    %20 = vector.load %arg7[%c0_15, %c0_16] : memref<1x128xf32, #tpu.memory_space<vmem>>, vector<1x128xf32>
    %c0_17 = arith.constant 0 : index
    %c0_18 = arith.constant 0 : index
    %21 = vector.load %arg8[%c0_17, %c0_18] : memref<128x384xf32, #tpu.memory_space<vmem>>, vector<128x384xf32>
    %c0_19 = arith.constant 0 : index
    %c0_20 = arith.constant 0 : index
    %22 = vector.load %arg9[%c0_19, %c0_20] : memref<128x512xf32, #tpu.memory_space<vmem>>, vector<128x512xf32>
    %c0_21 = arith.constant 0 : index
    %c0_22 = arith.constant 0 : index
    %23 = vector.load %arg10[%c0_21, %c0_22] : memref<1x384xf32, #tpu.memory_space<vmem>>, vector<1x384xf32>
    %c0_23 = arith.constant 0 : index
    %c0_24 = arith.constant 0 : index
    %24 = vector.load %arg11[%c0_23, %c0_24] : memref<1x512xf32, #tpu.memory_space<vmem>>, vector<1x512xf32>
    %c0_25 = arith.constant 0 : index
    %c0_26 = arith.constant 0 : index
    %25 = vector.load %arg12[%c0_25, %c0_26] : memref<128x128xf32, #tpu.memory_space<vmem>>, vector<128x128xf32>
    %c0_27 = arith.constant 0 : index
    %c0_28 = arith.constant 0 : index
    %26 = vector.load %arg13[%c0_27, %c0_28] : memref<1x128xf32, #tpu.memory_space<vmem>>, vector<1x128xf32>
    %cst_29 = arith.constant 0.000000e+00 : f32
    %27 = vector.broadcast %cst_29 : f32 to vector<2x128xf32>
    %c0_i32_30 = arith.constant 0 : i32
    %28 = vector.broadcast %c0_i32_30 : i32 to vector<2x1xi32>
    %cst_31 = arith.constant dense<0.000000e+00> : vector<2x512xf32>
    %29 = tpu.matmul %27, %22, %cst_31 {dimension_numbers = #tpu.dot_dimension_numbers<[1], [0], [0], [1], [0, 0, 1, 1], [], []>} : vector<2x128xf32>, vector<128x512xf32>, vector<2x512xf32> -> vector<2x512xf32>
    %30 = vector.broadcast %24 : vector<1x512xf32> to vector<2x512xf32>
    %31 = arith.addf %29, %30 : vector<2x512xf32>
    %32 = vector.extract_strided_slice %31 {offsets = [0, 384], sizes = [2, 1], strides = [1, 1]} : vector<2x512xf32> to vector<2x1xf32>
    %33 = vector.broadcast %32 : vector<2x1xf32> to vector<2x8xf32>
    %34 = arith.addf %16, %33 : vector<2x8xf32>
    %cst_32 = arith.constant dense<0xFF800000> : vector<2xf32>
    %35 = vector.multi_reduction <maximumf>, %34, %cst_32 [1] : vector<2x8xf32> to vector<2xf32>
    %36 = vector.shape_cast %35 : vector<2xf32> to vector<2x1xf32>
    %37 = vector.broadcast %36 : vector<2x1xf32> to vector<2x8xf32>
    %38 = arith.subf %34, %37 : vector<2x8xf32>
    %39 = math.exp %38 : vector<2x8xf32>
    %cst_33 = arith.constant dense<0.000000e+00> : vector<2xf32>
    %40 = vector.multi_reduction <add>, %39, %cst_33 [1] : vector<2x8xf32> to vector<2xf32>
    %41 = vector.shape_cast %40 : vector<2xf32> to vector<2x1xf32>
    %42 = vector.broadcast %41 : vector<2x1xf32> to vector<2x8xf32>
    %43 = arith.divf %39, %42 : vector<2x8xf32>
    %44 = vector.shape_cast %43 : vector<2x8xf32> to vector<2x8x1xf32>
    %45 = vector.broadcast %44 : vector<2x8x1xf32> to vector<2x8x64xf32>
    %46 = arith.mulf %0, %45 : vector<2x8x64xf32>
    %cst_34 = arith.constant dense<0.000000e+00> : vector<2x64xf32>
    %47 = vector.multi_reduction <add>, %46, %cst_34 [1] : vector<2x8x64xf32> to vector<2x64xf32>
    %48 = vector.broadcast %28 : vector<2x1xi32> to vector<2x128xi32>
    %49 = arith.cmpi eq, %1, %48 : vector<2x128xi32>
    %50 = arith.extui %49 : vector<2x128xi1> to vector<2x128xi32>
    %51 = arith.sitofp %50 : vector<2x128xi32> to vector<2x128xf32>
    %cst_35 = arith.constant dense<0.000000e+00> : vector<2x128xf32>
    %52 = tpu.matmul %51, %17, %cst_35 {dimension_numbers = #tpu.dot_dimension_numbers<[1], [0], [0], [1], [0, 0, 1, 1], [], []>} : vector<2x128xf32>, vector<128x128xf32>, vector<2x128xf32> -> vector<2x128xf32>
    %cst_36 = arith.constant dense<0.000000e+00> : vector<2x128xf32>
    %53 = tpu.matmul %52, %18, %cst_36 {dimension_numbers = #tpu.dot_dimension_numbers<[1], [0], [0], [1], [0, 0, 1, 1], [], []>} : vector<2x128xf32>, vector<128x128xf32>, vector<2x128xf32> -> vector<2x128xf32>
    %cst_37 = arith.constant dense<0.000000e+00> : vector<2x128xf32>
    %54 = tpu.matmul %47, %19, %cst_37 {dimension_numbers = #tpu.dot_dimension_numbers<[1], [0], [0], [1], [0, 0, 1, 1], [], []>} : vector<2x64xf32>, vector<64x128xf32>, vector<2x128xf32> -> vector<2x128xf32>
    %55 = arith.addf %53, %54 : vector<2x128xf32>
    %56 = vector.broadcast %20 : vector<1x128xf32> to vector<2x128xf32>
    %57 = arith.addf %55, %56 : vector<2x128xf32>
    %cst_38 = arith.constant 0.000000e+00 : f32
    %58 = vector.broadcast %cst_38 : f32 to vector<2x128xf32>
    %59 = arith.maximumf %57, %58 : vector<2x128xf32>
    %cst_39 = arith.constant dense<0.000000e+00> : vector<2x384xf32>
    %60 = tpu.matmul %59, %21, %cst_39 {dimension_numbers = #tpu.dot_dimension_numbers<[1], [0], [0], [1], [0, 0, 1, 1], [], []>} : vector<2x128xf32>, vector<128x384xf32>, vector<2x384xf32> -> vector<2x384xf32>
    %61 = vector.broadcast %23 : vector<1x384xf32> to vector<2x384xf32>
    %62 = arith.addf %60, %61 : vector<2x384xf32>
    %63 = vector.extract_strided_slice %62 {offsets = [0, 0], sizes = [2, 128], strides = [1, 1]} : vector<2x384xf32> to vector<2x128xf32>
    %64 = vector.extract_strided_slice %31 {offsets = [0, 0], sizes = [2, 128], strides = [1, 1]} : vector<2x512xf32> to vector<2x128xf32>
    %65 = arith.addf %63, %64 : vector<2x128xf32>
    %66 = arith.negf %65 : vector<2x128xf32>
    %67 = math.exp %66 : vector<2x128xf32>
    %cst_40 = arith.constant 1.000000e+00 : f32
    %68 = vector.broadcast %cst_40 : f32 to vector<2x128xf32>
    %69 = arith.addf %68, %67 : vector<2x128xf32>
    %70 = arith.divf %68, %69 : vector<2x128xf32>
    %71 = vector.extract_strided_slice %62 {offsets = [0, 128], sizes = [2, 128], strides = [1, 1]} : vector<2x384xf32> to vector<2x128xf32>
    %72 = vector.extract_strided_slice %31 {offsets = [0, 128], sizes = [2, 128], strides = [1, 1]} : vector<2x512xf32> to vector<2x128xf32>
    %73 = arith.addf %71, %72 : vector<2x128xf32>
    %74 = arith.negf %73 : vector<2x128xf32>
    %75 = math.exp %74 : vector<2x128xf32>
    %cst_41 = arith.constant 1.000000e+00 : f32
    %76 = vector.broadcast %cst_41 : f32 to vector<2x128xf32>
    %77 = arith.addf %76, %75 : vector<2x128xf32>
    %78 = arith.divf %76, %77 : vector<2x128xf32>
    %79 = vector.extract_strided_slice %62 {offsets = [0, 256], sizes = [2, 128], strides = [1, 1]} : vector<2x384xf32> to vector<2x128xf32>
    %80 = vector.extract_strided_slice %31 {offsets = [0, 256], sizes = [2, 128], strides = [1, 1]} : vector<2x512xf32> to vector<2x128xf32>
    %81 = arith.mulf %70, %80 : vector<2x128xf32>
    %82 = arith.addf %79, %81 : vector<2x128xf32>
    %83 = math.tanh %82 : vector<2x128xf32>
    %cst_42 = arith.constant 1.000000e+00 : f32
    %84 = vector.broadcast %cst_42 : f32 to vector<2x128xf32>
    %85 = arith.subf %84, %78 : vector<2x128xf32>
    %86 = arith.mulf %85, %83 : vector<2x128xf32>
    %87 = arith.mulf %78, %27 : vector<2x128xf32>
    %88 = arith.addf %86, %87 : vector<2x128xf32>
    %cst_43 = arith.constant dense<0.000000e+00> : vector<2x128xf32>
    %89 = tpu.matmul %88, %25, %cst_43 {dimension_numbers = #tpu.dot_dimension_numbers<[1], [0], [0], [1], [0, 0, 1, 1], [], []>} : vector<2x128xf32>, vector<128x128xf32>, vector<2x128xf32> -> vector<2x128xf32>
    %90 = vector.broadcast %26 : vector<1x128xf32> to vector<2x128xf32>
    %91 = arith.addf %89, %90 : vector<2x128xf32>
    %92 = vector.shape_cast %91 : vector<2x128xf32> to vector<2x1x128xf32>
    %c0_44 = arith.constant 0 : index
    %c1 = arith.constant 1 : index
    %c0_45 = arith.constant 0 : index
    %93 = vector.load %arg14[%c0_44, %c1, %c0_45] : memref<2x7x128xf32, #tpu.memory_space<vmem>>, vector<2x1x128xf32>
    tpu.vector_store %arg14[%c0_44, %c1, %c0_45], %92 {strides = array<i32>} : memref<2x7x128xf32, #tpu.memory_space<vmem>>, vector<2x1x128xf32>,
    %cst_46 = arith.constant dense<0xFF800000> : vector<2xf32>
    %94 = vector.multi_reduction <maximumf>, %91, %cst_46 [1] : vector<2x128xf32> to vector<2xf32>
    %95 = vector.shape_cast %94 : vector<2xf32> to vector<2x1xf32>
    %96 = vector.broadcast %95 : vector<2x1xf32> to vector<2x128xf32>
    %97 = arith.cmpf oeq, %91, %96 : vector<2x128xf32>
    %c128_i32 = arith.constant 128 : i32
    %98 = vector.broadcast %c128_i32 : i32 to vector<2x128xi32>
    %99 = arith.select %97, %1, %98 : vector<2x128xi1>, vector<2x128xi32>
    %cst_47 = arith.constant dense<2147483647> : vector<2xi32>
    %100 = vector.multi_reduction <minsi>, %99, %cst_47 [1] : vector<2x128xi32> to vector<2xi32>
    %101 = vector.shape_cast %100 : vector<2xi32> to vector<2x1xi32>
    %cst_48 = arith.constant dense<0.000000e+00> : vector<2x512xf32>
    %102 = tpu.matmul %88, %22, %cst_48 {dimension_numbers = #tpu.dot_dimension_numbers<[1], [0], [0], [1], [0, 0, 1, 1], [], []>} : vector<2x128xf32>, vector<128x512xf32>, vector<2x512xf32> -> vector<2x512xf32>
    %103 = vector.broadcast %24 : vector<1x512xf32> to vector<2x512xf32>
    %104 = arith.addf %102, %103 : vector<2x512xf32>
    %105 = vector.extract_strided_slice %104 {offsets = [0, 384], sizes = [2, 1], strides = [1, 1]} : vector<2x512xf32> to vector<2x1xf32>
    %106 = vector.broadcast %105 : vector<2x1xf32> to vector<2x8xf32>
    %107 = arith.addf %16, %106 : vector<2x8xf32>
    %cst_49 = arith.constant dense<0xFF800000> : vector<2xf32>
    %108 = vector.multi_reduction <maximumf>, %107, %cst_49 [1] : vector<2x8xf32> to vector<2xf32>
    %109 = vector.shape_cast %108 : vector<2xf32> to vector<2x1xf32>
    %110 = vector.broadcast %109 : vector<2x1xf32> to vector<2x8xf32>
    %111 = arith.subf %107, %110 : vector<2x8xf32>
    %112 = math.exp %111 : vector<2x8xf32>
    %cst_50 = arith.constant dense<0.000000e+00> : vector<2xf32>
    %113 = vector.multi_reduction <add>, %112, %cst_50 [1] : vector<2x8xf32> to vector<2xf32>
    %114 = vector.shape_cast %113 : vector<2xf32> to vector<2x1xf32>
    %115 = vector.broadcast %114 : vector<2x1xf32> to vector<2x8xf32>
    %116 = arith.divf %112, %115 : vector<2x8xf32>
    %117 = vector.shape_cast %116 : vector<2x8xf32> to vector<2x8x1xf32>
    %118 = vector.broadcast %117 : vector<2x8x1xf32> to vector<2x8x64xf32>
    %119 = arith.mulf %0, %118 : vector<2x8x64xf32>
    %cst_51 = arith.constant dense<0.000000e+00> : vector<2x64xf32>
    %120 = vector.multi_reduction <add>, %119, %cst_51 [1] : vector<2x8x64xf32> to vector<2x64xf32>
    %121 = vector.broadcast %101 : vector<2x1xi32> to vector<2x128xi32>
    %122 = arith.cmpi eq, %1, %121 : vector<2x128xi32>
    %123 = arith.extui %122 : vector<2x128xi1> to vector<2x128xi32>
    %124 = arith.sitofp %123 : vector<2x128xi32> to vector<2x128xf32>
    %cst_52 = arith.constant dense<0.000000e+00> : vector<2x128xf32>
    %125 = tpu.matmul %124, %17, %cst_52 {dimension_numbers = #tpu.dot_dimension_numbers<[1], [0], [0], [1], [0, 0, 1, 1], [], []>} : vector<2x128xf32>, vector<128x128xf32>, vector<2x128xf32> -> vector<2x128xf32>
    %cst_53 = arith.constant dense<0.000000e+00> : vector<2x128xf32>
    %126 = tpu.matmul %125, %18, %cst_53 {dimension_numbers = #tpu.dot_dimension_numbers<[1], [0], [0], [1], [0, 0, 1, 1], [], []>} : vector<2x128xf32>, vector<128x128xf32>, vector<2x128xf32> -> vector<2x128xf32>
    %cst_54 = arith.constant dense<0.000000e+00> : vector<2x128xf32>
    %127 = tpu.matmul %120, %19, %cst_54 {dimension_numbers = #tpu.dot_dimension_numbers<[1], [0], [0], [1], [0, 0, 1, 1], [], []>} : vector<2x64xf32>, vector<64x128xf32>, vector<2x128xf32> -> vector<2x128xf32>
    %128 = arith.addf %126, %127 : vector<2x128xf32>
    %129 = vector.broadcast %20 : vector<1x128xf32> to vector<2x128xf32>
    %130 = arith.addf %128, %129 : vector<2x128xf32>
    %cst_55 = arith.constant 0.000000e+00 : f32
    %131 = vector.broadcast %cst_55 : f32 to vector<2x128xf32>
    %132 = arith.maximumf %130, %131 : vector<2x128xf32>
    %cst_56 = arith.constant dense<0.000000e+00> : vector<2x384xf32>
    %133 = tpu.matmul %132, %21, %cst_56 {dimension_numbers = #tpu.dot_dimension_numbers<[1], [0], [0], [1], [0, 0, 1, 1], [], []>} : vector<2x128xf32>, vector<128x384xf32>, vector<2x384xf32> -> vector<2x384xf32>
    %134 = vector.broadcast %23 : vector<1x384xf32> to vector<2x384xf32>
    %135 = arith.addf %133, %134 : vector<2x384xf32>
    %136 = vector.extract_strided_slice %135 {offsets = [0, 0], sizes = [2, 128], strides = [1, 1]} : vector<2x384xf32> to vector<2x128xf32>
    %137 = vector.extract_strided_slice %104 {offsets = [0, 0], sizes = [2, 128], strides = [1, 1]} : vector<2x512xf32> to vector<2x128xf32>
    %138 = arith.addf %136, %137 : vector<2x128xf32>
    %139 = arith.negf %138 : vector<2x128xf32>
    %140 = math.exp %139 : vector<2x128xf32>
    %cst_57 = arith.constant 1.000000e+00 : f32
    %141 = vector.broadcast %cst_57 : f32 to vector<2x128xf32>
    %142 = arith.addf %141, %140 : vector<2x128xf32>
    %143 = arith.divf %141, %142 : vector<2x128xf32>
    %144 = vector.extract_strided_slice %135 {offsets = [0, 128], sizes = [2, 128], strides = [1, 1]} : vector<2x384xf32> to vector<2x128xf32>
    %145 = vector.extract_strided_slice %104 {offsets = [0, 128], sizes = [2, 128], strides = [1, 1]} : vector<2x512xf32> to vector<2x128xf32>
    %146 = arith.addf %144, %145 : vector<2x128xf32>
    %147 = arith.negf %146 : vector<2x128xf32>
    %148 = math.exp %147 : vector<2x128xf32>
    %cst_58 = arith.constant 1.000000e+00 : f32
    %149 = vector.broadcast %cst_58 : f32 to vector<2x128xf32>
    %150 = arith.addf %149, %148 : vector<2x128xf32>
    %151 = arith.divf %149, %150 : vector<2x128xf32>
    %152 = vector.extract_strided_slice %135 {offsets = [0, 256], sizes = [2, 128], strides = [1, 1]} : vector<2x384xf32> to vector<2x128xf32>
    %153 = vector.extract_strided_slice %104 {offsets = [0, 256], sizes = [2, 128], strides = [1, 1]} : vector<2x512xf32> to vector<2x128xf32>
    %154 = arith.mulf %143, %153 : vector<2x128xf32>
    %155 = arith.addf %152, %154 : vector<2x128xf32>
    %156 = math.tanh %155 : vector<2x128xf32>
    %cst_59 = arith.constant 1.000000e+00 : f32
    %157 = vector.broadcast %cst_59 : f32 to vector<2x128xf32>
    %158 = arith.subf %157, %151 : vector<2x128xf32>
    %159 = arith.mulf %158, %156 : vector<2x128xf32>
    %160 = arith.mulf %151, %88 : vector<2x128xf32>
    %161 = arith.addf %159, %160 : vector<2x128xf32>
    %cst_60 = arith.constant dense<0.000000e+00> : vector<2x128xf32>
    %162 = tpu.matmul %161, %25, %cst_60 {dimension_numbers = #tpu.dot_dimension_numbers<[1], [0], [0], [1], [0, 0, 1, 1], [], []>} : vector<2x128xf32>, vector<128x128xf32>, vector<2x128xf32> -> vector<2x128xf32>
    %163 = vector.broadcast %26 : vector<1x128xf32> to vector<2x128xf32>
    %164 = arith.addf %162, %163 : vector<2x128xf32>
    %165 = vector.shape_cast %164 : vector<2x128xf32> to vector<2x1x128xf32>
    %c0_61 = arith.constant 0 : index
    %c2 = arith.constant 2 : index
    %c0_62 = arith.constant 0 : index
    %166 = vector.load %arg14[%c0_61, %c2, %c0_62] : memref<2x7x128xf32, #tpu.memory_space<vmem>>, vector<2x1x128xf32>
    tpu.vector_store %arg14[%c0_61, %c2, %c0_62], %165 {strides = array<i32>} : memref<2x7x128xf32, #tpu.memory_space<vmem>>, vector<2x1x128xf32>,
    %cst_63 = arith.constant dense<0xFF800000> : vector<2xf32>
    %167 = vector.multi_reduction <maximumf>, %164, %cst_63 [1] : vector<2x128xf32> to vector<2xf32>
    %168 = vector.shape_cast %167 : vector<2xf32> to vector<2x1xf32>
    %169 = vector.broadcast %168 : vector<2x1xf32> to vector<2x128xf32>
    %170 = arith.cmpf oeq, %164, %169 : vector<2x128xf32>
    %c128_i32_64 = arith.constant 128 : i32
    %171 = vector.broadcast %c128_i32_64 : i32 to vector<2x128xi32>
    %172 = arith.select %170, %1, %171 : vector<2x128xi1>, vector<2x128xi32>
    %cst_65 = arith.constant dense<2147483647> : vector<2xi32>
    %173 = vector.multi_reduction <minsi>, %172, %cst_65 [1] : vector<2x128xi32> to vector<2xi32>
    %174 = vector.shape_cast %173 : vector<2xi32> to vector<2x1xi32>
    %cst_66 = arith.constant dense<0.000000e+00> : vector<2x512xf32>
    %175 = tpu.matmul %161, %22, %cst_66 {dimension_numbers = #tpu.dot_dimension_numbers<[1], [0], [0], [1], [0, 0, 1, 1], [], []>} : vector<2x128xf32>, vector<128x512xf32>, vector<2x512xf32> -> vector<2x512xf32>
    %176 = vector.broadcast %24 : vector<1x512xf32> to vector<2x512xf32>
    %177 = arith.addf %175, %176 : vector<2x512xf32>
    %178 = vector.extract_strided_slice %177 {offsets = [0, 384], sizes = [2, 1], strides = [1, 1]} : vector<2x512xf32> to vector<2x1xf32>
    %179 = vector.broadcast %178 : vector<2x1xf32> to vector<2x8xf32>
    %180 = arith.addf %16, %179 : vector<2x8xf32>
    %cst_67 = arith.constant dense<0xFF800000> : vector<2xf32>
    %181 = vector.multi_reduction <maximumf>, %180, %cst_67 [1] : vector<2x8xf32> to vector<2xf32>
    %182 = vector.shape_cast %181 : vector<2xf32> to vector<2x1xf32>
    %183 = vector.broadcast %182 : vector<2x1xf32> to vector<2x8xf32>
    %184 = arith.subf %180, %183 : vector<2x8xf32>
    %185 = math.exp %184 : vector<2x8xf32>
    %cst_68 = arith.constant dense<0.000000e+00> : vector<2xf32>
    %186 = vector.multi_reduction <add>, %185, %cst_68 [1] : vector<2x8xf32> to vector<2xf32>
    %187 = vector.shape_cast %186 : vector<2xf32> to vector<2x1xf32>
    %188 = vector.broadcast %187 : vector<2x1xf32> to vector<2x8xf32>
    %189 = arith.divf %185, %188 : vector<2x8xf32>
    %190 = vector.shape_cast %189 : vector<2x8xf32> to vector<2x8x1xf32>
    %191 = vector.broadcast %190 : vector<2x8x1xf32> to vector<2x8x64xf32>
    %192 = arith.mulf %0, %191 : vector<2x8x64xf32>
    %cst_69 = arith.constant dense<0.000000e+00> : vector<2x64xf32>
    %193 = vector.multi_reduction <add>, %192, %cst_69 [1] : vector<2x8x64xf32> to vector<2x64xf32>
    %194 = vector.broadcast %174 : vector<2x1xi32> to vector<2x128xi32>
    %195 = arith.cmpi eq, %1, %194 : vector<2x128xi32>
    %196 = arith.extui %195 : vector<2x128xi1> to vector<2x128xi32>
    %197 = arith.sitofp %196 : vector<2x128xi32> to vector<2x128xf32>
    %cst_70 = arith.constant dense<0.000000e+00> : vector<2x128xf32>
    %198 = tpu.matmul %197, %17, %cst_70 {dimension_numbers = #tpu.dot_dimension_numbers<[1], [0], [0], [1], [0, 0, 1, 1], [], []>} : vector<2x128xf32>, vector<128x128xf32>, vector<2x128xf32> -> vector<2x128xf32>
    %cst_71 = arith.constant dense<0.000000e+00> : vector<2x128xf32>
    %199 = tpu.matmul %198, %18, %cst_71 {dimension_numbers = #tpu.dot_dimension_numbers<[1], [0], [0], [1], [0, 0, 1, 1], [], []>} : vector<2x128xf32>, vector<128x128xf32>, vector<2x128xf32> -> vector<2x128xf32>
    %cst_72 = arith.constant dense<0.000000e+00> : vector<2x128xf32>
    %200 = tpu.matmul %193, %19, %cst_72 {dimension_numbers = #tpu.dot_dimension_numbers<[1], [0], [0], [1], [0, 0, 1, 1], [], []>} : vector<2x64xf32>, vector<64x128xf32>, vector<2x128xf32> -> vector<2x128xf32>
    %201 = arith.addf %199, %200 : vector<2x128xf32>
    %202 = vector.broadcast %20 : vector<1x128xf32> to vector<2x128xf32>
    %203 = arith.addf %201, %202 : vector<2x128xf32>
    %cst_73 = arith.constant 0.000000e+00 : f32
    %204 = vector.broadcast %cst_73 : f32 to vector<2x128xf32>
    %205 = arith.maximumf %203, %204 : vector<2x128xf32>
    %cst_74 = arith.constant dense<0.000000e+00> : vector<2x384xf32>
    %206 = tpu.matmul %205, %21, %cst_74 {dimension_numbers = #tpu.dot_dimension_numbers<[1], [0], [0], [1], [0, 0, 1, 1], [], []>} : vector<2x128xf32>, vector<128x384xf32>, vector<2x384xf32> -> vector<2x384xf32>
    %207 = vector.broadcast %23 : vector<1x384xf32> to vector<2x384xf32>
    %208 = arith.addf %206, %207 : vector<2x384xf32>
    %209 = vector.extract_strided_slice %208 {offsets = [0, 0], sizes = [2, 128], strides = [1, 1]} : vector<2x384xf32> to vector<2x128xf32>
    %210 = vector.extract_strided_slice %177 {offsets = [0, 0], sizes = [2, 128], strides = [1, 1]} : vector<2x512xf32> to vector<2x128xf32>
    %211 = arith.addf %209, %210 : vector<2x128xf32>
    %212 = arith.negf %211 : vector<2x128xf32>
    %213 = math.exp %212 : vector<2x128xf32>
    %cst_75 = arith.constant 1.000000e+00 : f32
    %214 = vector.broadcast %cst_75 : f32 to vector<2x128xf32>
    %215 = arith.addf %214, %213 : vector<2x128xf32>
    %216 = arith.divf %214, %215 : vector<2x128xf32>
    %217 = vector.extract_strided_slice %208 {offsets = [0, 128], sizes = [2, 128], strides = [1, 1]} : vector<2x384xf32> to vector<2x128xf32>
    %218 = vector.extract_strided_slice %177 {offsets = [0, 128], sizes = [2, 128], strides = [1, 1]} : vector<2x512xf32> to vector<2x128xf32>
    %219 = arith.addf %217, %218 : vector<2x128xf32>
    %220 = arith.negf %219 : vector<2x128xf32>
    %221 = math.exp %220 : vector<2x128xf32>
    %cst_76 = arith.constant 1.000000e+00 : f32
    %222 = vector.broadcast %cst_76 : f32 to vector<2x128xf32>
    %223 = arith.addf %222, %221 : vector<2x128xf32>
    %224 = arith.divf %222, %223 : vector<2x128xf32>
    %225 = vector.extract_strided_slice %208 {offsets = [0, 256], sizes = [2, 128], strides = [1, 1]} : vector<2x384xf32> to vector<2x128xf32>
    %226 = vector.extract_strided_slice %177 {offsets = [0, 256], sizes = [2, 128], strides = [1, 1]} : vector<2x512xf32> to vector<2x128xf32>
    %227 = arith.mulf %216, %226 : vector<2x128xf32>
    %228 = arith.addf %225, %227 : vector<2x128xf32>
    %229 = math.tanh %228 : vector<2x128xf32>
    %cst_77 = arith.constant 1.000000e+00 : f32
    %230 = vector.broadcast %cst_77 : f32 to vector<2x128xf32>
    %231 = arith.subf %230, %224 : vector<2x128xf32>
    %232 = arith.mulf %231, %229 : vector<2x128xf32>
    %233 = arith.mulf %224, %161 : vector<2x128xf32>
    %234 = arith.addf %232, %233 : vector<2x128xf32>
    %cst_78 = arith.constant dense<0.000000e+00> : vector<2x128xf32>
    %235 = tpu.matmul %234, %25, %cst_78 {dimension_numbers = #tpu.dot_dimension_numbers<[1], [0], [0], [1], [0, 0, 1, 1], [], []>} : vector<2x128xf32>, vector<128x128xf32>, vector<2x128xf32> -> vector<2x128xf32>
    %236 = vector.broadcast %26 : vector<1x128xf32> to vector<2x128xf32>
    %237 = arith.addf %235, %236 : vector<2x128xf32>
    %238 = vector.shape_cast %237 : vector<2x128xf32> to vector<2x1x128xf32>
    %c0_79 = arith.constant 0 : index
    %c3 = arith.constant 3 : index
    %c0_80 = arith.constant 0 : index
    %239 = vector.load %arg14[%c0_79, %c3, %c0_80] : memref<2x7x128xf32, #tpu.memory_space<vmem>>, vector<2x1x128xf32>
    tpu.vector_store %arg14[%c0_79, %c3, %c0_80], %238 {strides = array<i32>} : memref<2x7x128xf32, #tpu.memory_space<vmem>>, vector<2x1x128xf32>,
    %cst_81 = arith.constant dense<0xFF800000> : vector<2xf32>
    %240 = vector.multi_reduction <maximumf>, %237, %cst_81 [1] : vector<2x128xf32> to vector<2xf32>
    %241 = vector.shape_cast %240 : vector<2xf32> to vector<2x1xf32>
    %242 = vector.broadcast %241 : vector<2x1xf32> to vector<2x128xf32>
    %243 = arith.cmpf oeq, %237, %242 : vector<2x128xf32>
    %c128_i32_82 = arith.constant 128 : i32
    %244 = vector.broadcast %c128_i32_82 : i32 to vector<2x128xi32>
    %245 = arith.select %243, %1, %244 : vector<2x128xi1>, vector<2x128xi32>
    %cst_83 = arith.constant dense<2147483647> : vector<2xi32>
    %246 = vector.multi_reduction <minsi>, %245, %cst_83 [1] : vector<2x128xi32> to vector<2xi32>
    %247 = vector.shape_cast %246 : vector<2xi32> to vector<2x1xi32>
    %cst_84 = arith.constant dense<0.000000e+00> : vector<2x512xf32>
    %248 = tpu.matmul %234, %22, %cst_84 {dimension_numbers = #tpu.dot_dimension_numbers<[1], [0], [0], [1], [0, 0, 1, 1], [], []>} : vector<2x128xf32>, vector<128x512xf32>, vector<2x512xf32> -> vector<2x512xf32>
    %249 = vector.broadcast %24 : vector<1x512xf32> to vector<2x512xf32>
    %250 = arith.addf %248, %249 : vector<2x512xf32>
    %251 = vector.extract_strided_slice %250 {offsets = [0, 384], sizes = [2, 1], strides = [1, 1]} : vector<2x512xf32> to vector<2x1xf32>
    %252 = vector.broadcast %251 : vector<2x1xf32> to vector<2x8xf32>
    %253 = arith.addf %16, %252 : vector<2x8xf32>
    %cst_85 = arith.constant dense<0xFF800000> : vector<2xf32>
    %254 = vector.multi_reduction <maximumf>, %253, %cst_85 [1] : vector<2x8xf32> to vector<2xf32>
    %255 = vector.shape_cast %254 : vector<2xf32> to vector<2x1xf32>
    %256 = vector.broadcast %255 : vector<2x1xf32> to vector<2x8xf32>
    %257 = arith.subf %253, %256 : vector<2x8xf32>
    %258 = math.exp %257 : vector<2x8xf32>
    %cst_86 = arith.constant dense<0.000000e+00> : vector<2xf32>
    %259 = vector.multi_reduction <add>, %258, %cst_86 [1] : vector<2x8xf32> to vector<2xf32>
    %260 = vector.shape_cast %259 : vector<2xf32> to vector<2x1xf32>
    %261 = vector.broadcast %260 : vector<2x1xf32> to vector<2x8xf32>
    %262 = arith.divf %258, %261 : vector<2x8xf32>
    %263 = vector.shape_cast %262 : vector<2x8xf32> to vector<2x8x1xf32>
    %264 = vector.broadcast %263 : vector<2x8x1xf32> to vector<2x8x64xf32>
    %265 = arith.mulf %0, %264 : vector<2x8x64xf32>
    %cst_87 = arith.constant dense<0.000000e+00> : vector<2x64xf32>
    %266 = vector.multi_reduction <add>, %265, %cst_87 [1] : vector<2x8x64xf32> to vector<2x64xf32>
    %267 = vector.broadcast %247 : vector<2x1xi32> to vector<2x128xi32>
    %268 = arith.cmpi eq, %1, %267 : vector<2x128xi32>
    %269 = arith.extui %268 : vector<2x128xi1> to vector<2x128xi32>
    %270 = arith.sitofp %269 : vector<2x128xi32> to vector<2x128xf32>
    %cst_88 = arith.constant dense<0.000000e+00> : vector<2x128xf32>
    %271 = tpu.matmul %270, %17, %cst_88 {dimension_numbers = #tpu.dot_dimension_numbers<[1], [0], [0], [1], [0, 0, 1, 1], [], []>} : vector<2x128xf32>, vector<128x128xf32>, vector<2x128xf32> -> vector<2x128xf32>
    %cst_89 = arith.constant dense<0.000000e+00> : vector<2x128xf32>
    %272 = tpu.matmul %271, %18, %cst_89 {dimension_numbers = #tpu.dot_dimension_numbers<[1], [0], [0], [1], [0, 0, 1, 1], [], []>} : vector<2x128xf32>, vector<128x128xf32>, vector<2x128xf32> -> vector<2x128xf32>
    %cst_90 = arith.constant dense<0.000000e+00> : vector<2x128xf32>
    %273 = tpu.matmul %266, %19, %cst_90 {dimension_numbers = #tpu.dot_dimension_numbers<[1], [0], [0], [1], [0, 0, 1, 1], [], []>} : vector<2x64xf32>, vector<64x128xf32>, vector<2x128xf32> -> vector<2x128xf32>
    %274 = arith.addf %272, %273 : vector<2x128xf32>
    %275 = vector.broadcast %20 : vector<1x128xf32> to vector<2x128xf32>
    %276 = arith.addf %274, %275 : vector<2x128xf32>
    %cst_91 = arith.constant 0.000000e+00 : f32
    %277 = vector.broadcast %cst_91 : f32 to vector<2x128xf32>
    %278 = arith.maximumf %276, %277 : vector<2x128xf32>
    %cst_92 = arith.constant dense<0.000000e+00> : vector<2x384xf32>
    %279 = tpu.matmul %278, %21, %cst_92 {dimension_numbers = #tpu.dot_dimension_numbers<[1], [0], [0], [1], [0, 0, 1, 1], [], []>} : vector<2x128xf32>, vector<128x384xf32>, vector<2x384xf32> -> vector<2x384xf32>
    %280 = vector.broadcast %23 : vector<1x384xf32> to vector<2x384xf32>
    %281 = arith.addf %279, %280 : vector<2x384xf32>
    %282 = vector.extract_strided_slice %281 {offsets = [0, 0], sizes = [2, 128], strides = [1, 1]} : vector<2x384xf32> to vector<2x128xf32>
    %283 = vector.extract_strided_slice %250 {offsets = [0, 0], sizes = [2, 128], strides = [1, 1]} : vector<2x512xf32> to vector<2x128xf32>
    %284 = arith.addf %282, %283 : vector<2x128xf32>
    %285 = arith.negf %284 : vector<2x128xf32>
    %286 = math.exp %285 : vector<2x128xf32>
    %cst_93 = arith.constant 1.000000e+00 : f32
    %287 = vector.broadcast %cst_93 : f32 to vector<2x128xf32>
    %288 = arith.addf %287, %286 : vector<2x128xf32>
    %289 = arith.divf %287, %288 : vector<2x128xf32>
    %290 = vector.extract_strided_slice %281 {offsets = [0, 128], sizes = [2, 128], strides = [1, 1]} : vector<2x384xf32> to vector<2x128xf32>
    %291 = vector.extract_strided_slice %250 {offsets = [0, 128], sizes = [2, 128], strides = [1, 1]} : vector<2x512xf32> to vector<2x128xf32>
    %292 = arith.addf %290, %291 : vector<2x128xf32>
    %293 = arith.negf %292 : vector<2x128xf32>
    %294 = math.exp %293 : vector<2x128xf32>
    %cst_94 = arith.constant 1.000000e+00 : f32
    %295 = vector.broadcast %cst_94 : f32 to vector<2x128xf32>
    %296 = arith.addf %295, %294 : vector<2x128xf32>
    %297 = arith.divf %295, %296 : vector<2x128xf32>
    %298 = vector.extract_strided_slice %281 {offsets = [0, 256], sizes = [2, 128], strides = [1, 1]} : vector<2x384xf32> to vector<2x128xf32>
    %299 = vector.extract_strided_slice %250 {offsets = [0, 256], sizes = [2, 128], strides = [1, 1]} : vector<2x512xf32> to vector<2x128xf32>
    %300 = arith.mulf %289, %299 : vector<2x128xf32>
    %301 = arith.addf %298, %300 : vector<2x128xf32>
    %302 = math.tanh %301 : vector<2x128xf32>
    %cst_95 = arith.constant 1.000000e+00 : f32
    %303 = vector.broadcast %cst_95 : f32 to vector<2x128xf32>
    %304 = arith.subf %303, %297 : vector<2x128xf32>
    %305 = arith.mulf %304, %302 : vector<2x128xf32>
    %306 = arith.mulf %297, %234 : vector<2x128xf32>
    %307 = arith.addf %305, %306 : vector<2x128xf32>
    %cst_96 = arith.constant dense<0.000000e+00> : vector<2x128xf32>
    %308 = tpu.matmul %307, %25, %cst_96 {dimension_numbers = #tpu.dot_dimension_numbers<[1], [0], [0], [1], [0, 0, 1, 1], [], []>} : vector<2x128xf32>, vector<128x128xf32>, vector<2x128xf32> -> vector<2x128xf32>
    %309 = vector.broadcast %26 : vector<1x128xf32> to vector<2x128xf32>
    %310 = arith.addf %308, %309 : vector<2x128xf32>
    %311 = vector.shape_cast %310 : vector<2x128xf32> to vector<2x1x128xf32>
    %c0_97 = arith.constant 0 : index
    %c4 = arith.constant 4 : index
    %c0_98 = arith.constant 0 : index
    %312 = vector.load %arg14[%c0_97, %c4, %c0_98] : memref<2x7x128xf32, #tpu.memory_space<vmem>>, vector<2x1x128xf32>
    tpu.vector_store %arg14[%c0_97, %c4, %c0_98], %311 {strides = array<i32>} : memref<2x7x128xf32, #tpu.memory_space<vmem>>, vector<2x1x128xf32>,
    %cst_99 = arith.constant dense<0xFF800000> : vector<2xf32>
    %313 = vector.multi_reduction <maximumf>, %310, %cst_99 [1] : vector<2x128xf32> to vector<2xf32>
    %314 = vector.shape_cast %313 : vector<2xf32> to vector<2x1xf32>
    %315 = vector.broadcast %314 : vector<2x1xf32> to vector<2x128xf32>
    %316 = arith.cmpf oeq, %310, %315 : vector<2x128xf32>
    %c128_i32_100 = arith.constant 128 : i32
    %317 = vector.broadcast %c128_i32_100 : i32 to vector<2x128xi32>
    %318 = arith.select %316, %1, %317 : vector<2x128xi1>, vector<2x128xi32>
    %cst_101 = arith.constant dense<2147483647> : vector<2xi32>
    %319 = vector.multi_reduction <minsi>, %318, %cst_101 [1] : vector<2x128xi32> to vector<2xi32>
    %320 = vector.shape_cast %319 : vector<2xi32> to vector<2x1xi32>
    %cst_102 = arith.constant dense<0.000000e+00> : vector<2x512xf32>
    %321 = tpu.matmul %307, %22, %cst_102 {dimension_numbers = #tpu.dot_dimension_numbers<[1], [0], [0], [1], [0, 0, 1, 1], [], []>} : vector<2x128xf32>, vector<128x512xf32>, vector<2x512xf32> -> vector<2x512xf32>
    %322 = vector.broadcast %24 : vector<1x512xf32> to vector<2x512xf32>
    %323 = arith.addf %321, %322 : vector<2x512xf32>
    %324 = vector.extract_strided_slice %323 {offsets = [0, 384], sizes = [2, 1], strides = [1, 1]} : vector<2x512xf32> to vector<2x1xf32>
    %325 = vector.broadcast %324 : vector<2x1xf32> to vector<2x8xf32>
    %326 = arith.addf %16, %325 : vector<2x8xf32>
    %cst_103 = arith.constant dense<0xFF800000> : vector<2xf32>
    %327 = vector.multi_reduction <maximumf>, %326, %cst_103 [1] : vector<2x8xf32> to vector<2xf32>
    %328 = vector.shape_cast %327 : vector<2xf32> to vector<2x1xf32>
    %329 = vector.broadcast %328 : vector<2x1xf32> to vector<2x8xf32>
    %330 = arith.subf %326, %329 : vector<2x8xf32>
    %331 = math.exp %330 : vector<2x8xf32>
    %cst_104 = arith.constant dense<0.000000e+00> : vector<2xf32>
    %332 = vector.multi_reduction <add>, %331, %cst_104 [1] : vector<2x8xf32> to vector<2xf32>
    %333 = vector.shape_cast %332 : vector<2xf32> to vector<2x1xf32>
    %334 = vector.broadcast %333 : vector<2x1xf32> to vector<2x8xf32>
    %335 = arith.divf %331, %334 : vector<2x8xf32>
    %336 = vector.shape_cast %335 : vector<2x8xf32> to vector<2x8x1xf32>
    %337 = vector.broadcast %336 : vector<2x8x1xf32> to vector<2x8x64xf32>
    %338 = arith.mulf %0, %337 : vector<2x8x64xf32>
    %cst_105 = arith.constant dense<0.000000e+00> : vector<2x64xf32>
    %339 = vector.multi_reduction <add>, %338, %cst_105 [1] : vector<2x8x64xf32> to vector<2x64xf32>
    %340 = vector.broadcast %320 : vector<2x1xi32> to vector<2x128xi32>
    %341 = arith.cmpi eq, %1, %340 : vector<2x128xi32>
    %342 = arith.extui %341 : vector<2x128xi1> to vector<2x128xi32>
    %343 = arith.sitofp %342 : vector<2x128xi32> to vector<2x128xf32>
    %cst_106 = arith.constant dense<0.000000e+00> : vector<2x128xf32>
    %344 = tpu.matmul %343, %17, %cst_106 {dimension_numbers = #tpu.dot_dimension_numbers<[1], [0], [0], [1], [0, 0, 1, 1], [], []>} : vector<2x128xf32>, vector<128x128xf32>, vector<2x128xf32> -> vector<2x128xf32>
    %cst_107 = arith.constant dense<0.000000e+00> : vector<2x128xf32>
    %345 = tpu.matmul %344, %18, %cst_107 {dimension_numbers = #tpu.dot_dimension_numbers<[1], [0], [0], [1], [0, 0, 1, 1], [], []>} : vector<2x128xf32>, vector<128x128xf32>, vector<2x128xf32> -> vector<2x128xf32>
    %cst_108 = arith.constant dense<0.000000e+00> : vector<2x128xf32>
    %346 = tpu.matmul %339, %19, %cst_108 {dimension_numbers = #tpu.dot_dimension_numbers<[1], [0], [0], [1], [0, 0, 1, 1], [], []>} : vector<2x64xf32>, vector<64x128xf32>, vector<2x128xf32> -> vector<2x128xf32>
    %347 = arith.addf %345, %346 : vector<2x128xf32>
    %348 = vector.broadcast %20 : vector<1x128xf32> to vector<2x128xf32>
    %349 = arith.addf %347, %348 : vector<2x128xf32>
    %cst_109 = arith.constant 0.000000e+00 : f32
    %350 = vector.broadcast %cst_109 : f32 to vector<2x128xf32>
    %351 = arith.maximumf %349, %350 : vector<2x128xf32>
    %cst_110 = arith.constant dense<0.000000e+00> : vector<2x384xf32>
    %352 = tpu.matmul %351, %21, %cst_110 {dimension_numbers = #tpu.dot_dimension_numbers<[1], [0], [0], [1], [0, 0, 1, 1], [], []>} : vector<2x128xf32>, vector<128x384xf32>, vector<2x384xf32> -> vector<2x384xf32>
    %353 = vector.broadcast %23 : vector<1x384xf32> to vector<2x384xf32>
    %354 = arith.addf %352, %353 : vector<2x384xf32>
    %355 = vector.extract_strided_slice %354 {offsets = [0, 0], sizes = [2, 128], strides = [1, 1]} : vector<2x384xf32> to vector<2x128xf32>
    %356 = vector.extract_strided_slice %323 {offsets = [0, 0], sizes = [2, 128], strides = [1, 1]} : vector<2x512xf32> to vector<2x128xf32>
    %357 = arith.addf %355, %356 : vector<2x128xf32>
    %358 = arith.negf %357 : vector<2x128xf32>
    %359 = math.exp %358 : vector<2x128xf32>
    %cst_111 = arith.constant 1.000000e+00 : f32
    %360 = vector.broadcast %cst_111 : f32 to vector<2x128xf32>
    %361 = arith.addf %360, %359 : vector<2x128xf32>
    %362 = arith.divf %360, %361 : vector<2x128xf32>
    %363 = vector.extract_strided_slice %354 {offsets = [0, 128], sizes = [2, 128], strides = [1, 1]} : vector<2x384xf32> to vector<2x128xf32>
    %364 = vector.extract_strided_slice %323 {offsets = [0, 128], sizes = [2, 128], strides = [1, 1]} : vector<2x512xf32> to vector<2x128xf32>
    %365 = arith.addf %363, %364 : vector<2x128xf32>
    %366 = arith.negf %365 : vector<2x128xf32>
    %367 = math.exp %366 : vector<2x128xf32>
    %cst_112 = arith.constant 1.000000e+00 : f32
    %368 = vector.broadcast %cst_112 : f32 to vector<2x128xf32>
    %369 = arith.addf %368, %367 : vector<2x128xf32>
    %370 = arith.divf %368, %369 : vector<2x128xf32>
    %371 = vector.extract_strided_slice %354 {offsets = [0, 256], sizes = [2, 128], strides = [1, 1]} : vector<2x384xf32> to vector<2x128xf32>
    %372 = vector.extract_strided_slice %323 {offsets = [0, 256], sizes = [2, 128], strides = [1, 1]} : vector<2x512xf32> to vector<2x128xf32>
    %373 = arith.mulf %362, %372 : vector<2x128xf32>
    %374 = arith.addf %371, %373 : vector<2x128xf32>
    %375 = math.tanh %374 : vector<2x128xf32>
    %cst_113 = arith.constant 1.000000e+00 : f32
    %376 = vector.broadcast %cst_113 : f32 to vector<2x128xf32>
    %377 = arith.subf %376, %370 : vector<2x128xf32>
    %378 = arith.mulf %377, %375 : vector<2x128xf32>
    %379 = arith.mulf %370, %307 : vector<2x128xf32>
    %380 = arith.addf %378, %379 : vector<2x128xf32>
    %cst_114 = arith.constant dense<0.000000e+00> : vector<2x128xf32>
    %381 = tpu.matmul %380, %25, %cst_114 {dimension_numbers = #tpu.dot_dimension_numbers<[1], [0], [0], [1], [0, 0, 1, 1], [], []>} : vector<2x128xf32>, vector<128x128xf32>, vector<2x128xf32> -> vector<2x128xf32>
    %382 = vector.broadcast %26 : vector<1x128xf32> to vector<2x128xf32>
    %383 = arith.addf %381, %382 : vector<2x128xf32>
    %384 = vector.shape_cast %383 : vector<2x128xf32> to vector<2x1x128xf32>
    %c0_115 = arith.constant 0 : index
    %c5 = arith.constant 5 : index
    %c0_116 = arith.constant 0 : index
    %385 = vector.load %arg14[%c0_115, %c5, %c0_116] : memref<2x7x128xf32, #tpu.memory_space<vmem>>, vector<2x1x128xf32>
    tpu.vector_store %arg14[%c0_115, %c5, %c0_116], %384 {strides = array<i32>} : memref<2x7x128xf32, #tpu.memory_space<vmem>>, vector<2x1x128xf32>,
    %cst_117 = arith.constant dense<0xFF800000> : vector<2xf32>
    %386 = vector.multi_reduction <maximumf>, %383, %cst_117 [1] : vector<2x128xf32> to vector<2xf32>
    %387 = vector.shape_cast %386 : vector<2xf32> to vector<2x1xf32>
    %388 = vector.broadcast %387 : vector<2x1xf32> to vector<2x128xf32>
    %389 = arith.cmpf oeq, %383, %388 : vector<2x128xf32>
    %c128_i32_118 = arith.constant 128 : i32
    %390 = vector.broadcast %c128_i32_118 : i32 to vector<2x128xi32>
    %391 = arith.select %389, %1, %390 : vector<2x128xi1>, vector<2x128xi32>
    %cst_119 = arith.constant dense<2147483647> : vector<2xi32>
    %392 = vector.multi_reduction <minsi>, %391, %cst_119 [1] : vector<2x128xi32> to vector<2xi32>
    %393 = vector.shape_cast %392 : vector<2xi32> to vector<2x1xi32>
    %cst_120 = arith.constant dense<0.000000e+00> : vector<2x512xf32>
    %394 = tpu.matmul %380, %22, %cst_120 {dimension_numbers = #tpu.dot_dimension_numbers<[1], [0], [0], [1], [0, 0, 1, 1], [], []>} : vector<2x128xf32>, vector<128x512xf32>, vector<2x512xf32> -> vector<2x512xf32>
    %395 = vector.broadcast %24 : vector<1x512xf32> to vector<2x512xf32>
    %396 = arith.addf %394, %395 : vector<2x512xf32>
    %397 = vector.extract_strided_slice %396 {offsets = [0, 384], sizes = [2, 1], strides = [1, 1]} : vector<2x512xf32> to vector<2x1xf32>
    %398 = vector.broadcast %397 : vector<2x1xf32> to vector<2x8xf32>
    %399 = arith.addf %16, %398 : vector<2x8xf32>
    %cst_121 = arith.constant dense<0xFF800000> : vector<2xf32>
    %400 = vector.multi_reduction <maximumf>, %399, %cst_121 [1] : vector<2x8xf32> to vector<2xf32>
    %401 = vector.shape_cast %400 : vector<2xf32> to vector<2x1xf32>
    %402 = vector.broadcast %401 : vector<2x1xf32> to vector<2x8xf32>
    %403 = arith.subf %399, %402 : vector<2x8xf32>
    %404 = math.exp %403 : vector<2x8xf32>
    %cst_122 = arith.constant dense<0.000000e+00> : vector<2xf32>
    %405 = vector.multi_reduction <add>, %404, %cst_122 [1] : vector<2x8xf32> to vector<2xf32>
    %406 = vector.shape_cast %405 : vector<2xf32> to vector<2x1xf32>
    %407 = vector.broadcast %406 : vector<2x1xf32> to vector<2x8xf32>
    %408 = arith.divf %404, %407 : vector<2x8xf32>
    %409 = vector.shape_cast %408 : vector<2x8xf32> to vector<2x8x1xf32>
    %410 = vector.broadcast %409 : vector<2x8x1xf32> to vector<2x8x64xf32>
    %411 = arith.mulf %0, %410 : vector<2x8x64xf32>
    %cst_123 = arith.constant dense<0.000000e+00> : vector<2x64xf32>
    %412 = vector.multi_reduction <add>, %411, %cst_123 [1] : vector<2x8x64xf32> to vector<2x64xf32>
    %413 = vector.broadcast %393 : vector<2x1xi32> to vector<2x128xi32>
    %414 = arith.cmpi eq, %1, %413 : vector<2x128xi32>
    %415 = arith.extui %414 : vector<2x128xi1> to vector<2x128xi32>
    %416 = arith.sitofp %415 : vector<2x128xi32> to vector<2x128xf32>
    %cst_124 = arith.constant dense<0.000000e+00> : vector<2x128xf32>
    %417 = tpu.matmul %416, %17, %cst_124 {dimension_numbers = #tpu.dot_dimension_numbers<[1], [0], [0], [1], [0, 0, 1, 1], [], []>} : vector<2x128xf32>, vector<128x128xf32>, vector<2x128xf32> -> vector<2x128xf32>
    %cst_125 = arith.constant dense<0.000000e+00> : vector<2x128xf32>
    %418 = tpu.matmul %417, %18, %cst_125 {dimension_numbers = #tpu.dot_dimension_numbers<[1], [0], [0], [1], [0, 0, 1, 1], [], []>} : vector<2x128xf32>, vector<128x128xf32>, vector<2x128xf32> -> vector<2x128xf32>
    %cst_126 = arith.constant dense<0.000000e+00> : vector<2x128xf32>
    %419 = tpu.matmul %412, %19, %cst_126 {dimension_numbers = #tpu.dot_dimension_numbers<[1], [0], [0], [1], [0, 0, 1, 1], [], []>} : vector<2x64xf32>, vector<64x128xf32>, vector<2x128xf32> -> vector<2x128xf32>
    %420 = arith.addf %418, %419 : vector<2x128xf32>
    %421 = vector.broadcast %20 : vector<1x128xf32> to vector<2x128xf32>
    %422 = arith.addf %420, %421 : vector<2x128xf32>
    %cst_127 = arith.constant 0.000000e+00 : f32
    %423 = vector.broadcast %cst_127 : f32 to vector<2x128xf32>
    %424 = arith.maximumf %422, %423 : vector<2x128xf32>
    %cst_128 = arith.constant dense<0.000000e+00> : vector<2x384xf32>
    %425 = tpu.matmul %424, %21, %cst_128 {dimension_numbers = #tpu.dot_dimension_numbers<[1], [0], [0], [1], [0, 0, 1, 1], [], []>} : vector<2x128xf32>, vector<128x384xf32>, vector<2x384xf32> -> vector<2x384xf32>
    %426 = vector.broadcast %23 : vector<1x384xf32> to vector<2x384xf32>
    %427 = arith.addf %425, %426 : vector<2x384xf32>
    %428 = vector.extract_strided_slice %427 {offsets = [0, 0], sizes = [2, 128], strides = [1, 1]} : vector<2x384xf32> to vector<2x128xf32>
    %429 = vector.extract_strided_slice %396 {offsets = [0, 0], sizes = [2, 128], strides = [1, 1]} : vector<2x512xf32> to vector<2x128xf32>
    %430 = arith.addf %428, %429 : vector<2x128xf32>
    %431 = arith.negf %430 : vector<2x128xf32>
    %432 = math.exp %431 : vector<2x128xf32>
    %cst_129 = arith.constant 1.000000e+00 : f32
    %433 = vector.broadcast %cst_129 : f32 to vector<2x128xf32>
    %434 = arith.addf %433, %432 : vector<2x128xf32>
    %435 = arith.divf %433, %434 : vector<2x128xf32>
    %436 = vector.extract_strided_slice %427 {offsets = [0, 128], sizes = [2, 128], strides = [1, 1]} : vector<2x384xf32> to vector<2x128xf32>
    %437 = vector.extract_strided_slice %396 {offsets = [0, 128], sizes = [2, 128], strides = [1, 1]} : vector<2x512xf32> to vector<2x128xf32>
    %438 = arith.addf %436, %437 : vector<2x128xf32>
    %439 = arith.negf %438 : vector<2x128xf32>
    %440 = math.exp %439 : vector<2x128xf32>
    %cst_130 = arith.constant 1.000000e+00 : f32
    %441 = vector.broadcast %cst_130 : f32 to vector<2x128xf32>
    %442 = arith.addf %441, %440 : vector<2x128xf32>
    %443 = arith.divf %441, %442 : vector<2x128xf32>
    %444 = vector.extract_strided_slice %427 {offsets = [0, 256], sizes = [2, 128], strides = [1, 1]} : vector<2x384xf32> to vector<2x128xf32>
    %445 = vector.extract_strided_slice %396 {offsets = [0, 256], sizes = [2, 128], strides = [1, 1]} : vector<2x512xf32> to vector<2x128xf32>
    %446 = arith.mulf %435, %445 : vector<2x128xf32>
    %447 = arith.addf %444, %446 : vector<2x128xf32>
    %448 = math.tanh %447 : vector<2x128xf32>
    %cst_131 = arith.constant 1.000000e+00 : f32
    %449 = vector.broadcast %cst_131 : f32 to vector<2x128xf32>
    %450 = arith.subf %449, %443 : vector<2x128xf32>
    %451 = arith.mulf %450, %448 : vector<2x128xf32>
    %452 = arith.mulf %443, %380 : vector<2x128xf32>
    %453 = arith.addf %451, %452 : vector<2x128xf32>
    %cst_132 = arith.constant dense<0.000000e+00> : vector<2x128xf32>
    %454 = tpu.matmul %453, %25, %cst_132 {dimension_numbers = #tpu.dot_dimension_numbers<[1], [0], [0], [1], [0, 0, 1, 1], [], []>} : vector<2x128xf32>, vector<128x128xf32>, vector<2x128xf32> -> vector<2x128xf32>
    %455 = vector.broadcast %26 : vector<1x128xf32> to vector<2x128xf32>
    %456 = arith.addf %454, %455 : vector<2x128xf32>
    %457 = vector.shape_cast %456 : vector<2x128xf32> to vector<2x1x128xf32>
    %c0_133 = arith.constant 0 : index
    %c6 = arith.constant 6 : index
    %c0_134 = arith.constant 0 : index
    %458 = vector.load %arg14[%c0_133, %c6, %c0_134] : memref<2x7x128xf32, #tpu.memory_space<vmem>>, vector<2x1x128xf32>
    tpu.vector_store %arg14[%c0_133, %c6, %c0_134], %457 {strides = array<i32>} : memref<2x7x128xf32, #tpu.memory_space<vmem>>, vector<2x1x128xf32>,
    return
  }
  func.func @transform_0(%arg0: i32) -> (i32, i32, i32) {
    %c0_i32 = arith.constant 0 : i32
    %c0_i32_0 = arith.constant 0 : i32
    %c0_i32_1 = arith.constant 0 : i32
    return %arg0, %c0_i32, %c0_i32_0 : i32, i32, i32
  }
  func.func @transform_1(%arg0: i32) -> (i32, i32) {
    %c0_i32 = arith.constant 0 : i32
    %c0_i32_0 = arith.constant 0 : i32
    %c0_i32_1 = arith.constant 0 : i32
    return %c0_i32, %c0_i32_0 : i32, i32
  }
  func.func @transform_2(%arg0: i32) -> (i32, i32) {
    %c0_i32 = arith.constant 0 : i32
    %c0_i32_0 = arith.constant 0 : i32
    %c0_i32_1 = arith.constant 0 : i32
    return %c0_i32, %c0_i32_0 : i32, i32
  }
  func.func @transform_3(%arg0: i32) -> (i32, i32) {
    %c0_i32 = arith.constant 0 : i32
    %c0_i32_0 = arith.constant 0 : i32
    %c0_i32_1 = arith.constant 0 : i32
    return %c0_i32, %c0_i32_0 : i32, i32
  }
  func.func @transform_4(%arg0: i32) -> (i32, i32) {
    %c0_i32 = arith.constant 0 : i32
    %c0_i32_0 = arith.constant 0 : i32
    %c0_i32_1 = arith.constant 0 : i32
    return %c0_i32, %c0_i32_0 : i32, i32
  }
  func.func @transform_5(%arg0: i32) -> (i32, i32) {
    %c0_i32 = arith.constant 0 : i32
    %c0_i32_0 = arith.constant 0 : i32
    %c0_i32_1 = arith.constant 0 : i32
    return %c0_i32, %c0_i32_0 : i32, i32
  }
  func.func @transform_6(%arg0: i32) -> (i32, i32) {
    %c0_i32 = arith.constant 0 : i32
    %c0_i32_0 = arith.constant 0 : i32
    %c0_i32_1 = arith.constant 0 : i32
    return %c0_i32, %c0_i32_0 : i32, i32
  }
  func.func @transform_7(%arg0: i32) -> (i32, i32) {
    %c0_i32 = arith.constant 0 : i32
    %c0_i32_0 = arith.constant 0 : i32
    %c0_i32_1 = arith.constant 0 : i32
    return %c0_i32, %c0_i32_0 : i32, i32
  }
  func.func @transform_8(%arg0: i32) -> (i32, i32) {
    %c0_i32 = arith.constant 0 : i32
    %c0_i32_0 = arith.constant 0 : i32
    %c0_i32_1 = arith.constant 0 : i32
    return %c0_i32, %c0_i32_0 : i32, i32
  }
  func.func @transform_9(%arg0: i32) -> (i32, i32) {
    %c0_i32 = arith.constant 0 : i32
    %c0_i32_0 = arith.constant 0 : i32
    %c0_i32_1 = arith.constant 0 : i32
    return %c0_i32, %c0_i32_0 : i32, i32
  }
  func.func @transform_10(%arg0: i32) -> (i32, i32) {
    %c0_i32 = arith.constant 0 : i32
    %c0_i32_0 = arith.constant 0 : i32
    %c0_i32_1 = arith.constant 0 : i32
    return %c0_i32, %c0_i32_0 : i32, i32
  }
  func.func @transform_11(%arg0: i32) -> (i32, i32) {
    %c0_i32 = arith.constant 0 : i32
    %c0_i32_0 = arith.constant 0 : i32
    %c0_i32_1 = arith.constant 0 : i32
    return %c0_i32, %c0_i32_0 : i32, i32
  }
  func.func @transform_12(%arg0: i32) -> (i32, i32) {
    %c0_i32 = arith.constant 0 : i32
    %c0_i32_0 = arith.constant 0 : i32
    %c0_i32_1 = arith.constant 0 : i32
    return %c0_i32, %c0_i32_0 : i32, i32
  }
  func.func @transform_13(%arg0: i32) -> (i32, i32, i32) {
    %c0_i32 = arith.constant 0 : i32
    %c0_i32_0 = arith.constant 0 : i32
    %c0_i32_1 = arith.constant 0 : i32
    return %arg0, %c0_i32, %c0_i32_0 : i32, i32, i32
  }
}

</mosaic_0001>

<bundles_post_ra>
// kernel: gru_decoder_forward.1
= control target key start
LH: loop header
LB: loop body
LE: loop exit
PB: predicated region body
PF: predicated region fallthrough
CT: control target
= control target key end

     0   :  { %v9702_v3 = vmov 0.0   ;;  %vm89_vm0 = vcmask 523264   ;;  %v7696_v56 = vmov 0   ;;  %v47_v57 = vlaneseq  ;;  %s9680_s8 = inlined_call_operand.vmem [shape: f32[128,512], index: 8, kind: input, shape index: {}]   ;;  %s9681_s0 = inlined_call_operand.vmem [shape: f32[2,8,64], index: 0, kind: input, shape index: {}]   ;;  %s9682_s1 = inlined_call_operand.vmem [shape: f32[1,64], index: 1, kind: input, shape index: {}]   ;;  %s9683_s10 = inlined_call_operand.vmem [shape: f32[1,512], index: 10, kind: input, shape index: {}]   ;;  %s9684_s2 = inlined_call_operand.<no memory space> [shape: f32[1,1], index: 2, kind: input, shape index: {}]   ;;  %s9685_s13 = inlined_call_operand.vmem [shape: f32[2,7,128], index: 13, kind: output, shape index: {}]   ;;  %s9686_s3 = inlined_call_operand.vmem [shape: f32[128,128], index: 3, kind: input, shape index: {}]   ;;  %s9687_s5 = inlined_call_operand.vmem [shape: f32[64,128], index: 5, kind: input, shape index: {}]   ;;  %s9688_s4 = inlined_call_operand.vmem [shape: f32[128,128], index: 4, kind: input, shape index: {}]   ;;  %s9689_s7 = inlined_call_operand.vmem [shape: f32[128,384], index: 7, kind: input, shape index: {}]   ;;  %s9690_s6 = inlined_call_operand.vmem [shape: f32[1,128], index: 6, kind: input, shape index: {}]   ;;  %s9691_s11 = inlined_call_operand.vmem [shape: f32[128,128], index: 11, kind: input, shape index: {}]   ;;  %s9692_s9 = inlined_call_operand.vmem [shape: f32[1,384], index: 9, kind: input, shape index: {}]   ;;  %s9693_s12 = inlined_call_operand.vmem [shape: f32[1,128], index: 12, kind: input, shape index: {}]  }
   0x1   :  { %v191_v0 = vld [vmem:[%s9680_s8 + $0x18] sm:$0xff]  ;;  %v190_v2 = vld [vmem:[%s9680_s8 + $0x10] sm:$0xff]  ;;  %427 = vmatprep.mubr.f32.mxu1 %v9702_v3  ;;  %356 = vmatprep.mubr.f32.mxu0 %v9702_v3  ;;  %v7849_v26 = vld [vmem:[%s9681_s0] sm:$0xff]  ;;  %vm466_vm1 = vcmask 1041409   ;;  %vm469_vm2 = vcmask 58368   ;;  %vm7698_vm3 = vmmov 0  }
   0x2   :  { %v195_v1 = vld [vmem:[%s9680_s8 + $0x38] sm:$0xff]  ;;  %v194_v5 = vld [vmem:[%s9680_s8 + $0x30] sm:$0xff]  ;;  %v4849_v27 = vld [vmem:[%s9682_s1] ss:$0 sm:$0xff]  ;;  %7575 = vset.pattern.permute.xlu1 %v7696_v56  ;;  %7576 = vset.pattern.permute.xlu0 %v7696_v56  ;;  %v7935_v58 = vshrl.u32 %v47_v57, 7  ;;  %v9694_v56 = vmov 0.0|0.0  }
   0x3   :  { %v7782_v4 = vpack.c.bf16 %v195_v1, %v191_v0  ;;  %v199_v6 = vld [vmem:[%s9680_s8 + $0x58] sm:$0xff]  ;;  %v7793_v8 = vpack.c.bf16 %v194_v5, %v190_v2  ;;  %v198_v10 = vld [vmem:[%s9680_s8 + $0x50] sm:$0xff]  ;;  %v7857_v28 = vld [vmem:[%s9681_s0 + $0x8] sm:$0xff]  ;;  %v87_v30 = vmul.f32 %v4849_v27, %v7849_v26  ;;  %vm1056_vm5 = vcmask 1041408  }
   0x4   :  { %v203_v7 = vld [vmem:[%s9680_s8 + $0x78] sm:$0xff]  ;;  %v202_v11 = vld [vmem:[%s9680_s8 + $0x70] sm:$0xff]  ;;  %v88_v31 = vmul.f32 %v4849_v27, %v7857_v28  ;;  %v286_v59 = vsub.s32 3, %v7935_v58  ;;  %v7941_v60 = vld [vmem:[%s9683_s10] sm:$0xf]  ;;  %v7950_v5 = vsub.s32 0, %v7935_v58 }
   0x5   :  { %9865 = vst [vmem:[#allocation3_spill] sm:$0xff] %v7782_v4  ;;  %v7795_v9 = vpack.c.bf16 %v203_v7, %v199_v6  ;;  %v207_v12 = vld [vmem:[%s9680_s8 + $0x98] sm:$0xff]  ;;  %6342 = vmatprep.subr.bf16.mxu1 %v7782_v4  ;;  %v7811_v14 = vpack.c.bf16 %v202_v11, %v198_v10  ;;  %v206_v16 = vld [vmem:[%s9680_s8 + $0x90] sm:$0xff]  ;;  %v90_v37 = vsel %vm89_vm0, %v87_v30, 0.0  ;;  %v7953_v6 = vsub.s32 1, %v7935_v58 }
   0x6   :  { %v211_v13 = vld [vmem:[%s9680_s8 + $0xb8] sm:$0xff]  ;;  %6344 = vmatpush1.bf16.msra.mxu1 %v7793_v8  ;;  %v210_v17 = vld [vmem:[%s9680_s8 + $0xb0] sm:$0xff]  ;;  %91 = vadd.xlane.f32.xlu0 %v90_v37  ;;  %v93_v39 = vsel %vm89_vm0, %v88_v31, 0.0  ;;  %v7944_v61 = vrot.slane %v7941_v60, %v286_v59  ;;  %v96_v7 = vstv %s9684_s2 }
   0x7   :  { %6346 = vmatprep.subr.bf16.mxu1 %v7795_v9  ;;  %v7814_v15 = vpack.c.bf16 %v211_v13, %v207_v12  ;;  %v215_v18 = vld [vmem:[%s9680_s8 + $0xd8] sm:$0xff]  ;;  %v7829_v20 = vpack.c.bf16 %v210_v17, %v206_v16  ;;  %v214_v22 = vld [vmem:[%s9680_s8 + $0xd0] sm:$0xff] }
   0x8   :  { %v219_v19 = vld [vmem:[%s9680_s8 + $0xf8] sm:$0xff]  ;;  %v218_v23 = vld [vmem:[%s9680_s8 + $0xf0] sm:$0xff]  ;;  %9877 = vst [vmem:[#allocation15_spill] sm:$0xff] %v7944_v61 }
   0x9   :  { %9866 = vst [vmem:[#allocation4_spill] sm:$0xff] %v7829_v20  ;;  %v7832_v21 = vpack.c.bf16 %v219_v19, %v215_v18  ;;  %v223_v24 = vld [vmem:[%s9680_s8 + $0x118] sm:$0xff]  ;;  %v7860_v29 = vpack.c.bf16 %v218_v23, %v214_v22  ;;  %v222_v33 = vld [vmem:[%s9680_s8 + $0x110] sm:$0xff]  ;;  %v7966_v19 = vand.u32 127, %v47_v57 }
   0xa   :  { %6348 = vmatpush1.bf16.msra.mxu1 %v7811_v14  ;;  %v227_v25 = vld [vmem:[%s9680_s8 + $0x138] sm:$0xff]  ;;  %v226_v34 = vld [vmem:[%s9680_s8 + $0x130] sm:$0xff]  ;;  %94 = vadd.xlane.f32.xlu0 %v93_v39 }
   0xb   :  { %6350 = vmatprep.subr.bf16.mxu1 %v7814_v15  ;;  %9867 = vst [vmem:[#allocation5_spill] sm:$0xff] %v7832_v21  ;;  %9868 = vst [vmem:[#allocation6_spill] sm:$0xff] %v7860_v29  ;;  %v7865_v32 = vpack.c.bf16 %v227_v25, %v223_v24  ;;  %v231_v35 = vld [vmem:[%s9680_s8 + $0x158] sm:$0xff]  ;;  %v7881_v38 = vpack.c.bf16 %v226_v34, %v222_v33  ;;  %v230_v41 = vld [vmem:[%s9680_s8 + $0x150] sm:$0xff]  ;;  %v7970_v22 = vsub.s32 %v7966_v19, %v7935_v58 }
   0xc   :  { %v235_v36 = vld [vmem:[%s9680_s8 + $0x178] sm:$0xff]  ;;  %v234_v42 = vld [vmem:[%s9680_s8 + $0x170] sm:$0xff]  ;;  %9880 = vst [vmem:[#allocation18_spill] sm:$0xff] %v7966_v19  ;;  %vm49_vm4 = vcmp.eq.s32.totalorder %v7966_v19, 0 }
   0xd   :  { %9869 = vst [vmem:[#allocation7_spill] sm:$0xff] %v7865_v32  ;;  %9870 = vst [vmem:[#allocation8_spill] sm:$0xff] %v7881_v38  ;;  %v7885_v40 = vpack.c.bf16 %v235_v36, %v231_v35  ;;  %v239_v43 = vld [vmem:[%s9680_s8 + $0x198] sm:$0xff]  ;;  %v7900_v45 = vpack.c.bf16 %v234_v42, %v230_v41  ;;  %v238_v47 = vld [vmem:[%s9680_s8 + $0x190] sm:$0xff] }
   0xe   :  { %6352 = vmatpush1.bf16.msra.mxu1 %v7829_v20  ;;  %v243_v44 = vld [vmem:[%s9680_s8 + $0x1b8] sm:$0xff]  ;;  %v242_v48 = vld [vmem:[%s9680_s8 + $0x1b0] sm:$0xff]  ;;  %9881 = vst [vmem:[#allocation19_spill] sm:$0xff] %v7970_v22 }
   0xf   :  { %6354 = vmatprep.subr.bf16.mxu1 %v7832_v21  ;;  %9871 = vst [vmem:[#allocation9_spill] sm:$0xff] %v7885_v40  ;;  %9872 = vst [vmem:[#allocation10_spill] sm:$0xff] %v7900_v45  ;;  %v7903_v46 = vpack.c.bf16 %v243_v44, %v239_v43  ;;  %v247_v49 = vld [vmem:[%s9680_s8 + $0x1d8] sm:$0xff]  ;;  %v7918_v51 = vpack.c.bf16 %v242_v48, %v238_v47  ;;  %v246_v53 = vld [vmem:[%s9680_s8 + $0x1d0] sm:$0xff] }
  0x10   :  { %v251_v50 = vld [vmem:[%s9680_s8 + $0x1f8] sm:$0xff]  ;;  %v250_v54 = vld [vmem:[%s9680_s8 + $0x1f0] sm:$0xff]  ;;  %v189_v44 = vld [vmem:[%s9680_s8 + $0x8] sm:$0xff] }
  0x11   :  { %9873 = vst [vmem:[#allocation11_spill] sm:$0xff] %v7903_v46  ;;  %9874 = vst [vmem:[#allocation12_spill] sm:$0xff] %v7918_v51  ;;  %v7921_v52 = vpack.c.bf16 %v251_v50, %v247_v49  ;;  %v7930_v55 = vpack.c.bf16 %v250_v54, %v246_v53  ;;  %v193_v47 = vld [vmem:[%s9680_s8 + $0x28] sm:$0xff]  ;;  %v188_v48 = vld [vmem:[%s9680_s8] sm:$0xff] }
  0x12   :  { %6356 = vmatpush1.bf16.msra.mxu1 %v7860_v29  ;;  %v7993_v49 = vpack.c.bf16 %v193_v47, %v189_v44  ;;  %v192_v50 = vld [vmem:[%s9680_s8 + $0x20] sm:$0xff]  ;;  %v197_v53 = vld [vmem:[%s9680_s8 + $0x48] sm:$0xff] }
  0x13   :  { %6358 = vmatprep.subr.bf16.mxu1 %v7865_v32  ;;  %9875 = vst [vmem:[#allocation13_spill] sm:$0xff] %v7921_v52  ;;  %9876 = vst [vmem:[#allocation14_spill] sm:$0xff] %v7930_v55  ;;  %v201_v54 = vld [vmem:[%s9680_s8 + $0x68] sm:$0xff]  ;;  %v8007_v57 = vpack.c.bf16 %v192_v50, %v188_v48  ;;  %v220_v48 = vld [vmem:[%s9680_s8 + $0x100] sm:$0xff] }
  0x14   :  { %9882 = vst [vmem:[#allocation20_spill] sm:$0xff] %v7993_v49  ;;  %v8009_v59 = vpack.c.bf16 %v201_v54, %v197_v53  ;;  %6310 = vmatprep.subr.bf16.mxu0 %v7993_v49  ;;  %v224_v50 = vld [vmem:[%s9680_s8 + $0x120] sm:$0xff]  ;;  %v229_v53 = vld [vmem:[%s9680_s8 + $0x148] sm:$0xff] }
  0x15   :  { %9883 = vst [vmem:[#allocation21_spill] sm:$0xff] %v8007_v57  ;;  %6312 = vmatpush1.bf16.msra.mxu0 %v8007_v57  ;;  %v233_v54 = vld [vmem:[%s9680_s8 + $0x168] sm:$0xff] }
  0x16   :  { %6360 = vmatpush1.bf16.msra.mxu1 %v7881_v38  ;;  %9884 = vst [vmem:[#allocation22_spill] sm:$0xff] %v8009_v59  ;;  %6314 = vmatprep.subr.bf16.mxu0 %v8009_v59 }
  0x17   :  { %6362 = vmatprep.subr.bf16.mxu1 %v7885_v40 }
  0x1a   :  { %6364 = vmatpush1.bf16.msra.mxu1 %v7900_v45 }
  0x1b   :  { %6366 = vmatprep.subr.bf16.mxu1 %v7903_v46 }
  0x1e   :  { %6368 = vmatpush1.bf16.msra.mxu1 %v7918_v51 }
  0x1f   :  { %6370 = vmatprep.subr.bf16.mxu1 %v7921_v52 }
  0x22   :  { %6372 = vmatpush1.bf16.msra.mxu1 %v7930_v55 }
  0x23   :  { %6397 = vmatprep.subr.bf16.mxu1 %v9694_v56 }
  0x25   :  { %428 = vmatmul.mubr.f32.vlgmr.msra.gmra.mrb[0].mxu1 %v9702_v3 }
  0x26   :  { %5406 = vmatprep.mubr.msk.f32.mxu1 %vm7698_vm3, %v9702_v3 }
  0x93   :  { %v92_v1 = vpop.xlane.xlu0 %91 }
  0x94   :  { %v7960_v12 = vadd.f32 %v96_v7, %v92_v1  ;;  %v205_v1 = vld [vmem:[%s9680_s8 + $0x88] sm:$0xff] }
  0x96   :  { %9879 = vst [vmem:[#allocation17_spill] sm:$0xff] %v7960_v12 }
  0x97   :  { %v95_v2 = vpop.xlane.xlu0 %94 }
  0x98   :  { %v7958_v10 = vadd.f32 %v96_v7, %v95_v2  ;;  %v7699_v2 = vmov 1966171168  }
  0x99   :  { %v54_v7 = vunpack.c.l.s4 %v7699_v2  ;;  %v232_v2 = vld [vmem:[%s9680_s8 + $0x160] sm:$0xff] }
  0x9a   :  { %9878 = vst [vmem:[#allocation16_spill] sm:$0xff] %v7958_v10 }
  0xf8   :  { %v7946_v62 = vpop.f32.mrb[0].mxu1 }
  0xf9   :  { %v431_v63 = vpop.f32.mrb[1].mxu1 }
  0xfa   :  { %v432_v0 = vadd.f32 %v431_v63, %v7944_v61  ;;  %v196_v63 = vld [vmem:[%s9680_s8 + $0x40] sm:$0xff] }
  0xfc   :  { %436 = vperm.xlu1 %7575, %v432_v0   ;;  %v200_v0 = vld [vmem:[%s9680_s8 + $0x60] sm:$0xff] }
 0x17b   :  { %v437_v11 = vpop.permute.xlu1 %436 }
 0x17c   :  { %v441_v13 = vrot.slane %v437_v11, %v7950_v5  ;;  %v445_v16 = vrot.slane %v437_v11, %v7953_v6  ;;  %v209_v11 = vld [vmem:[%s9680_s8 + $0xa8] sm:$0xff] }
 0x17e   :  { %v448_v17 = vadd.f32 %v441_v13, %v7960_v12  ;;  %v449_v18 = vadd.f32 %v445_v16, %v7958_v10  ;;  %v8025_v13 = vpack.c.bf16 %v200_v0, %v196_v63  ;;  %v55_v16 = vunpack.c.0.s8 %v54_v7  ;;  %v237_v7 = vld [vmem:[%s9680_s8 + $0x188] sm:$0xff] }
 0x17f   :  { %v8093_v63 = vpack.c.bf16 %v224_v50, %v220_v48  ;;  %v8096_v0 = vpack.c.bf16 %v233_v54, %v229_v53  ;;  %v100_v48 = vld [vmem:[%s9686_s3 + $0x8] sm:$0xff]  ;;  %v101_v53 = vld [vmem:[%s9686_s3 + $0x10] sm:$0xff]  ;;  %v102_v54 = vld [vmem:[%s9686_s3 + $0x18] sm:$0xff] }
 0x180   :  { %453 = vperm.xlu1 %7575, %v448_v17   ;;  %456 = vperm.xlu0 %7576, %v449_v18   ;;  %9885 = vst [vmem:[#allocation23_spill] sm:$0xff] %v8025_v13 }
 0x181   :  { %6316 = vmatpush1.bf16.msra.mxu0 %v8025_v13  ;;  %9892 = vst [vmem:[#allocation30_spill] sm:$0xff] %v8093_v63  ;;  %9893 = vst [vmem:[#allocation31_spill] sm:$0xff] %v8096_v0 }
 0x1ff   :  { %v454_v23 = vpop.permute.xlu1 %453  ;;  %v457_v24 = vpop.permute.xlu0 %456 }
 0x200   :  { %v461_v25 = vrot.slane %v454_v23, %v7970_v22  ;;  %v465_v27 = vrot.slane %v457_v24, %v7970_v22  ;;  %v208_v23 = vld [vmem:[%s9680_s8 + $0xa0] sm:$0xff]  ;;  %v4846_v24 = vsel %vm49_vm4, 1.0, %v9702_v3 }
 0x202   :  { %v467_v30 = vsel %vm466_vm1, %v465_v27, %v461_v25  ;;  %v213_v25 = vld [vmem:[%s9680_s8 + $0xc8] sm:$0xff] }
 0x203   :  { %v470_v31 = vsel %vm469_vm2, %v467_v30, -inf  ;;  %v217_v27 = vld [vmem:[%s9680_s8 + $0xe8] sm:$0xff]  ;;  %v8047_v30 = vsub.s32 %v55_v16, %v7935_v58 }
 0x204   :  { %471 = vmax.xlane.f32.xlu1 %v470_v31 }
 0x205   :  { %9887 = vst [vmem:[#allocation25_spill] sm:$0xff] %v8047_v30 }
 0x291   :  { %v472_v33 = vpop.xlane.xlu1 %471 }
 0x292   :  { %v477_v34 = vrot.slane %v472_v33, %v7950_v5  ;;  %v481_v35 = vrot.slane %v472_v33, %v7953_v6  ;;  %v59_v33 = vrot.slane %v4846_v24, %v8047_v30  ;;  %v240_v24 = vld [vmem:[%s9680_s8 + $0x1a0] sm:$0xff] }
 0x294   :  { %v484_v36 = vsub.f32 %v448_v17, %v477_v34  ;;  %v485_v37 = vsub.f32 %v449_v18, %v481_v35  ;;  %v8029_v17 = vpack.c.bf16 %v209_v11, %v205_v1  ;;  %v204_v18 = vld [vmem:[%s9680_s8 + $0x80] sm:$0xff]  ;;  %v8054_v34 = vpack.c.bf16 %v217_v27, %v213_v25  ;;  %4847 = vst.sshfl [vmem:[%s9685_s13] sm:$0x1 pattern:$0x73625140] %v59_v33  ;;  %v241_v11 = vld [vmem:[%s9680_s8 + $0x1a8] sm:$0xff] }
 0x295   :  { %v8050_v31 = vpack.c.bf16 %v208_v23, %v204_v18  ;;  %v212_v35 = vld [vmem:[%s9680_s8 + $0xc0] sm:$0xff]  ;;  %v8114_v18 = vpack.c.bf16 %v241_v11, %v237_v7  ;;  %v245_v25 = vld [vmem:[%s9680_s8 + $0x1c8] sm:$0xff] }
 0x296   :  { %v486_v39 = vmul.f32 1.442695, %v484_v36  ;;  %v488_v41 = vmul.f32 1.442695, %v485_v37  ;;  %9886 = vst [vmem:[#allocation24_spill] sm:$0xff] %v8029_v17  ;;  %6318 = vmatprep.subr.bf16.mxu0 %v8029_v17  ;;  %9889 = vst [vmem:[#allocation27_spill] sm:$0xff] %v8054_v34 }
 0x297   :  { %9888 = vst [vmem:[#allocation26_spill] sm:$0xff] %v8050_v31  ;;  %v216_v36 = vld [vmem:[%s9680_s8 + $0xe0] sm:$0xff]  ;;  %v221_v37 = vld [vmem:[%s9680_s8 + $0x108] sm:$0xff]  ;;  %6320 = vmatpush1.bf16.msra.mxu0 %v8050_v31  ;;  %9895 = vst [vmem:[#allocation33_spill] sm:$0xff] %v8114_v18 }
 0x298   :  { %7577 = vpow2.f32 %v486_v39  ;;  %v225_v39 = vld [vmem:[%s9680_s8 + $0x128] sm:$0xff]  ;;  %v8072_v44 = vpack.c.bf16 %v216_v36, %v212_v35  ;;  %6322 = vmatprep.subr.bf16.mxu0 %v8054_v34  ;;  %v228_v1 = vld [vmem:[%s9680_s8 + $0x140] sm:$0xff] }
 0x299   :  { %7579 = vpow2.f32 %v488_v41  ;;  %v60_v41 = vcombine.high %v59_v33, %v59_v33  ;;  %v8078_v47 = vpack.c.bf16 %v225_v39, %v221_v37  ;;  %v8111_v16 = vpack.c.bf16 %v232_v2, %v228_v1  ;;  %v236_v23 = vld [vmem:[%s9680_s8 + $0x180] sm:$0xff]  ;;  %v249_v27 = vld [vmem:[%s9680_s8 + $0x1e8] sm:$0xff] }
 0x29a   :  { %9890 = vst [vmem:[#allocation28_spill] sm:$0xff] %v8072_v44  ;;  %v8129_v33 = vpack.c.bf16 %v240_v24, %v236_v23  ;;  %v8132_v35 = vpack.c.bf16 %v249_v27, %v245_v25  ;;  %v244_v36 = vld [vmem:[%s9680_s8 + $0x1c0] sm:$0xff]  ;;  %v8162_v1 = vpack.c.bf16 %v102_v54, %v101_v53  ;;  %v104_v7 = vld [vmem:[%s9686_s3 + $0x28] sm:$0xff]  ;;  %v105_v23 = vld [vmem:[%s9686_s3 + $0x30] sm:$0xff] }
 0x29b   :  { %4848 = vst.sshfl [vmem:[%s9685_s13 + $0x8] sm:$0x1 pattern:$0x73625140] %v60_v41  ;;  %9891 = vst [vmem:[#allocation29_spill] sm:$0xff] %v8078_v47  ;;  %6324 = vmatpush1.bf16.msra.mxu0 %v8072_v44  ;;  %v248_v37 = vld [vmem:[%s9680_s8 + $0x1e0] sm:$0xff] }
 0x29c   :  { %6326 = vmatprep.subr.bf16.mxu0 %v8078_v47  ;;  %9894 = vst [vmem:[#allocation32_spill] sm:$0xff] %v8111_v16  ;;  %9896 = vst [vmem:[#allocation34_spill] sm:$0xff] %v8129_v33  ;;  %v8141_v39 = vpack.c.bf16 %v248_v37, %v244_v36  ;;  %v99_v41 = vld [vmem:[%s9686_s3] sm:$0xff]  ;;  %v106_v24 = vld [vmem:[%s9686_s3 + $0x38] sm:$0xff] }
 0x29d   :  { %9897 = vst [vmem:[#allocation35_spill] sm:$0xff] %v8132_v35  ;;  %v8151_v50 = vpack.c.bf16 %v100_v48, %v99_v41  ;;  %9899 = vst [vmem:[#allocation37_spill] sm:$0xff] %v8162_v1  ;;  %v103_v2 = vld [vmem:[%s9686_s3 + $0x20] sm:$0xff]  ;;  %v8184_v25 = vpack.c.bf16 %v106_v24, %v105_v23  ;;  %v108_v36 = vld [vmem:[%s9686_s3 + $0x48] sm:$0xff] }
 0x29e   :  { %9898 = vst [vmem:[#allocation36_spill] sm:$0xff] %v8141_v39  ;;  %v8174_v11 = vpack.c.bf16 %v104_v7, %v103_v2  ;;  %v107_v27 = vld [vmem:[%s9686_s3 + $0x40] sm:$0xff]  ;;  %v109_v41 = vld [vmem:[%s9686_s3 + $0x50] sm:$0xff]  ;;  %v110_v48 = vld [vmem:[%s9686_s3 + $0x58] sm:$0xff] }
 0x29f   :  { %6328 = vmatpush1.bf16.msra.mxu0 %v8093_v63  ;;  %9901 = vst [vmem:[#allocation39_spill] sm:$0xff] %v8184_v25  ;;  %v8194_v37 = vpack.c.bf16 %v108_v36, %v107_v27  ;;  %v8204_v53 = vpack.c.bf16 %v110_v48, %v109_v41  ;;  %v111_v54 = vld [vmem:[%s9686_s3 + $0x60] sm:$0xff]  ;;  %v112_v2 = vld [vmem:[%s9686_s3 + $0x68] sm:$0xff]  ;;  %v113_v23 = vld [vmem:[%s9686_s3 + $0x70] sm:$0xff]  ;;  %v9700_v36 = vmov 1.0  }
 0x2a0   :  { %6330 = vmatprep.subr.bf16.mxu0 %v8096_v0  ;;  %9900 = vst [vmem:[#allocation38_spill] sm:$0xff] %v8174_v11  ;;  %v8214_v7 = vpack.c.bf16 %v112_v2, %v111_v54  ;;  %v114_v24 = vld [vmem:[%s9686_s3 + $0x78] sm:$0xff] }
 0x2a1   :  { %9902 = vst [vmem:[#allocation40_spill] sm:$0xff] %v8194_v37  ;;  %9903 = vst [vmem:[#allocation41_spill] sm:$0xff] %v8204_v53  ;;  %v8224_v27 = vpack.c.bf16 %v114_v24, %v113_v23 }
 0x2a2   :  { %v7978_v42 = vpop.eup %7577  ;;  %9904 = vst [vmem:[#allocation42_spill] sm:$0xff] %v8214_v7 }
 0x2a3   :  { %v7980_v43 = vpop.eup %7579  ;;  %493 = vperm.xlu1 %7575, %v7978_v42   ;;  %6332 = vmatpush1.bf16.msra.mxu0 %v8111_v16  ;;  %9905 = vst [vmem:[#allocation43_spill] sm:$0xff] %v8224_v27 }
 0x2a4   :  { %496 = vperm.xlu0 %7576, %v7980_v43   ;;  %6334 = vmatprep.subr.bf16.mxu0 %v8114_v18 }
 0x2a7   :  { %6336 = vmatpush1.bf16.msra.mxu0 %v8129_v33 }
 0x2a8   :  { %6338 = vmatprep.subr.bf16.mxu0 %v8132_v35 }
 0x2ab   :  { %6340 = vmatpush1.bf16.msra.mxu0 %v8141_v39 }
 0x2ac   :  { %6373 = vmatprep.subr.bf16.mxu0 %v9694_v56 }
 0x2ae   :  { %357 = vmatmul.mubr.f32.vlgmr.msra.gmra.mrb[0].mxu0 %v9702_v3 }
 0x2af   :  { %6375 = vmatpush3.bf16.msra.mxu0 %v8151_v50  ;;  %5387 = vmatprep.mubr.msk.f32.mxu0 %vm7698_vm3, %v9702_v3 }
 0x2b0   :  { %6376 = vmatprep.subr.bf16.mxu0 %v9694_v56 }
 0x2b3   :  { %6378 = vmatpush3.bf16.msra.mxu0 %v8162_v1 }
 0x2b4   :  { %6379 = vmatprep.subr.bf16.mxu0 %v9694_v56 }
 0x2b7   :  { %6381 = vmatpush3.bf16.msra.mxu0 %v8174_v11 }
 0x2b8   :  { %6382 = vmatprep.subr.bf16.mxu0 %v9694_v56 }
 0x2bb   :  { %6384 = vmatpush3.bf16.msra.mxu0 %v8184_v25 }
 0x2bc   :  { %6385 = vmatprep.subr.bf16.mxu0 %v9694_v56 }
 0x2bf   :  { %6387 = vmatpush3.bf16.msra.mxu0 %v8194_v37 }
 0x2c0   :  { %6388 = vmatprep.subr.bf16.mxu0 %v9694_v56 }
 0x2c3   :  { %6390 = vmatpush3.bf16.msra.mxu0 %v8204_v53 }
 0x2c4   :  { %6391 = vmatprep.subr.bf16.mxu0 %v9694_v56 }
 0x2c7   :  { %6393 = vmatpush3.bf16.msra.mxu0 %v8214_v7 }
 0x2c8   :  { %6394 = vmatprep.subr.bf16.mxu0 %v9694_v56 }
 0x2cb   :  { %6396 = vmatpush3.bf16.msra.mxu0 %v8224_v27 }
 0x2ce   :  { %5388 = vmatmul.mubr.msk.f32.vlgmr.msra.gmra.mrb[2].mxu0 %vm49_vm4, %v9700_v36 }
 0x2cf   :  { %855 = vmatprep.mubr.f32.mxu0 %v9702_v3 }
 0x322   :  { %v494_v41 = vpop.permute.xlu1 %493 }
 0x323   :  { %v497_v48 = vpop.permute.xlu0 %496  ;;  %v501_v54 = vrot.slane %v494_v41, %v7970_v22 }
 0x324   :  { %v505_v2 = vrot.slane %v497_v48, %v7970_v22  ;;  %v131_v48 = vld [vmem:[%s9687_s5] sm:$0xff] }
 0x326   :  { %v506_v23 = vsel %vm466_vm1, %v505_v2, %v501_v54  ;;  %v132_v54 = vld [vmem:[%s9687_s5 + $0x8] sm:$0xff] }
 0x327   :  { %v508_v24 = vsel %vm469_vm2, %v506_v23, 0.0  ;;  %v8246_v2 = vpack.c.bf16 %v132_v54, %v131_v48  ;;  %v138_v23 = vld [vmem:[%s9687_s5 + $0x38] sm:$0xff] }
 0x328   :  { %509 = vadd.xlane.f32.xlu0 %v508_v24 }
 0x329   :  { %9906 = vst [vmem:[#allocation44_spill] sm:$0xff] %v8246_v2  ;;  %6399 = vmatpush3.bf16.msra.mxu1 %v8246_v2 }
 0x3b5   :  { %v510_v56 = vpop.xlane.xlu0 %509 }
 0x3b6   :  { %v515_v10 = vrot.slane %v510_v56, %v7950_v5  ;;  %v519_v12 = vrot.slane %v510_v56, %v7953_v6 }
 0x3b8   :  { %7581 = vrcp.f32 %v515_v10  ;;  %v9907_v10 = vmov 0.0|0.0  }
 0x3b9   :  { %7583 = vrcp.f32 %v519_v12  ;;  %6400 = vmatprep.subr.bf16.mxu1 %v9907_v10  ;;  %v134_v12 = vld [vmem:[%s9687_s5 + $0x18] sm:$0xff] }
 0x3c2   :  { %v7582_v36 = vpop.eup %7581 }
 0x3c3   :  { %v523_v3 = vmul.f32 %v7582_v36, %v7978_v42  ;;  %v7584_v19 = vpop.eup %7583  ;;  %v135_v42 = vld [vmem:[%s9687_s5 + $0x20] sm:$0xff]  ;;  %v137_v36 = vld [vmem:[%s9687_s5 + $0x30] sm:$0xff] }
 0x3c4   :  { %v525_v41 = vmul.f32 %v7584_v19, %v7980_v43  ;;  %v136_v43 = vld [vmem:[%s9687_s5 + $0x28] sm:$0xff]  ;;  %v8276_v24 = vpack.c.bf16 %v138_v23, %v137_v36 }
 0x3c5   :  { %528 = vperm.xlu1 %7575, %v523_v3   ;;  %v133_v3 = vld [vmem:[%s9687_s5 + $0x10] sm:$0xff]  ;;  %v8266_v56 = vpack.c.bf16 %v136_v43, %v135_v42 }
 0x3c6   :  { %v8256_v19 = vpack.c.bf16 %v134_v12, %v133_v3  ;;  %9910 = vst [vmem:[#allocation47_spill] sm:$0xff] %v8276_v24 }
 0x3c7   :  { %9909 = vst [vmem:[#allocation46_spill] sm:$0xff] %v8266_v56 }
 0x3c8   :  { %9908 = vst [vmem:[#allocation45_spill] sm:$0xff] %v8256_v19  ;;  %6402 = vmatpush3.bf16.msra.mxu1 %v8256_v19 }
 0x3c9   :  { %533 = vperm.xlu1 %7575, %v525_v41   ;;  %6403 = vmatprep.subr.bf16.mxu1 %v9907_v10  ;;  %v8280_v41 = vpop.f32.mrb[2].mxu0 }
 0x3ca   :  { %v5389_v48 = vpop.f32.mrb[3].mxu0 }
 0x3cb   :  { %v116_v48 = vld [vmem:[%s9688_s4 + $0x8] sm:$0xff] }
 0x3cc   :  { %6405 = vmatpush3.bf16.msra.mxu1 %v8266_v56 }
 0x3cd   :  { %6406 = vmatprep.subr.bf16.mxu1 %v9907_v10 }
 0x3d0   :  { %6408 = vmatpush3.bf16.msra.mxu1 %v8276_v24 }
 0x3d1   :  { %6409 = vmatprep.subr.bf16.mxu1 %v9907_v10 }
 0x444   :  { %v529_v54 = vpop.permute.xlu1 %528 }
 0x445   :  { %v536_v3 = vmul.f32 %v529_v54, %v7849_v26  ;;  %v115_v26 = vld [vmem:[%s9688_s4] sm:$0xff] }
 0x447   :  { %v538_v12 = vsel %vm89_vm0, %v536_v3, 0.0 }
 0x448   :  { %v539_v42 = vrot.slane %v538_v12, 4  ;;  %v534_v43 = vpop.permute.xlu1 %533 }
 0x449   :  { %v537_v22 = vmul.f32 %v534_v43, %v7857_v28  ;;  %v122_v43 = vld [vmem:[%s9688_s4 + $0x38] sm:$0xff] }
 0x44a   :  { %v540_v61 = vadd.f32 %v539_v42, %v538_v12  ;;  %v8292_v12 = vpack.c.bf16 %v116_v48, %v115_v26  ;;  %v121_v42 = vld [vmem:[%s9688_s4 + $0x30] sm:$0xff]  ;;  %v124_v26 = vld [vmem:[%s9688_s4 + $0x48] sm:$0xff] }
 0x44b   :  { %v545_v36 = vsel %vm89_vm0, %v537_v22, 0.0  ;;  %v118_v22 = vld [vmem:[%s9688_s4 + $0x18] sm:$0xff] }
 0x44c   :  { %v541_v23 = vrot.slane %v540_v61, 2  ;;  %v546_v30 = vrot.slane %v545_v36, 4  ;;  %9911 = vst [vmem:[#allocation48_spill] sm:$0xff] %v8292_v12 }
 0x44e   :  { %v542_v24 = vadd.f32 %v541_v23, %v540_v61  ;;  %v547_v56 = vadd.f32 %v546_v30, %v545_v36  ;;  %v117_v61 = vld [vmem:[%s9688_s4 + $0x10] sm:$0xff]  ;;  %v8325_v36 = vpack.c.bf16 %v122_v43, %v121_v42  ;;  %v123_v23 = vld [vmem:[%s9688_s4 + $0x40] sm:$0xff]  ;;  %v141_v43 = vld [vmem:[%s9689_s7 + $0x8] sm:$0xff] }
 0x44f   :  { %v8335_v48 = vpack.c.bf16 %v124_v26, %v123_v23  ;;  %v144_v23 = vld [vmem:[%s9689_s7 + $0x20] sm:$0xff] }
 0x450   :  { %v548_v19 = vrot.slane %v547_v56, 2  ;;  %v543_v2 = vrot.slane %v542_v24, 1  ;;  %9915 = vst [vmem:[#allocation51_spill] sm:$0xff] %v8325_v36  ;;  %v140_v26 = vld [vmem:[%s9689_s7] sm:$0xff] }
 0x451   :  { %9916 = vst [vmem:[#allocation52_spill] sm:$0xff] %v8335_v48 }
 0x452   :  { %v549_v27 = vadd.f32 %v548_v19, %v547_v56  ;;  %v544_v28 = vadd.f32 %v543_v2, %v542_v24  ;;  %v8303_v19 = vpack.c.bf16 %v118_v22, %v117_v61  ;;  %v9913_v2 = vmov 0.0   ;;  %v120_v56 = vld [vmem:[%s9688_s4 + $0x28] sm:$0xff]  ;;  %v127_v61 = vld [vmem:[%s9688_s4 + $0x60] sm:$0xff] }
 0x453   :  { %v128_v22 = vld [vmem:[%s9688_s4 + $0x68] sm:$0xff] }
 0x454   :  { %v550_v54 = vrot.slane %v549_v27, 1  ;;  %9912 = vst [vmem:[#allocation49_spill] sm:$0xff] %v8303_v19 }
 0x456   :  { %v551_v3 = vadd.f32 %v550_v54, %v549_v27  ;;  %v119_v27 = vld [vmem:[%s9688_s4 + $0x20] sm:$0xff]  ;;  %v125_v54 = vld [vmem:[%s9688_s4 + $0x50] sm:$0xff] }
 0x457   :  { %v8315_v24 = vpack.c.bf16 %v120_v56, %v119_v27  ;;  %v129_v27 = vld [vmem:[%s9688_s4 + $0x70] sm:$0xff]  ;;  %v130_v56 = vld [vmem:[%s9688_s4 + $0x78] sm:$0xff] }
 0x458   :  { %v624_v30 = vsel %vm466_vm1, %v551_v3, %v544_v28  ;;  %v126_v28 = vld [vmem:[%s9688_s4 + $0x58] sm:$0xff]  ;;  %v8365_v42 = vpack.c.bf16 %v130_v56, %v129_v27 }
 0x459   :  { %5407 = vmatmul.mubr.msk.f32.vlgmr.msra.gmra.mrb[2].mxu1 %vm89_vm0, %v624_v30  ;;  %9914 = vst [vmem:[#allocation50_spill] sm:$0xff] %v8315_v24  ;;  %v8345_v3 = vpack.c.bf16 %v126_v28, %v125_v54  ;;  %v8355_v30 = vpack.c.bf16 %v128_v22, %v127_v61  ;;  %v8382_v54 = vpack.c.bf16 %v144_v23, %v141_v43  ;;  %v142_v28 = vld [vmem:[%s9689_s7 + $0x10] sm:$0xff]  ;;  %v145_v61 = vld [vmem:[%s9689_s7 + $0x28] sm:$0xff]  ;;  %v147_v56 = vld [vmem:[%s9689_s7 + $0x38] sm:$0xff] }
 0x45a   :  { %6411 = vmatpush3.bf16.msra.mxu1 %v8292_v12  ;;  %5441 = vmatprep.mubr.msk.f32.mxu1 %vm7698_vm3, %v9913_v2  ;;  %9919 = vst [vmem:[#allocation55_spill] sm:$0xff] %v8365_v42  ;;  %v8395_v27 = vpack.c.bf16 %v145_v61, %v142_v28  ;;  %v150_v43 = vld [vmem:[%s9689_s7 + $0x50] sm:$0xff]  ;;  %v151_v28 = vld [vmem:[%s9689_s7 + $0x58] sm:$0xff] }
 0x45b   :  { %6412 = vmatprep.subr.bf16.mxu1 %v9907_v10  ;;  %9917 = vst [vmem:[#allocation53_spill] sm:$0xff] %v8345_v3  ;;  %9918 = vst [vmem:[#allocation54_spill] sm:$0xff] %v8355_v30  ;;  %v146_v23 = vld [vmem:[%s9689_s7 + $0x30] sm:$0xff]  ;;  %6434 = vmatprep.subr.bf16.mxu0 %v8382_v54 }
 0x45c   :  { %9920 = vst [vmem:[#allocation56_spill] sm:$0xff] %v8382_v54  ;;  %9921 = vst [vmem:[#allocation57_spill] sm:$0xff] %v8395_v27 }
 0x45e   :  { %6414 = vmatpush3.bf16.msra.mxu1 %v8303_v19  ;;  %v161_v19 = vld [vmem:[%s9689_s7 + $0xa8] sm:$0xff] }
 0x45f   :  { %6415 = vmatprep.subr.bf16.mxu1 %v9907_v10 }
 0x462   :  { %6417 = vmatpush3.bf16.msra.mxu1 %v8315_v24 }
 0x463   :  { %6418 = vmatprep.subr.bf16.mxu1 %v9907_v10 }
 0x466   :  { %6420 = vmatpush3.bf16.msra.mxu1 %v8325_v36  ;;  %v158_v36 = vld [vmem:[%s9689_s7 + $0x90] sm:$0xff] }
 0x467   :  { %6421 = vmatprep.subr.bf16.mxu1 %v9907_v10 }
 0x46a   :  { %6423 = vmatpush3.bf16.msra.mxu1 %v8335_v48 }
 0x46b   :  { %6424 = vmatprep.subr.bf16.mxu1 %v9907_v10 }
 0x46e   :  { %6426 = vmatpush3.bf16.msra.mxu1 %v8345_v3  ;;  %v152_v3 = vld [vmem:[%s9689_s7 + $0x60] sm:$0xff] }
 0x46f   :  { %6427 = vmatprep.subr.bf16.mxu1 %v9907_v10 }
 0x472   :  { %6429 = vmatpush3.bf16.msra.mxu1 %v8355_v30  ;;  %v156_v30 = vld [vmem:[%s9689_s7 + $0x80] sm:$0xff] }
 0x473   :  { %6430 = vmatprep.subr.bf16.mxu1 %v9907_v10 }
 0x476   :  { %6432 = vmatpush3.bf16.msra.mxu1 %v8365_v42  ;;  %v8407_v42 = vpack.c.bf16 %v150_v43, %v147_v56  ;;  %v153_v43 = vld [vmem:[%s9689_s7 + $0x68] sm:$0xff] }
 0x477   :  { %6465 = vmatprep.subr.bf16.mxu1 %v9907_v10 }
 0x479   :  { %5442 = vmatmul.mubr.f32.vlgmr.msra.gmra.mrb[4].mxu1 %v8280_v41  ;;  %v143_v41 = vld [vmem:[%s9689_s7 + $0x18] sm:$0xff] }
 0x47a   :  { %5476 = vmatprep.mubr.msk.f32.mxu1 %vm7698_vm3, %v9913_v2  ;;  %v8393_v22 = vpack.c.bf16 %v143_v41, %v140_v26  ;;  %v149_v26 = vld [vmem:[%s9689_s7 + $0x48] sm:$0xff]  ;;  %v148_v41 = vld [vmem:[%s9689_s7 + $0x40] sm:$0xff]  ;;  %6467 = vmatpush3.bf16.msra.mxu1 %v8395_v27  ;;  %v159_v27 = vld [vmem:[%s9689_s7 + $0x98] sm:$0xff] }
 0x47b   :  { %v8420_v61 = vpack.c.bf16 %v149_v26, %v146_v23  ;;  %v8422_v56 = vpack.c.bf16 %v151_v28, %v148_v41  ;;  %6468 = vmatprep.subr.bf16.mxu1 %v9907_v10  ;;  %v8435_v23 = vpack.c.bf16 %v156_v30, %v153_v43  ;;  %v155_v26 = vld [vmem:[%s9689_s7 + $0x78] sm:$0xff]  ;;  %v154_v41 = vld [vmem:[%s9689_s7 + $0x70] sm:$0xff]  ;;  %v157_v28 = vld [vmem:[%s9689_s7 + $0x88] sm:$0xff] }
 0x47c   :  { %6436 = vmatpush1.bf16.msra.mxu0 %v8393_v22  ;;  %v162_v30 = vld [vmem:[%s9689_s7 + $0xb0] sm:$0xff]  ;;  %v8454_v43 = vpack.c.bf16 %v155_v26, %v152_v3  ;;  %v8456_v48 = vpack.c.bf16 %v157_v28, %v154_v41  ;;  %v160_v3 = vld [vmem:[%s9689_s7 + $0xa0] sm:$0xff]  ;;  %v163_v26 = vld [vmem:[%s9689_s7 + $0xb8] sm:$0xff]  ;;  %v8482_v28 = vpack.c.bf16 %v161_v19, %v158_v36 }
 0x47d   :  { %9922 = vst [vmem:[#allocation58_spill] sm:$0xff] %v8422_v56  ;;  %6438 = vmatprep.subr.bf16.mxu0 %v8407_v42  ;;  %9923 = vst [vmem:[#allocation59_spill] sm:$0xff] %v8435_v23  ;;  %v8463_v24 = vpack.c.bf16 %v162_v30, %v159_v27  ;;  %v165_v41 = vld [vmem:[%s9689_s7 + $0xc8] sm:$0xff]  ;;  %v168_v27 = vld [vmem:[%s9689_s7 + $0xe0] sm:$0xff]  ;;  %v8484_v30 = vpack.c.bf16 %v163_v26, %v160_v3 }
 0x47e   :  { %6470 = vmatpush3.bf16.msra.mxu1 %v8422_v56  ;;  %9924 = vst [vmem:[#allocation60_spill] sm:$0xff] %v8454_v43  ;;  %9925 = vst [vmem:[#allocation61_spill] sm:$0xff] %v8456_v48  ;;  %v164_v56 = vld [vmem:[%s9689_s7 + $0xc0] sm:$0xff]  ;;  %v8491_v12 = vpack.c.bf16 %v168_v27, %v165_v41  ;;  %v166_v19 = vld [vmem:[%s9689_s7 + $0xd0] sm:$0xff] }
 0x47f   :  { %6471 = vmatprep.subr.bf16.mxu1 %v9907_v10  ;;  %9926 = vst [vmem:[#allocation62_spill] sm:$0xff] %v8463_v24  ;;  %9927 = vst [vmem:[#allocation63_spill] sm:$0xff] %v8482_v28  ;;  %v169_v36 = vld [vmem:[%s9689_s7 + $0xe8] sm:$0xff]  ;;  %v171_v3 = vld [vmem:[%s9689_s7 + $0xf8] sm:$0xff] }
 0x480   :  { %6440 = vmatpush1.bf16.msra.mxu0 %v8420_v61  ;;  %9928 = vst [vmem:[#allocation64_spill] sm:$0xff] %v8484_v30  ;;  %9929 = vst [vmem:[#allocation65_spill] sm:$0xff] %v8491_v12  ;;  %v174_v26 = vld [vmem:[%s9689_s7 + $0x110] sm:$0xff]  ;;  %v8512_v27 = vpack.c.bf16 %v169_v36, %v166_v19  ;;  %v177_v19 = vld [vmem:[%s9689_s7 + $0x128] sm:$0xff] }
 0x481   :  { %6442 = vmatprep.subr.bf16.mxu0 %v8435_v23  ;;  %v180_v36 = vld [vmem:[%s9689_s7 + $0x140] sm:$0xff] }
 0x482   :  { %6473 = vmatpush3.bf16.msra.mxu1 %v8456_v48  ;;  %9931 = vst [vmem:[#allocation67_spill] sm:$0xff] %v8512_v27  ;;  %v170_v48 = vld [vmem:[%s9689_s7 + $0xf0] sm:$0xff] }
 0x483   :  { %6474 = vmatprep.subr.bf16.mxu1 %v9907_v10 }
 0x484   :  { %6444 = vmatpush1.bf16.msra.mxu0 %v8454_v43  ;;  %v167_v43 = vld [vmem:[%s9689_s7 + $0xd8] sm:$0xff] }
 0x485   :  { %6446 = vmatprep.subr.bf16.mxu0 %v8463_v24  ;;  %v8510_v41 = vpack.c.bf16 %v167_v43, %v164_v56  ;;  %v8519_v24 = vpack.c.bf16 %v174_v26, %v171_v3  ;;  %v172_v56 = vld [vmem:[%s9689_s7 + $0x100] sm:$0xff]  ;;  %v175_v43 = vld [vmem:[%s9689_s7 + $0x118] sm:$0xff] }
 0x486   :  { %6476 = vmatpush3.bf16.msra.mxu1 %v8484_v30  ;;  %v8540_v26 = vpack.c.bf16 %v175_v43, %v172_v56  ;;  %v8544_v30 = vpack.c.bf16 %v180_v36, %v177_v19  ;;  %v178_v56 = vld [vmem:[%s9689_s7 + $0x130] sm:$0xff]  ;;  %v181_v19 = vld [vmem:[%s9689_s7 + $0x148] sm:$0xff] }
 0x487   :  { %9930 = vst [vmem:[#allocation66_spill] sm:$0xff] %v8510_v41  ;;  %6477 = vmatprep.subr.bf16.mxu1 %v9907_v10  ;;  %9932 = vst [vmem:[#allocation68_spill] sm:$0xff] %v8519_v24  ;;  %v8564_v36 = vpack.c.bf16 %v181_v19, %v178_v56  ;;  %v185_v56 = vld [vmem:[%s9689_s7 + $0x168] sm:$0xff]  ;;  %v184_v19 = vld [vmem:[%s9689_s7 + $0x160] sm:$0xff] }
 0x488   :  { %6448 = vmatpush1.bf16.msra.mxu0 %v8482_v28  ;;  %v173_v28 = vld [vmem:[%s9689_s7 + $0x108] sm:$0xff]  ;;  %9934 = vst [vmem:[#allocation70_spill] sm:$0xff] %v8540_v26  ;;  %9935 = vst [vmem:[#allocation71_spill] sm:$0xff] %v8544_v30 }
 0x489   :  { %6450 = vmatprep.subr.bf16.mxu0 %v8491_v12  ;;  %v8538_v3 = vpack.c.bf16 %v173_v28, %v170_v48  ;;  %v176_v48 = vld [vmem:[%s9689_s7 + $0x120] sm:$0xff]  ;;  %v179_v28 = vld [vmem:[%s9689_s7 + $0x138] sm:$0xff]  ;;  %9937 = vst [vmem:[#allocation73_spill] sm:$0xff] %v8564_v36 }
 0x48a   :  { %6479 = vmatpush3.bf16.msra.mxu1 %v8512_v27  ;;  %v8559_v43 = vpack.c.bf16 %v179_v28, %v176_v48  ;;  %v186_v27 = vld [vmem:[%s9689_s7 + $0x170] sm:$0xff] }
 0x48b   :  { %9933 = vst [vmem:[#allocation69_spill] sm:$0xff] %v8538_v3  ;;  %6480 = vmatprep.subr.bf16.mxu1 %v9907_v10  ;;  %v182_v28 = vld [vmem:[%s9689_s7 + $0x150] sm:$0xff] }
 0x48c   :  { %6452 = vmatpush1.bf16.msra.mxu0 %v8510_v41  ;;  %9936 = vst [vmem:[#allocation72_spill] sm:$0xff] %v8559_v43 }
 0x48d   :  { %6454 = vmatprep.subr.bf16.mxu0 %v8519_v24 }
 0x48e   :  { %6482 = vmatpush3.bf16.msra.mxu1 %v8540_v26  ;;  %v183_v26 = vld [vmem:[%s9689_s7 + $0x158] sm:$0xff] }
 0x48f   :  { %6483 = vmatprep.subr.bf16.mxu1 %v9907_v10  ;;  %v8574_v48 = vpack.c.bf16 %v186_v27, %v183_v26  ;;  %v187_v27 = vld [vmem:[%s9689_s7 + $0x178] sm:$0xff] }
 0x490   :  { %6456 = vmatpush1.bf16.msra.mxu0 %v8538_v3  ;;  %v8592_v26 = vpack.c.bf16 %v187_v27, %v184_v19 }
 0x491   :  { %6458 = vmatprep.subr.bf16.mxu0 %v8544_v30  ;;  %9938 = vst [vmem:[#allocation74_spill] sm:$0xff] %v8574_v48 }
 0x492   :  { %6485 = vmatpush3.bf16.msra.mxu1 %v8564_v36  ;;  %9940 = vst [vmem:[#allocation76_spill] sm:$0xff] %v8592_v26 }
 0x493   :  { %6486 = vmatprep.subr.bf16.mxu1 %v9907_v10 }
 0x494   :  { %6460 = vmatpush1.bf16.msra.mxu0 %v8559_v43  ;;  %v8586_v43 = vpack.c.bf16 %v185_v56, %v182_v28  ;;  %v8601_v28 = vld [vmem:[%s9690_s6] ss:$0 sm:$0xff] }
 0x495   :  { %6462 = vmatprep.subr.bf16.mxu0 %v8574_v48 }
 0x496   :  { %9939 = vst [vmem:[#allocation75_spill] sm:$0xff] %v8586_v43  ;;  %6488 = vmatpush3.bf16.msra.mxu1 %v8592_v26 }
 0x497   :  { %6514 = vmatprep.subr.bf16.mxu1 %v7993_v49 }
 0x498   :  { %6464 = vmatpush1.bf16.msra.mxu0 %v8586_v43 }
 0x499   :  { %6489 = vmatprep.subr.bf16.mxu0 %v9907_v10 }
 0x52c   :  { %v693_v36 = vpop.f32.mrb[2].mxu1 }
 0x52d   :  { %v5408_v30 = vpop.f32.mrb[3].mxu1 }
 0x52e   :  { %v254_v30 = vld [vmem:[%s9691_s11] sm:$0xff] }
 0x54c   :  { %v763_v56 = vpop.f32.mrb[4].mxu1 }
 0x54d   :  { %v764_v3 = vadd.f32 %v763_v56, %v693_v36  ;;  %v5443_v48 = vpop.f32.mrb[5].mxu1  ;;  %v257_v56 = vld [vmem:[%s9691_s11 + $0x18] sm:$0xff] }
 0x54e   :  { %v256_v48 = vld [vmem:[%s9691_s11 + $0x10] sm:$0xff] }
 0x54f   :  { %v773_v19 = vadd.f32 %v8601_v28, %v764_v3  ;;  %v255_v3 = vld [vmem:[%s9691_s11 + $0x8] sm:$0xff] }
 0x550   :  { %v8629_v36 = vpack.c.bf16 %v255_v3, %v254_v30  ;;  %v259_v30 = vld [vmem:[%s9691_s11 + $0x28] sm:$0xff] }
 0x551   :  { %v774_v27 = vmax.f32 %v773_v19, 0.0  ;;  %v8639_v19 = vpack.c.bf16 %v257_v56, %v256_v48  ;;  %v260_v48 = vld [vmem:[%s9691_s11 + $0x30] sm:$0xff]  ;;  %v261_v56 = vld [vmem:[%s9691_s11 + $0x38] sm:$0xff] }
 0x552   :  { %9941 = vst [vmem:[#allocation77_spill] sm:$0xff] %v8629_v36 }
 0x553   :  { %856 = vmatmul.mubr.f32.vlgmr.msra.gmra.mrb[0].mxu0 %v774_v27  ;;  %5477 = vmatmul.mubr.f32.vlgmr.msra.gmra.mrb[6].mxu1 %v774_v27  ;;  %9942 = vst [vmem:[#allocation78_spill] sm:$0xff] %v8639_v19  ;;  %v258_v27 = vld [vmem:[%s9691_s11 + $0x20] sm:$0xff] }
 0x554   :  { %6516 = vmatpush1.bf16.msra.mxu1 %v8007_v57  ;;  %5511 = vmatprep.mubr.msk.f32.mxu0 %vm7698_vm3, %v9913_v2  ;;  %v8649_v3 = vpack.c.bf16 %v259_v30, %v258_v27  ;;  %v262_v27 = vld [vmem:[%s9691_s11 + $0x40] sm:$0xff]  ;;  %v263_v30 = vld [vmem:[%s9691_s11 + $0x48] sm:$0xff] }
 0x555   :  { %6518 = vmatprep.subr.bf16.mxu1 %v8009_v59  ;;  %1141 = vmatprep.mubr.f32.mxu1 %v9913_v2 }
 0x556   :  { %6491 = vmatpush3.bf16.msra.mxu0 %v8629_v36  ;;  %9943 = vst [vmem:[#allocation79_spill] sm:$0xff] %v8649_v3 }
 0x557   :  { %6492 = vmatprep.subr.bf16.mxu0 %v9907_v10 }
 0x558   :  { %6520 = vmatpush1.bf16.msra.mxu1 %v8025_v13 }
 0x559   :  { %6522 = vmatprep.subr.bf16.mxu1 %v8029_v17 }
 0x55a   :  { %6494 = vmatpush3.bf16.msra.mxu0 %v8639_v19 }
 0x55b   :  { %6495 = vmatprep.subr.bf16.mxu0 %v9907_v10 }
 0x55c   :  { %6524 = vmatpush1.bf16.msra.mxu1 %v8050_v31 }
 0x55d   :  { %6526 = vmatprep.subr.bf16.mxu1 %v8054_v34 }
 0x55e   :  { %6497 = vmatpush3.bf16.msra.mxu0 %v8649_v3 }
 0x55f   :  { %6498 = vmatprep.subr.bf16.mxu0 %v9907_v10 }
 0x560   :  { %6528 = vmatpush1.bf16.msra.mxu1 %v8072_v44 }
 0x561   :  { %6530 = vmatprep.subr.bf16.mxu1 %v8078_v47 }
 0x564   :  { %6532 = vmatpush1.bf16.msra.mxu1 %v8093_v63 }
 0x565   :  { %6534 = vmatprep.subr.bf16.mxu1 %v8096_v0  ;;  %v269_v0 = vld [vmem:[%s9691_s11 + $0x78] sm:$0xff] }
 0x568   :  { %6536 = vmatpush1.bf16.msra.mxu1 %v8111_v16  ;;  %v268_v16 = vld [vmem:[%s9691_s11 + $0x70] sm:$0xff] }
 0x569   :  { %6538 = vmatprep.subr.bf16.mxu1 %v8114_v18 }
 0x56c   :  { %6540 = vmatpush1.bf16.msra.mxu1 %v8129_v33  ;;  %v266_v33 = vld [vmem:[%s9691_s11 + $0x60] sm:$0xff] }
 0x56d   :  { %6542 = vmatprep.subr.bf16.mxu1 %v8132_v35  ;;  %v8669_v35 = vpack.c.bf16 %v263_v30, %v262_v27  ;;  %v267_v27 = vld [vmem:[%s9691_s11 + $0x68] sm:$0xff] }
 0x56e   :  { %v8688_v30 = vpack.c.bf16 %v267_v27, %v266_v33  ;;  %v252_v33 = vld [vmem:[%s9692_s9] sm:$0x7] }
 0x56f   :  { %9945 = vst [vmem:[#allocation81_spill] sm:$0xff] %v8669_v35  ;;  %v779_v27 = vrot.slane %v252_v33, %v7950_v5 }
 0x570   :  { %6544 = vmatpush1.bf16.msra.mxu1 %v8141_v39  ;;  %v8659_v39 = vpack.c.bf16 %v261_v56, %v260_v48  ;;  %v264_v48 = vld [vmem:[%s9691_s11 + $0x50] sm:$0xff]  ;;  %v265_v56 = vld [vmem:[%s9691_s11 + $0x58] sm:$0xff]  ;;  %9947 = vst [vmem:[#allocation83_spill] sm:$0xff] %v8688_v30 }
 0x571   :  { %6577 = vmatprep.subr.bf16.mxu1 %v9907_v10  ;;  %v8682_v18 = vpack.c.bf16 %v265_v56, %v264_v48  ;;  %v8698_v48 = vpack.c.bf16 %v269_v0, %v268_v16  ;;  %v275_v56 = vrot.slane %v7941_v60, %v7950_v5  ;;  %v783_v0 = vrot.slane %v252_v33, %v7953_v6 }
 0x572   :  { %9944 = vst [vmem:[#allocation80_spill] sm:$0xff] %v8659_v39  ;;  %6500 = vmatpush3.bf16.msra.mxu0 %v8659_v39 }
 0x573   :  { %6501 = vmatprep.subr.bf16.mxu0 %v9907_v10  ;;  %9946 = vst [vmem:[#allocation82_spill] sm:$0xff] %v8682_v18  ;;  %9948 = vst [vmem:[#allocation84_spill] sm:$0xff] %v8698_v48  ;;  %v8712_v16 = vadd.f32 %v779_v27, %v275_v56  ;;  %v282_v56 = vsub.s32 2, %v7935_v58 }
 0x575   :  { %v8720_v17 = vrot.slane %v7941_v60, %v282_v56 }
 0x576   :  { %6503 = vmatpush3.bf16.msra.mxu0 %v8669_v35 }
 0x577   :  { %6504 = vmatprep.subr.bf16.mxu0 %v9907_v10 }
 0x57a   :  { %6506 = vmatpush3.bf16.msra.mxu0 %v8682_v18 }
 0x57b   :  { %6507 = vmatprep.subr.bf16.mxu0 %v9907_v10 }
 0x57e   :  { %6509 = vmatpush3.bf16.msra.mxu0 %v8688_v30  ;;  %v279_v30 = vrot.slane %v7941_v60, %v7953_v6 }
 0x57f   :  { %6510 = vmatprep.subr.bf16.mxu0 %v9907_v10 }
 0x580   :  { %v8714_v63 = vadd.f32 %v783_v0, %v279_v30  ;;  %v8722_v30 = vrot.slane %v252_v33, %v282_v56  ;;  %v9951_v33 = vld [vmem:[#allocation45_spill] sm:$0xff]  ;;  %v9952_v56 = vld [vmem:[#allocation46_spill] sm:$0xff] }
 0x582   :  { %6512 = vmatpush3.bf16.msra.mxu0 %v8698_v48 }
 0x583   :  { %6546 = vmatprep.subr.bf16.mxu0 %v7782_v4 }
 0x626   :  { %v857_v18 = vpop.f32.mrb[0].mxu0  ;;  %v928_v48 = vpop.f32.mrb[6].mxu1 }
 0x627   :  { %v7534_v4 = vadd.f32 %v8712_v16, %v857_v18  ;;  %v859_v35 = vpop.f32.mrb[1].mxu0  ;;  %v5478_v47 = vpop.f32.mrb[7].mxu1 }
 0x628   :  { %v7536_v39 = vadd.f32 %v8714_v63, %v859_v35 }
 0x629   :  { %v4853_v44 = vmul.f32 -1.442695, %v7534_v4  ;;  %v430_v4 = vadd.f32 %v7946_v62, %v8720_v17  ;;  %v9949_v62 = vld [vmem:[#allocation43_spill] sm:$0xff] }
 0x62a   :  { %v4854_v34 = vmul.f32 -1.442695, %v7536_v39 }
 0x62b   :  { %7585 = vpow2.f32 %v4853_v44  ;;  %v929_v44 = vadd.f32 %v928_v48, %v8722_v30  ;;  %v9950_v48 = vld [vmem:[#allocation44_spill] sm:$0xff] }
 0x62c   :  { %7587 = vpow2.f32 %v4854_v34 }
 0x635   :  { %v7586_v31 = vpop.eup %7585 }
 0x636   :  { %v936_v3 = vadd.f32 1.0, %v7586_v31  ;;  %v7588_v27 = vpop.eup %7587 }
 0x637   :  { %v943_v18 = vadd.f32 1.0, %v7588_v27  ;;  %v9953_v27 = vld [vmem:[#allocation47_spill] sm:$0xff] }
 0x638   :  { %7589 = vrcp.f32 %v936_v3 }
 0x639   :  { %7591 = vrcp.f32 %v943_v18  ;;  %v8780_v18 = vld [vmem:[%s9693_s12] ss:$0 sm:$0xff] }
 0x63a   :  { %9954 = vst [vmem:[#allocation85_spill] sm:$0xff] %v8780_v18 }
 0x642   :  { %v7590_v47 = vpop.eup %7589 }
 0x643   :  { %v946_v35 = vmul.f32 %v7590_v47, %v430_v4  ;;  %v7592_v31 = vpop.eup %7591 }
 0x644   :  { %v949_v39 = vsub.f32 1.0, %v7592_v31  ;;  %v951_v0 = vmul.f32 0.0, %v7592_v31 }
 0x645   :  { %v947_v34 = vadd.f32 %v946_v35, %v929_v44  ;;  %v9955_v35 = vld [vmem:[#allocation25_spill] sm:$0xff] }
 0x647   :  { %7593 = vtanh.f32 %v947_v34 }
 0x651   :  { %v7594_v58 = vpop.eup %7593 }
 0x652   :  { %v950_v3 = vmul.f32 %v7594_v58, %v949_v39 }
 0x654   :  { %v8727_v60 = vadd.f32 %v951_v0, %v950_v3  ;;  %v9956_v3 = vld [vmem:[#allocation15_spill] sm:$0xff] }
 0x656   :  { %5512 = vmatmul.mubr.f32.vlgmr.msra.gmra.mrb[4].mxu0 %v8727_v60  ;;  %1142 = vmatmul.mubr.f32.vlgmr.msra.gmra.mrb[8].mxu1 %v8727_v60 }
 0x657   :  { %6548 = vmatpush1.bf16.msra.mxu0 %v7793_v8  ;;  %1212 = vmatprep.mubr.f32.mxu0 %v9913_v2 }
 0x658   :  { %6550 = vmatprep.subr.bf16.mxu0 %v7795_v9  ;;  %6579 = vmatpush3.bf16.msra.mxu1 %v8151_v50 }
 0x659   :  { %6580 = vmatprep.subr.bf16.mxu1 %v9907_v10  ;;  %5546 = vmatprep.mubr.msk.f32.mxu1 %vm7698_vm3, %v9913_v2 }
 0x65b   :  { %6552 = vmatpush1.bf16.msra.mxu0 %v7811_v14 }
 0x65c   :  { %6554 = vmatprep.subr.bf16.mxu0 %v7814_v15  ;;  %6582 = vmatpush3.bf16.msra.mxu1 %v8162_v1 }
 0x65d   :  { %6583 = vmatprep.subr.bf16.mxu1 %v9907_v10 }
 0x65f   :  { %6556 = vmatpush1.bf16.msra.mxu0 %v7829_v20 }
 0x660   :  { %6558 = vmatprep.subr.bf16.mxu0 %v7832_v21  ;;  %6585 = vmatpush3.bf16.msra.mxu1 %v8174_v11 }
 0x661   :  { %6586 = vmatprep.subr.bf16.mxu1 %v9907_v10 }
 0x663   :  { %6560 = vmatpush1.bf16.msra.mxu0 %v7860_v29 }
 0x664   :  { %6562 = vmatprep.subr.bf16.mxu0 %v7865_v32  ;;  %6588 = vmatpush3.bf16.msra.mxu1 %v8184_v25 }
 0x665   :  { %6589 = vmatprep.subr.bf16.mxu1 %v9907_v10 }
 0x667   :  { %6564 = vmatpush1.bf16.msra.mxu0 %v7881_v38 }
 0x668   :  { %6566 = vmatprep.subr.bf16.mxu0 %v7885_v40  ;;  %6591 = vmatpush3.bf16.msra.mxu1 %v8194_v37 }
 0x669   :  { %6592 = vmatprep.subr.bf16.mxu1 %v9907_v10 }
 0x66b   :  { %6568 = vmatpush1.bf16.msra.mxu0 %v7900_v45 }
 0x66c   :  { %6570 = vmatprep.subr.bf16.mxu0 %v7903_v46  ;;  %6594 = vmatpush3.bf16.msra.mxu1 %v8204_v53 }
 0x66d   :  { %6595 = vmatprep.subr.bf16.mxu1 %v9907_v10 }
 0x66f   :  { %6572 = vmatpush1.bf16.msra.mxu0 %v7918_v51 }
 0x670   :  { %6574 = vmatprep.subr.bf16.mxu0 %v7921_v52  ;;  %6597 = vmatpush3.bf16.msra.mxu1 %v8214_v7 }
 0x671   :  { %6598 = vmatprep.subr.bf16.mxu1 %v9907_v10 }
 0x673   :  { %6576 = vmatpush1.bf16.msra.mxu0 %v7930_v55  ;;  %v9960_v55 = vld [vmem:[#allocation19_spill] sm:$0xff] }
 0x674   :  { %6600 = vmatpush3.bf16.msra.mxu1 %v9949_v62  ;;  %6601 = vmatprep.subr.bf16.mxu0 %v9907_v10 }
 0x675   :  { %6638 = vmatprep.subr.bf16.mxu1 %v8382_v54 }
 0x676   :  { %1213 = vmatmul.mubr.f32.vlgmr.msra.gmra.mrb[6].mxu0 %v8727_v60 }
 0x677   :  { %6603 = vmatpush3.bf16.msra.mxu0 %v9950_v48  ;;  %5565 = vmatprep.mubr.msk.f32.mxu0 %vm7698_vm3, %v9913_v2  ;;  %v9959_v48 = vld [vmem:[#allocation18_spill] sm:$0xff] }
 0x678   :  { %6604 = vmatprep.subr.bf16.mxu0 %v9907_v10 }
 0x67b   :  { %6606 = vmatpush3.bf16.msra.mxu0 %v9951_v33 }
 0x67c   :  { %6607 = vmatprep.subr.bf16.mxu0 %v9907_v10 }
 0x67f   :  { %6609 = vmatpush3.bf16.msra.mxu0 %v9952_v56  ;;  %v9958_v56 = vld [vmem:[#allocation16_spill] sm:$0xff] }
 0x680   :  { %6610 = vmatprep.subr.bf16.mxu0 %v9907_v10 }
 0x683   :  { %6612 = vmatpush3.bf16.msra.mxu0 %v9953_v27 }
 0x684   :  { %6613 = vmatprep.subr.bf16.mxu0 %v9907_v10 }
 0x729   :  { %v1025_v4 = vpop.f32.mrb[4].mxu0 }
 0x72a   :  { %v1026_v47 = vadd.f32 %v8780_v18, %v1025_v4  ;;  %v5513_v44 = vpop.f32.mrb[5].mxu0 }
 0x72c   :  { %v1036_v34 = vrot.slane %v1026_v47, %v9955_v35  ;;  %v1057_v4 = vsel %vm1056_vm5, %v1026_v47, -inf }
 0x72e   :  { %v1037_v31 = vcombine.high %v1036_v34, %v1036_v34  ;;  %4856 = vst.sshfl [vmem:[%s9685_s13 + $0x1] sm:$0x1 pattern:$0x73625140] %v1036_v34  ;;  %v9957_v34 = vld [vmem:[#allocation17_spill] sm:$0xff] }
 0x730   :  { %4857 = vst.sshfl [vmem:[%s9685_s13 + $0x9] sm:$0x1 pattern:$0x73625140] %v1037_v31 }
 0x749   :  { %v8790_v39 = vpop.f32.mrb[6].mxu0 }
 0x74a   :  { %v1216_v58 = vpop.f32.mrb[7].mxu0 }
 0x74b   :  { %v1217_v0 = vadd.f32 %v1216_v58, %v9956_v3 }
 0x74d   :  { %1221 = vperm.xlu1 %7575, %v1217_v0  }
 0x771   :  { %1058 = vmax.xlane.f32.xlu1 %v1057_v4 }
 0x7cc   :  { %v1222_v44 = vpop.permute.xlu1 %1221 }
 0x7cd   :  { %v1226_v35 = vrot.slane %v1222_v44, %v7950_v5  ;;  %v1230_v18 = vrot.slane %v1222_v44, %v7953_v6 }
 0x7cf   :  { %v1233_v27 = vadd.f32 %v1226_v35, %v9957_v34  ;;  %v1234_v31 = vadd.f32 %v1230_v18, %v9958_v56 }
 0x7d1   :  { %1238 = vperm.xlu0 %7576, %v1233_v27  }
 0x7d5   :  { %1241 = vperm.xlu0 %7576, %v1234_v31  }
 0x7fe   :  { %v1059_v33 = vpop.xlane.xlu1 %1058 }
 0x7ff   :  { %vm1060_vm6 = vcmp.eq.f32.partialorder %v1026_v47, %v1059_v33 }
 0x800   :  { %v1061_v58 = vsel %vm1060_vm6, %v9959_v48, 128 }
 0x801   :  { %v1062_v0 = vsel %vm1056_vm5, %v1061_v58, 2147483647 }
 0x802   :  { %v1064_v3 = vshra.s32 %v1062_v0, 16  ;;  %v1063_v56 = vand.u32 65535, %v1062_v0 }
 0x804   :  { %v1066_v54 = vcvt.s32.f32 %v1064_v3  ;;  %v1065_v47 = vcvt.s32.f32 %v1063_v56 }
 0x806   :  { %1067 = vmin.xlane.f32.xlu1 %v1066_v54 }
 0x850   :  { %v1239_v4 = vpop.permute.xlu0 %1238 }
 0x851   :  { %v1246_v7 = vrot.slane %v1239_v4, %v9960_v55 }
 0x854   :  { %v1242_v62 = vpop.permute.xlu0 %1241 }
 0x855   :  { %v1250_v44 = vrot.slane %v1242_v62, %v9960_v55 }
 0x857   :  { %v1251_v35 = vsel %vm466_vm1, %v1250_v44, %v1246_v7 }
 0x858   :  { %v1253_v18 = vsel %vm469_vm2, %v1251_v35, -inf }
 0x859   :  { %1254 = vmax.xlane.f32.xlu0 %v1253_v18  ;;  %v9961_v18 = vmov 1.0  }
 0x893   :  { %v1068_v33 = vpop.xlane.xlu1 %1067 }
 0x894   :  { %vm1069_vm7 = vcmp.eq.f32.partialorder %v1066_v54, %v1068_v33  ;;  %v1074_v0 = vcvt.f32.s32 %v1068_v33  ;;  %v9967_v33 = vld [vmem:[#allocation72_spill] sm:$0xff] }
 0x895   :  { %v1070_v34 = vsel %vm1069_vm7, %v1065_v47, inf  ;;  %v9968_v47 = vld [vmem:[#allocation74_spill] sm:$0xff] }
 0x896   :  { %1071 = vmin.xlane.f32.xlu1 %v1070_v34  ;;  %v1075_v54 = vshll.u32 %v1074_v0, 16 }
 0x8e6   :  { %v1255_v58 = vpop.xlane.xlu0 %1254 }
 0x8e7   :  { %v1260_v3 = vrot.slane %v1255_v58, %v7950_v5  ;;  %v1264_v52 = vrot.slane %v1255_v58, %v7953_v6 }
 0x8e9   :  { %v1267_v51 = vsub.f32 %v1233_v27, %v1260_v3  ;;  %v1268_v4 = vsub.f32 %v1234_v31, %v1264_v52  ;;  %v9963_v52 = vld [vmem:[#allocation62_spill] sm:$0xff]  ;;  %v9965_v27 = vld [vmem:[#allocation69_spill] sm:$0xff]  ;;  %v9966_v31 = vld [vmem:[#allocation71_spill] sm:$0xff] }
 0x8eb   :  { %v1269_v53 = vmul.f32 1.442695, %v1267_v51  ;;  %v1271_v62 = vmul.f32 1.442695, %v1268_v4  ;;  %v9962_v51 = vld [vmem:[#allocation60_spill] sm:$0xff] }
 0x8ed   :  { %7595 = vpow2.f32 %v1269_v53  ;;  %v9964_v53 = vld [vmem:[#allocation63_spill] sm:$0xff] }
 0x8ee   :  { %7597 = vpow2.f32 %v1271_v62 }
 0x8f7   :  { %v7596_v7 = vpop.eup %7595 }
 0x8f8   :  { %1276 = vperm.xlu1 %7575, %v7596_v7   ;;  %v7598_v44 = vpop.eup %7597 }
 0x8fc   :  { %1279 = vperm.xlu1 %7575, %v7598_v44  }
 0x923   :  { %v1072_v56 = vpop.xlane.xlu1 %1071 }
 0x924   :  { %v1073_v35 = vcvt.f32.s32 %v1072_v56 }
 0x926   :  { %v1076_v34 = vadd.s32 %v1075_v54, %v1073_v35 }
 0x928   :  { %vm1335_vm8 = vcmp.eq.s32.totalorder %v9959_v48, %v1076_v34 }
 0x929   :  { %5547 = vmatmul.mubr.msk.f32.vlgmr.msra.gmra.mrb[10].mxu1 %vm1335_vm8, %v9961_v18 }
 0x92a   :  { %6640 = vmatpush1.bf16.msra.mxu1 %v8393_v22  ;;  %1619 = vmatprep.mubr.f32.mxu1 %v9913_v2 }
 0x92b   :  { %6642 = vmatprep.subr.bf16.mxu1 %v8407_v42 }
 0x92e   :  { %6644 = vmatpush1.bf16.msra.mxu1 %v8420_v61 }
 0x92f   :  { %6646 = vmatprep.subr.bf16.mxu1 %v8435_v23 }
 0x932   :  { %6648 = vmatpush1.bf16.msra.mxu1 %v9962_v51 }
 0x933   :  { %6650 = vmatprep.subr.bf16.mxu1 %v9963_v52 }
 0x936   :  { %6652 = vmatpush1.bf16.msra.mxu1 %v9964_v53  ;;  %v9970_v53 = vld [vmem:[#allocation48_spill] sm:$0xff] }
 0x937   :  { %6654 = vmatprep.subr.bf16.mxu1 %v8491_v12 }
 0x93a   :  { %6656 = vmatpush1.bf16.msra.mxu1 %v8510_v41 }
 0x93b   :  { %6658 = vmatprep.subr.bf16.mxu1 %v8519_v24 }
 0x93e   :  { %6660 = vmatpush1.bf16.msra.mxu1 %v9965_v27 }
 0x93f   :  { %6662 = vmatprep.subr.bf16.mxu1 %v9966_v31 }
 0x942   :  { %6664 = vmatpush1.bf16.msra.mxu1 %v9967_v33 }
 0x943   :  { %6666 = vmatprep.subr.bf16.mxu1 %v9968_v47 }
 0x946   :  { %6668 = vmatpush1.bf16.msra.mxu1 %v8586_v43 }
 0x947   :  { %6693 = vmatprep.subr.bf16.mxu1 %v9907_v10 }
 0x977   :  { %v1277_v58 = vpop.permute.xlu1 %1276 }
 0x978   :  { %v1284_v4 = vrot.slane %v1277_v58, %v9960_v55 }
 0x97b   :  { %v1280_v3 = vpop.permute.xlu1 %1279 }
 0x97c   :  { %v1288_v62 = vrot.slane %v1280_v3, %v9960_v55 }
 0x97e   :  { %v1289_v0 = vsel %vm466_vm1, %v1288_v62, %v1284_v4  ;;  %v8834_v4 = vld [vmem:[%s9681_s0] sm:$0xff] }
 0x97f   :  { %v1291_v56 = vsel %vm469_vm2, %v1289_v0, 0.0  ;;  %9969 = vst [vmem:[#allocation18_spill] sm:$0xff] %v8834_v4 }
 0x980   :  { %1292 = vadd.xlane.f32.xlu1 %v1291_v56 }
 0x9fc   :  { %v1404_v54 = vpop.f32.mrb[10].mxu1 }
 0x9fd   :  { %v5548_v35 = vpop.f32.mrb[11].mxu1 }
 0xa0d   :  { %v1293_v34 = vpop.xlane.xlu1 %1292 }
 0xa0e   :  { %v1298_v47 = vrot.slane %v1293_v34, %v7950_v5  ;;  %v1302_v43 = vrot.slane %v1293_v34, %v7953_v6 }
 0xa10   :  { %7599 = vrcp.f32 %v1298_v47 }
 0xa11   :  { %7601 = vrcp.f32 %v1302_v43  ;;  %v8841_v43 = vld [vmem:[%s9681_s0 + $0x8] sm:$0xff] }
 0xa1a   :  { %v7600_v33 = vpop.eup %7599 }
 0xa1b   :  { %v1306_v31 = vmul.f32 %v7600_v33, %v7596_v7  ;;  %v7602_v27 = vpop.eup %7601 }
 0xa1c   :  { %v1308_v58 = vmul.f32 %v7602_v27, %v7598_v44 }
 0xa1d   :  { %1311 = vperm.xlu0 %7576, %v1306_v31  }
 0xa21   :  { %1316 = vperm.xlu0 %7576, %v1308_v58  }
 0xa9c   :  { %v1312_v3 = vpop.permute.xlu0 %1311 }
 0xa9d   :  { %v1319_v62 = vmul.f32 %v8834_v4, %v1312_v3 }
 0xa9f   :  { %v1321_v0 = vsel %vm89_vm0, %v1319_v62, 0.0 }
 0xaa0   :  { %v1322_v56 = vrot.slane %v1321_v0, 4  ;;  %v1317_v35 = vpop.permute.xlu0 %1316 }
 0xaa1   :  { %v1320_v7 = vmul.f32 %v8841_v43, %v1317_v35  ;;  %v9977_v35 = vld [vmem:[#allocation55_spill] sm:$0xff] }
 0xaa2   :  { %v1323_v44 = vadd.f32 %v1322_v56, %v1321_v0  ;;  %v9971_v0 = vld [vmem:[#allocation49_spill] sm:$0xff]  ;;  %v9972_v56 = vld [vmem:[#allocation50_spill] sm:$0xff] }
 0xaa3   :  { %v1328_v27 = vsel %vm89_vm0, %v1320_v7, 0.0  ;;  %v9978_v7 = vld [vmem:[#allocation57_spill] sm:$0xff] }
 0xaa4   :  { %v1324_v31 = vrot.slane %v1323_v44, 2  ;;  %v1329_v33 = vrot.slane %v1328_v27, 4 }
 0xaa6   :  { %v1325_v47 = vadd.f32 %v1324_v31, %v1323_v44  ;;  %v1330_v34 = vadd.f32 %v1329_v33, %v1328_v27  ;;  %v9979_v44 = vld [vmem:[#allocation58_spill] sm:$0xff]  ;;  %v9980_v27 = vld [vmem:[#allocation61_spill] sm:$0xff]  ;;  %v9981_v31 = vld [vmem:[#allocation64_spill] sm:$0xff] }
 0xaa7   :  { %v9983_v33 = vld [vmem:[#allocation70_spill] sm:$0xff] }
 0xaa8   :  { %v1331_v58 = vrot.slane %v1330_v34, 2  ;;  %v1326_v3 = vrot.slane %v1325_v47, 1 }
 0xaaa   :  { %v1332_v4 = vadd.f32 %v1331_v58, %v1330_v34  ;;  %v1327_v24 = vadd.f32 %v1326_v3, %v1325_v47  ;;  %v9984_v47 = vld [vmem:[#allocation73_spill] sm:$0xff] }
 0xaac   :  { %v1333_v62 = vrot.slane %v1332_v4, 1 }
 0xaae   :  { %v1334_v41 = vadd.f32 %v1333_v62, %v1332_v4  ;;  %v9973_v4 = vld [vmem:[#allocation51_spill] sm:$0xff] }
 0xab0   :  { %v1410_v12 = vsel %vm466_vm1, %v1334_v41, %v1327_v24  ;;  %v9975_v24 = vld [vmem:[#allocation53_spill] sm:$0xff]  ;;  %v9976_v41 = vld [vmem:[#allocation54_spill] sm:$0xff] }
 0xab1   :  { %5566 = vmatmul.mubr.msk.f32.vlgmr.msra.gmra.mrb[8].mxu0 %vm89_vm0, %v1410_v12  ;;  %v9974_v12 = vld [vmem:[#allocation52_spill] sm:$0xff] }
 0xab2   :  { %6615 = vmatpush3.bf16.msra.mxu0 %v9970_v53  ;;  %5600 = vmatprep.mubr.msk.f32.mxu0 %vm7698_vm3, %v9913_v2 }
 0xab3   :  { %6616 = vmatprep.subr.bf16.mxu0 %v9907_v10 }
 0xab6   :  { %6618 = vmatpush3.bf16.msra.mxu0 %v9971_v0 }
 0xab7   :  { %6619 = vmatprep.subr.bf16.mxu0 %v9907_v10 }
 0xaba   :  { %6621 = vmatpush3.bf16.msra.mxu0 %v9972_v56 }
 0xabb   :  { %6622 = vmatprep.subr.bf16.mxu0 %v9907_v10 }
 0xabe   :  { %6624 = vmatpush3.bf16.msra.mxu0 %v9973_v4 }
 0xabf   :  { %6625 = vmatprep.subr.bf16.mxu0 %v9907_v10 }
 0xac2   :  { %6627 = vmatpush3.bf16.msra.mxu0 %v9974_v12 }
 0xac3   :  { %6628 = vmatprep.subr.bf16.mxu0 %v9907_v10 }
 0xac6   :  { %6630 = vmatpush3.bf16.msra.mxu0 %v9975_v24 }
 0xac7   :  { %6631 = vmatprep.subr.bf16.mxu0 %v9907_v10 }
 0xaca   :  { %6633 = vmatpush3.bf16.msra.mxu0 %v9976_v41 }
 0xacb   :  { %6634 = vmatprep.subr.bf16.mxu0 %v9907_v10 }
 0xace   :  { %6636 = vmatpush3.bf16.msra.mxu0 %v9977_v35 }
 0xacf   :  { %6669 = vmatprep.subr.bf16.mxu0 %v9907_v10 }
 0xad1   :  { %5601 = vmatmul.mubr.f32.vlgmr.msra.gmra.mrb[10].mxu0 %v1404_v54  ;;  %v9982_v54 = vld [vmem:[#allocation67_spill] sm:$0xff] }
 0xad2   :  { %6671 = vmatpush3.bf16.msra.mxu0 %v9978_v7  ;;  %5635 = vmatprep.mubr.msk.f32.mxu0 %vm7698_vm3, %v9913_v2 }
 0xad3   :  { %6672 = vmatprep.subr.bf16.mxu0 %v9907_v10 }
 0xad6   :  { %6674 = vmatpush3.bf16.msra.mxu0 %v9979_v44 }
 0xad7   :  { %6675 = vmatprep.subr.bf16.mxu0 %v9907_v10 }
 0xada   :  { %6677 = vmatpush3.bf16.msra.mxu0 %v9980_v27 }
 0xadb   :  { %6678 = vmatprep.subr.bf16.mxu0 %v9907_v10 }
 0xade   :  { %6680 = vmatpush3.bf16.msra.mxu0 %v9981_v31 }
 0xadf   :  { %6681 = vmatprep.subr.bf16.mxu0 %v9907_v10 }
 0xae2   :  { %6683 = vmatpush3.bf16.msra.mxu0 %v9982_v54 }
 0xae3   :  { %6684 = vmatprep.subr.bf16.mxu0 %v9907_v10 }
 0xae6   :  { %6686 = vmatpush3.bf16.msra.mxu0 %v9983_v33 }
 0xae7   :  { %6687 = vmatprep.subr.bf16.mxu0 %v9907_v10 }
 0xaea   :  { %6689 = vmatpush3.bf16.msra.mxu0 %v9984_v47 }
 0xaeb   :  { %6690 = vmatprep.subr.bf16.mxu0 %v9907_v10 }
 0xaee   :  { %6692 = vmatpush3.bf16.msra.mxu0 %v8592_v26 }
 0xaef   :  { %6718 = vmatprep.subr.bf16.mxu0 %v7993_v49 }
 0xb84   :  { %v1479_v34 = vpop.f32.mrb[8].mxu0 }
 0xb85   :  { %v5567_v58 = vpop.f32.mrb[9].mxu0 }
 0xb86   :  { %v9990_v58 = vld [vmem:[#allocation28_spill] sm:$0xff] }
 0xba4   :  { %v1549_v3 = vpop.f32.mrb[10].mxu0 }
 0xba5   :  { %v1550_v62 = vadd.f32 %v1549_v3, %v1479_v34  ;;  %v5602_v31 = vpop.f32.mrb[11].mxu0  ;;  %v9989_v34 = vld [vmem:[#allocation80_spill] sm:$0xff]  ;;  %v9991_v3 = vld [vmem:[#allocation29_spill] sm:$0xff] }
 0xba6   :  { %v9987_v31 = vld [vmem:[#allocation26_spill] sm:$0xff] }
 0xba7   :  { %v1553_v54 = vadd.f32 %v8601_v28, %v1550_v62  ;;  %v9985_v28 = vld [vmem:[#allocation24_spill] sm:$0xff]  ;;  %v9992_v62 = vld [vmem:[#allocation81_spill] sm:$0xff] }
 0xba9   :  { %v1554_v27 = vmax.f32 %v1553_v54, 0.0  ;;  %v9988_v54 = vld [vmem:[#allocation27_spill] sm:$0xff] }
 0xbab   :  { %1620 = vmatmul.mubr.f32.vlgmr.msra.gmra.mrb[8].mxu1 %v1554_v27  ;;  %5636 = vmatmul.mubr.f32.vlgmr.msra.gmra.mrb[12].mxu0 %v1554_v27  ;;  %v9986_v27 = vld [vmem:[#allocation79_spill] sm:$0xff] }
 0xbac   :  { %6695 = vmatpush3.bf16.msra.mxu1 %v8629_v36  ;;  %6720 = vmatpush1.bf16.msra.mxu0 %v8007_v57 }
 0xbad   :  { %6696 = vmatprep.subr.bf16.mxu1 %v9907_v10  ;;  %6722 = vmatprep.subr.bf16.mxu0 %v8009_v59 }
 0xbae   :  { %5670 = vmatprep.mubr.msk.f32.mxu1 %vm7698_vm3, %v9913_v2  ;;  %1898 = vmatprep.mubr.f32.mxu0 %v9913_v2 }
 0xbb0   :  { %6698 = vmatpush3.bf16.msra.mxu1 %v8639_v19  ;;  %6724 = vmatpush1.bf16.msra.mxu0 %v8025_v13  ;;  %v9993_v13 = vld [vmem:[#allocation30_spill] sm:$0xff] }
 0xbb1   :  { %6699 = vmatprep.subr.bf16.mxu1 %v9907_v10  ;;  %6726 = vmatprep.subr.bf16.mxu0 %v9985_v28  ;;  %v9996_v28 = vld [vmem:[#allocation32_spill] sm:$0xff] }
 0xbb4   :  { %6701 = vmatpush3.bf16.msra.mxu1 %v9986_v27  ;;  %6728 = vmatpush1.bf16.msra.mxu0 %v9987_v31  ;;  %v9994_v27 = vld [vmem:[#allocation31_spill] sm:$0xff]  ;;  %v9995_v31 = vld [vmem:[#allocation82_spill] sm:$0xff] }
 0xbb5   :  { %6702 = vmatprep.subr.bf16.mxu1 %v9907_v10  ;;  %6730 = vmatprep.subr.bf16.mxu0 %v9988_v54  ;;  %v9999_v54 = vld [vmem:[#allocation34_spill] sm:$0xff] }
 0xbb8   :  { %6704 = vmatpush3.bf16.msra.mxu1 %v9989_v34  ;;  %6732 = vmatpush1.bf16.msra.mxu0 %v9990_v58  ;;  %v9997_v34 = vld [vmem:[#allocation33_spill] sm:$0xff]  ;;  %v9998_v58 = vld [vmem:[#allocation83_spill] sm:$0xff] }
 0xbb9   :  { %6705 = vmatprep.subr.bf16.mxu1 %v9907_v10  ;;  %6734 = vmatprep.subr.bf16.mxu0 %v9991_v3  ;;  %v10002_v3 = vld [vmem:[#allocation36_spill] sm:$0xff] }
 0xbbc   :  { %6707 = vmatpush3.bf16.msra.mxu1 %v9992_v62  ;;  %6736 = vmatpush1.bf16.msra.mxu0 %v9993_v13  ;;  %v10000_v62 = vld [vmem:[#allocation35_spill] sm:$0xff]  ;;  %v10001_v13 = vld [vmem:[#allocation84_spill] sm:$0xff] }
 0xbbd   :  { %6708 = vmatprep.subr.bf16.mxu1 %v9907_v10  ;;  %6738 = vmatprep.subr.bf16.mxu0 %v9994_v27  ;;  %v10003_v27 = vld [vmem:[#allocation3_spill] sm:$0xff] }
 0xbc0   :  { %6710 = vmatpush3.bf16.msra.mxu1 %v9995_v31  ;;  %6740 = vmatpush1.bf16.msra.mxu0 %v9996_v28 }
 0xbc1   :  { %6711 = vmatprep.subr.bf16.mxu1 %v9907_v10  ;;  %6742 = vmatprep.subr.bf16.mxu0 %v9997_v34 }
 0xbc4   :  { %6713 = vmatpush3.bf16.msra.mxu1 %v9998_v58  ;;  %6744 = vmatpush1.bf16.msra.mxu0 %v9999_v54 }
 0xbc5   :  { %6714 = vmatprep.subr.bf16.mxu1 %v9907_v10  ;;  %6746 = vmatprep.subr.bf16.mxu0 %v10000_v62 }
 0xbc8   :  { %6716 = vmatpush3.bf16.msra.mxu1 %v10001_v13  ;;  %6748 = vmatpush1.bf16.msra.mxu0 %v10002_v3 }
 0xbc9   :  { %6750 = vmatprep.subr.bf16.mxu1 %v10003_v27  ;;  %6781 = vmatprep.subr.bf16.mxu0 %v9907_v10  ;;  %v1215_v27 = vadd.f32 %v8790_v39, %v8720_v17  ;;  %v10009_v39 = vld [vmem:[#allocation43_spill] sm:$0xff] }
 0xc7e   :  { %v1621_v28 = vpop.f32.mrb[8].mxu1  ;;  %v1692_v31 = vpop.f32.mrb[12].mxu0 }
 0xc7f   :  { %v7538_v34 = vadd.f32 %v8712_v16, %v1621_v28  ;;  %v1623_v19 = vpop.f32.mrb[9].mxu1  ;;  %v5637_v58 = vpop.f32.mrb[13].mxu0  ;;  %v1693_v26 = vadd.f32 %v1692_v31, %v8722_v30  ;;  %v10011_v31 = vld [vmem:[#allocation44_spill] sm:$0xff] }
 0xc80   :  { %v7540_v54 = vadd.f32 %v8714_v63, %v1623_v19 }
 0xc81   :  { %v4861_v59 = vmul.f32 -1.442695, %v7538_v34 }
 0xc82   :  { %v4862_v57 = vmul.f32 -1.442695, %v7540_v54 }
 0xc83   :  { %7603 = vpow2.f32 %v4861_v59 }
 0xc84   :  { %7605 = vpow2.f32 %v4862_v57 }
 0xc8d   :  { %v7604_v62 = vpop.eup %7603 }
 0xc8e   :  { %v1700_v13 = vadd.f32 1.0, %v7604_v62  ;;  %v7606_v3 = vpop.eup %7605 }
 0xc8f   :  { %v1707_v36 = vadd.f32 1.0, %v7606_v3  ;;  %v10012_v3 = vld [vmem:[#allocation45_spill] sm:$0xff] }
 0xc90   :  { %7607 = vrcp.f32 %v1700_v13  ;;  %v10005_v13 = vld [vmem:[#allocation12_spill] sm:$0xff] }
 0xc91   :  { %7609 = vrcp.f32 %v1707_v36  ;;  %v10007_v36 = vld [vmem:[#allocation42_spill] sm:$0xff] }
 0xc9a   :  { %v7608_v49 = vpop.eup %7607 }
 0xc9b   :  { %v1710_v28 = vmul.f32 %v7608_v49, %v1215_v27  ;;  %v7610_v34 = vpop.eup %7609  ;;  %v10004_v49 = vld [vmem:[#allocation41_spill] sm:$0xff]  ;;  %v10010_v27 = vld [vmem:[#allocation56_spill] sm:$0xff] }
 0xc9c   :  { %v1713_v19 = vsub.f32 1.0, %v7610_v34  ;;  %v1715_v57 = vmul.f32 %v7610_v34, %v8727_v60  ;;  %v10008_v60 = vld [vmem:[#allocation14_spill] sm:$0xff] }
 0xc9d   :  { %v1711_v58 = vadd.f32 %v1710_v28, %v1693_v26  ;;  %v10006_v26 = vld [vmem:[#allocation13_spill] sm:$0xff]  ;;  %v10013_v28 = vld [vmem:[#allocation46_spill] sm:$0xff] }
 0xc9f   :  { %7611 = vtanh.f32 %v1711_v58  ;;  %v10014_v58 = vld [vmem:[#allocation47_spill] sm:$0xff] }
 0xca9   :  { %v7612_v59 = vpop.eup %7611 }
 0xcaa   :  { %v1714_v54 = vmul.f32 %v7612_v59, %v1713_v19  ;;  %v10015_v19 = vld [vmem:[#allocation85_spill] sm:$0xff] }
 0xcac   :  { %v8925_v62 = vadd.f32 %v1715_v57, %v1714_v54  ;;  %v10016_v57 = vld [vmem:[#allocation25_spill] sm:$0xff] }
 0xcae   :  { %5671 = vmatmul.mubr.f32.vlgmr.msra.gmra.mrb[12].mxu1 %v8925_v62  ;;  %1899 = vmatmul.mubr.f32.vlgmr.msra.gmra.mrb[14].mxu0 %v8925_v62 }
 0xcaf   :  { %6752 = vmatpush1.bf16.msra.mxu1 %v7793_v8  ;;  %1969 = vmatprep.mubr.f32.mxu1 %v9913_v2 }
 0xcb0   :  { %6754 = vmatprep.subr.bf16.mxu1 %v7795_v9  ;;  %6783 = vmatpush3.bf16.msra.mxu0 %v8151_v50 }
 0xcb1   :  { %6784 = vmatprep.subr.bf16.mxu0 %v9907_v10  ;;  %5705 = vmatprep.mubr.msk.f32.mxu0 %vm7698_vm3, %v9913_v2 }
 0xcb3   :  { %6756 = vmatpush1.bf16.msra.mxu1 %v7811_v14 }
 0xcb4   :  { %6758 = vmatprep.subr.bf16.mxu1 %v7814_v15  ;;  %6786 = vmatpush3.bf16.msra.mxu0 %v8162_v1 }
 0xcb5   :  { %6787 = vmatprep.subr.bf16.mxu0 %v9907_v10 }
 0xcb7   :  { %6760 = vmatpush1.bf16.msra.mxu1 %v7829_v20 }
 0xcb8   :  { %6762 = vmatprep.subr.bf16.mxu1 %v7832_v21  ;;  %6789 = vmatpush3.bf16.msra.mxu0 %v8174_v11 }
 0xcb9   :  { %6790 = vmatprep.subr.bf16.mxu0 %v9907_v10 }
 0xcbb   :  { %6764 = vmatpush1.bf16.msra.mxu1 %v7860_v29 }
 0xcbc   :  { %6766 = vmatprep.subr.bf16.mxu1 %v7865_v32  ;;  %6792 = vmatpush3.bf16.msra.mxu0 %v8184_v25 }
 0xcbd   :  { %6793 = vmatprep.subr.bf16.mxu0 %v9907_v10 }
 0xcbf   :  { %6768 = vmatpush1.bf16.msra.mxu1 %v7881_v38 }
 0xcc0   :  { %6770 = vmatprep.subr.bf16.mxu1 %v7885_v40  ;;  %6795 = vmatpush3.bf16.msra.mxu0 %v8194_v37 }
 0xcc1   :  { %6796 = vmatprep.subr.bf16.mxu0 %v9907_v10 }
 0xcc3   :  { %6772 = vmatpush1.bf16.msra.mxu1 %v7900_v45 }
 0xcc4   :  { %6774 = vmatprep.subr.bf16.mxu1 %v7903_v46  ;;  %6798 = vmatpush3.bf16.msra.mxu0 %v10004_v49 }
 0xcc5   :  { %6799 = vmatprep.subr.bf16.mxu0 %v9907_v10 }
 0xcc7   :  { %6776 = vmatpush1.bf16.msra.mxu1 %v10005_v13 }
 0xcc8   :  { %6778 = vmatprep.subr.bf16.mxu1 %v10006_v26  ;;  %6801 = vmatpush3.bf16.msra.mxu0 %v10007_v36  ;;  %v10019_v36 = vld [vmem:[#allocation16_spill] sm:$0xff] }
 0xcc9   :  { %6802 = vmatprep.subr.bf16.mxu0 %v9907_v10 }
 0xccb   :  { %6780 = vmatpush1.bf16.msra.mxu1 %v10008_v60  ;;  %v10018_v60 = vld [vmem:[#allocation17_spill] sm:$0xff] }
 0xccc   :  { %6804 = vmatpush3.bf16.msra.mxu0 %v10009_v39  ;;  %6805 = vmatprep.subr.bf16.mxu1 %v9907_v10 }
 0xccd   :  { %6842 = vmatprep.subr.bf16.mxu0 %v10010_v27 }
 0xcce   :  { %1970 = vmatmul.mubr.f32.vlgmr.msra.gmra.mrb[14].mxu1 %v8925_v62 }
 0xccf   :  { %6807 = vmatpush3.bf16.msra.mxu1 %v10011_v31  ;;  %5724 = vmatprep.mubr.msk.f32.mxu1 %vm7698_vm3, %v9913_v2 }
 0xcd0   :  { %6808 = vmatprep.subr.bf16.mxu1 %v9907_v10 }
 0xcd3   :  { %6810 = vmatpush3.bf16.msra.mxu1 %v10012_v3  ;;  %v10017_v3 = vld [vmem:[#allocation15_spill] sm:$0xff] }
 0xcd4   :  { %6811 = vmatprep.subr.bf16.mxu1 %v9907_v10 }
 0xcd7   :  { %6813 = vmatpush3.bf16.msra.mxu1 %v10013_v28 }
 0xcd8   :  { %6814 = vmatprep.subr.bf16.mxu1 %v9907_v10 }
 0xcdb   :  { %6816 = vmatpush3.bf16.msra.mxu1 %v10014_v58 }
 0xcdc   :  { %6817 = vmatprep.subr.bf16.mxu1 %v9907_v10 }
 0xd81   :  { %v1783_v34 = vpop.f32.mrb[12].mxu1 }
 0xd82   :  { %v1784_v59 = vadd.f32 %v10015_v19, %v1783_v34  ;;  %v5672_v54 = vpop.f32.mrb[13].mxu1 }
 0xd84   :  { %v1794_v31 = vrot.slane %v1784_v59, %v10016_v57  ;;  %v1814_v34 = vsel %vm1056_vm5, %v1784_v59, -inf }
 0xd86   :  { %v1795_v27 = vcombine.high %v1794_v31, %v1794_v31  ;;  %4863 = vst.sshfl [vmem:[%s9685_s13 + $0x2] sm:$0x1 pattern:$0x73625140] %v1794_v31 }
 0xd88   :  { %4864 = vst.sshfl [vmem:[%s9685_s13 + $0xa] sm:$0x1 pattern:$0x73625140] %v1795_v27 }
 0xda1   :  { %v8983_v28 = vpop.f32.mrb[14].mxu1 }
 0xda2   :  { %v1973_v58 = vpop.f32.mrb[15].mxu1 }
 0xda3   :  { %v1974_v39 = vadd.f32 %v1973_v58, %v10017_v3 }
 0xda5   :  { %1978 = vperm.xlu0 %7576, %v1974_v39  }
 0xdc4   :  { %1815 = vmax.xlane.f32.xlu0 %v1814_v34 }
 0xe24   :  { %v1979_v19 = vpop.permute.xlu0 %1978 }
 0xe25   :  { %v1983_v54 = vrot.slane %v1979_v19, %v7950_v5  ;;  %v1987_v57 = vrot.slane %v1979_v19, %v7953_v6 }
 0xe27   :  { %v1990_v31 = vadd.f32 %v1983_v54, %v10018_v60  ;;  %v1991_v26 = vadd.f32 %v1987_v57, %v10019_v36 }
 0xe29   :  { %1995 = vperm.xlu1 %7575, %v1990_v31  }
 0xe2d   :  { %1998 = vperm.xlu1 %7575, %v1991_v26  }
 0xe51   :  { %v1816_v27 = vpop.xlane.xlu0 %1815 }
 0xe52   :  { %vm1817_vm9 = vcmp.eq.f32.partialorder %v1784_v59, %v1816_v27 }
 0xe53   :  { %v1818_v13 = vsel %vm1817_vm9, %v9959_v48, 128 }
 0xe54   :  { %v1819_v39 = vsel %vm1056_vm5, %v1818_v13, 2147483647 }
 0xe55   :  { %v1821_v58 = vshra.s32 %v1819_v39, 16  ;;  %v1820_v36 = vand.u32 65535, %v1819_v39 }
 0xe57   :  { %v1823_v3 = vcvt.s32.f32 %v1821_v58  ;;  %v1822_v27 = vcvt.s32.f32 %v1820_v36 }
 0xe59   :  { %1824 = vmin.xlane.f32.xlu1 %v1823_v3 }
 0xea8   :  { %v1996_v34 = vpop.permute.xlu1 %1995 }
 0xea9   :  { %v2003_v46 = vrot.slane %v1996_v34, %v9960_v55 }
 0xeac   :  { %v1999_v49 = vpop.permute.xlu1 %1998 }
 0xead   :  { %v2007_v19 = vrot.slane %v1999_v49, %v9960_v55 }
 0xeaf   :  { %v2008_v54 = vsel %vm466_vm1, %v2007_v19, %v2003_v46 }
 0xeb0   :  { %v2010_v57 = vsel %vm469_vm2, %v2008_v54, -inf }
 0xeb1   :  { %2011 = vmax.xlane.f32.xlu0 %v2010_v57  ;;  %v10025_v57 = vld [vmem:[#allocation71_spill] sm:$0xff] }
 0xee6   :  { %v1825_v59 = vpop.xlane.xlu1 %1824 }
 0xee7   :  { %vm1826_vm10 = vcmp.eq.f32.partialorder %v1823_v3, %v1825_v59  ;;  %v1831_v39 = vcvt.f32.s32 %v1825_v59  ;;  %v10026_v59 = vld [vmem:[#allocation72_spill] sm:$0xff] }
 0xee8   :  { %v1827_v60 = vsel %vm1826_vm10, %v1822_v27, inf  ;;  %v10027_v27 = vld [vmem:[#allocation74_spill] sm:$0xff] }
 0xee9   :  { %1828 = vmin.xlane.f32.xlu0 %v1827_v60  ;;  %v1832_v3 = vshll.u32 %v1831_v39, 16 }
 0xf3e   :  { %v2012_v13 = vpop.xlane.xlu0 %2011 }
 0xf3f   :  { %v2017_v58 = vrot.slane %v2012_v13, %v7950_v5  ;;  %v2021_v45 = vrot.slane %v2012_v13, %v7953_v6  ;;  %v10028_v13 = vld [vmem:[#allocation75_spill] sm:$0xff] }
 0xf41   :  { %v2024_v37 = vsub.f32 %v1990_v31, %v2017_v58  ;;  %v2025_v34 = vsub.f32 %v1991_v26, %v2021_v45  ;;  %v10021_v45 = vld [vmem:[#allocation65_spill] sm:$0xff]  ;;  %v10023_v26 = vld [vmem:[#allocation68_spill] sm:$0xff] }
 0xf42   :  { %v10024_v31 = vld [vmem:[#allocation69_spill] sm:$0xff] }
 0xf43   :  { %v2026_v40 = vmul.f32 1.442695, %v2024_v37  ;;  %v2028_v49 = vmul.f32 1.442695, %v2025_v34  ;;  %v10022_v37 = vld [vmem:[#allocation66_spill] sm:$0xff] }
 0xf45   :  { %7613 = vpow2.f32 %v2026_v40  ;;  %v10020_v40 = vld [vmem:[#allocation63_spill] sm:$0xff] }
 0xf46   :  { %7615 = vpow2.f32 %v2028_v49 }
 0xf4f   :  { %v7614_v46 = vpop.eup %7613 }
 0xf50   :  { %v7616_v19 = vpop.eup %7615  ;;  %2033 = vperm.xlu0 %7576, %v7614_v46  }
 0xf51   :  { %2036 = vperm.xlu1 %7575, %v7616_v19  }
 0xf76   :  { %v1829_v36 = vpop.xlane.xlu0 %1828 }
 0xf77   :  { %v1830_v54 = vcvt.f32.s32 %v1829_v36 }
 0xf79   :  { %v1833_v60 = vadd.s32 %v1832_v3, %v1830_v54 }
 0xf7b   :  { %vm2092_vm11 = vcmp.eq.s32.totalorder %v9959_v48, %v1833_v60 }
 0xf7c   :  { %5706 = vmatmul.mubr.msk.f32.vlgmr.msra.gmra.mrb[16].mxu0 %vm2092_vm11, %v9961_v18 }
 0xf7d   :  { %6844 = vmatpush1.bf16.msra.mxu0 %v8393_v22  ;;  %2376 = vmatprep.mubr.f32.mxu0 %v9913_v2 }
 0xf7e   :  { %6846 = vmatprep.subr.bf16.mxu0 %v8407_v42 }
 0xf81   :  { %6848 = vmatpush1.bf16.msra.mxu0 %v8420_v61 }
 0xf82   :  { %6850 = vmatprep.subr.bf16.mxu0 %v8435_v23 }
 0xf85   :  { %6852 = vmatpush1.bf16.msra.mxu0 %v9962_v51 }
 0xf86   :  { %6854 = vmatprep.subr.bf16.mxu0 %v9963_v52 }
 0xf89   :  { %6856 = vmatpush1.bf16.msra.mxu0 %v10020_v40 }
 0xf8a   :  { %6858 = vmatprep.subr.bf16.mxu0 %v10021_v45 }
 0xf8d   :  { %6860 = vmatpush1.bf16.msra.mxu0 %v10022_v37 }
 0xf8e   :  { %6862 = vmatprep.subr.bf16.mxu0 %v10023_v26 }
 0xf91   :  { %6864 = vmatpush1.bf16.msra.mxu0 %v10024_v31 }
 0xf92   :  { %6866 = vmatprep.subr.bf16.mxu0 %v10025_v57 }
 0xf95   :  { %6868 = vmatpush1.bf16.msra.mxu0 %v10026_v59 }
 0xf96   :  { %6870 = vmatprep.subr.bf16.mxu0 %v10027_v27 }
 0xf99   :  { %6872 = vmatpush1.bf16.msra.mxu0 %v10028_v13 }
 0xf9a   :  { %6897 = vmatprep.subr.bf16.mxu0 %v9907_v10 }
 0xfcf   :  { %v2034_v58 = vpop.permute.xlu0 %2033 }
 0xfd0   :  { %v2037_v34 = vpop.permute.xlu1 %2036  ;;  %v2041_v49 = vrot.slane %v2034_v58, %v9960_v55 }
 0xfd1   :  { %v2045_v39 = vrot.slane %v2037_v34, %v9960_v55 }
 0xfd3   :  { %v2046_v36 = vsel %vm466_vm1, %v2045_v39, %v2041_v49  ;;  %v10029_v49 = vld [vmem:[#allocation18_spill] sm:$0xff] }
 0xfd4   :  { %v2048_v3 = vsel %vm469_vm2, %v2046_v36, 0.0 }
 0xfd5   :  { %2049 = vadd.xlane.f32.xlu0 %v2048_v3 }
0x104f   :  { %v2161_v54 = vpop.f32.mrb[16].mxu0 }
0x1050   :  { %v5707_v60 = vpop.f32.mrb[17].mxu0 }
0x1062   :  { %v2050_v59 = vpop.xlane.xlu0 %2049 }
0x1063   :  { %v2055_v27 = vrot.slane %v2050_v59, %v7950_v5  ;;  %v2059_v13 = vrot.slane %v2050_v59, %v7953_v6 }
0x1065   :  { %7617 = vrcp.f32 %v2055_v27 }
0x1066   :  { %7619 = vrcp.f32 %v2059_v13 }
0x106f   :  { %v7618_v57 = vpop.eup %7617 }
0x1070   :  { %v2063_v31 = vmul.f32 %v7618_v57, %v7614_v46  ;;  %v7620_v26 = vpop.eup %7619 }
0x1071   :  { %v2065_v58 = vmul.f32 %v7620_v26, %v7616_v19 }
0x1072   :  { %2068 = vperm.xlu1 %7575, %v2063_v31  }
0x1076   :  { %2073 = vperm.xlu1 %7575, %v2065_v58  }
0x10f1   :  { %v2069_v34 = vpop.permute.xlu1 %2068 }
0x10f2   :  { %v2076_v39 = vmul.f32 %v10029_v49, %v2069_v34 }
0x10f4   :  { %v2078_v36 = vsel %vm89_vm0, %v2076_v39, 0.0 }
0x10f5   :  { %v2079_v3 = vrot.slane %v2078_v36, 4  ;;  %v2074_v60 = vpop.permute.xlu1 %2073 }
0x10f6   :  { %v2077_v37 = vmul.f32 %v8841_v43, %v2074_v60  ;;  %v10031_v43 = vld [vmem:[#allocation64_spill] sm:$0xff]  ;;  %v9069_v60 = vld [vmem:[%s9690_s6] ss:$0 sm:$0xff] }
0x10f7   :  { %v2080_v45 = vadd.f32 %v2079_v3, %v2078_v36 }
0x10f8   :  { %v2085_v59 = vsel %vm89_vm0, %v2077_v37, 0.0  ;;  %v10034_v37 = vld [vmem:[#allocation20_spill] sm:$0xff] }
0x10f9   :  { %v2081_v27 = vrot.slane %v2080_v45, 2  ;;  %v2086_v13 = vrot.slane %v2085_v59, 4 }
0x10fb   :  { %v2082_v40 = vadd.f32 %v2081_v27, %v2080_v45  ;;  %v2087_v46 = vadd.f32 %v2086_v13, %v2085_v59  ;;  %v10033_v45 = vld [vmem:[#allocation76_spill] sm:$0xff]  ;;  %v10035_v13 = vld [vmem:[#allocation77_spill] sm:$0xff] }
0x10fd   :  { %v2088_v57 = vrot.slane %v2087_v46, 2  ;;  %v2083_v31 = vrot.slane %v2082_v40, 1 }
0x10ff   :  { %v2089_v19 = vadd.f32 %v2088_v57, %v2087_v46  ;;  %v2084_v58 = vadd.f32 %v2083_v31, %v2082_v40  ;;  %v10032_v40 = vld [vmem:[#allocation67_spill] sm:$0xff]  ;;  %v10036_v46 = vld [vmem:[#allocation21_spill] sm:$0xff]  ;;  %v10037_v57 = vld [vmem:[#allocation22_spill] sm:$0xff] }
0x1100   :  { %v10038_v31 = vld [vmem:[#allocation78_spill] sm:$0xff] }
0x1101   :  { %v2090_v26 = vrot.slane %v2089_v19, 1 }
0x1103   :  { %v2091_v52 = vadd.f32 %v2090_v26, %v2089_v19  ;;  %v10039_v19 = vld [vmem:[#allocation23_spill] sm:$0xff]  ;;  %v10040_v26 = vld [vmem:[#allocation24_spill] sm:$0xff] }
0x1105   :  { %v2167_v34 = vsel %vm466_vm1, %v2091_v52, %v2084_v58  ;;  %v10030_v52 = vld [vmem:[#allocation61_spill] sm:$0xff]  ;;  %v10041_v58 = vld [vmem:[#allocation79_spill] sm:$0xff] }
0x1106   :  { %5725 = vmatmul.mubr.msk.f32.vlgmr.msra.gmra.mrb[16].mxu1 %vm89_vm0, %v2167_v34  ;;  %v10042_v34 = vld [vmem:[#allocation26_spill] sm:$0xff] }
0x1107   :  { %6819 = vmatpush3.bf16.msra.mxu1 %v9970_v53  ;;  %5759 = vmatprep.mubr.msk.f32.mxu1 %vm7698_vm3, %v9913_v2 }
0x1108   :  { %6820 = vmatprep.subr.bf16.mxu1 %v9907_v10 }
0x110b   :  { %6822 = vmatpush3.bf16.msra.mxu1 %v9971_v0 }
0x110c   :  { %6823 = vmatprep.subr.bf16.mxu1 %v9907_v10 }
0x110f   :  { %6825 = vmatpush3.bf16.msra.mxu1 %v9972_v56 }
0x1110   :  { %6826 = vmatprep.subr.bf16.mxu1 %v9907_v10 }
0x1113   :  { %6828 = vmatpush3.bf16.msra.mxu1 %v9973_v4 }
0x1114   :  { %6829 = vmatprep.subr.bf16.mxu1 %v9907_v10 }
0x1117   :  { %6831 = vmatpush3.bf16.msra.mxu1 %v9974_v12 }
0x1118   :  { %6832 = vmatprep.subr.bf16.mxu1 %v9907_v10 }
0x111b   :  { %6834 = vmatpush3.bf16.msra.mxu1 %v9975_v24 }
0x111c   :  { %6835 = vmatprep.subr.bf16.mxu1 %v9907_v10 }
0x111f   :  { %6837 = vmatpush3.bf16.msra.mxu1 %v9976_v41 }
0x1120   :  { %6838 = vmatprep.subr.bf16.mxu1 %v9907_v10 }
0x1123   :  { %6840 = vmatpush3.bf16.msra.mxu1 %v9977_v35 }
0x1124   :  { %6873 = vmatprep.subr.bf16.mxu1 %v9907_v10 }
0x1126   :  { %5760 = vmatmul.mubr.f32.vlgmr.msra.gmra.mrb[18].mxu1 %v2161_v54 }
0x1127   :  { %6875 = vmatpush3.bf16.msra.mxu1 %v9978_v7  ;;  %5794 = vmatprep.mubr.msk.f32.mxu1 %vm7698_vm3, %v9913_v2 }
0x1128   :  { %6876 = vmatprep.subr.bf16.mxu1 %v9907_v10 }
0x112b   :  { %6878 = vmatpush3.bf16.msra.mxu1 %v9979_v44 }
0x112c   :  { %6879 = vmatprep.subr.bf16.mxu1 %v9907_v10 }
0x112f   :  { %6881 = vmatpush3.bf16.msra.mxu1 %v10030_v52 }
0x1130   :  { %6882 = vmatprep.subr.bf16.mxu1 %v9907_v10 }
0x1133   :  { %6884 = vmatpush3.bf16.msra.mxu1 %v10031_v43 }
0x1134   :  { %6885 = vmatprep.subr.bf16.mxu1 %v9907_v10 }
0x1137   :  { %6887 = vmatpush3.bf16.msra.mxu1 %v10032_v40 }
0x1138   :  { %6888 = vmatprep.subr.bf16.mxu1 %v9907_v10 }
0x113b   :  { %6890 = vmatpush3.bf16.msra.mxu1 %v9983_v33 }
0x113c   :  { %6891 = vmatprep.subr.bf16.mxu1 %v9907_v10 }
0x113f   :  { %6893 = vmatpush3.bf16.msra.mxu1 %v9984_v47 }
0x1140   :  { %6894 = vmatprep.subr.bf16.mxu1 %v9907_v10 }
0x1143   :  { %6896 = vmatpush3.bf16.msra.mxu1 %v10033_v45 }
0x1144   :  { %6922 = vmatprep.subr.bf16.mxu1 %v10034_v37 }
0x11d9   :  { %v2236_v54 = vpop.f32.mrb[16].mxu1 }
0x11da   :  { %v5726_v49 = vpop.f32.mrb[17].mxu1 }
0x11db   :  { %v10044_v49 = vld [vmem:[#allocation80_spill] sm:$0xff] }
0x11f9   :  { %v2306_v39 = vpop.f32.mrb[18].mxu1 }
0x11fa   :  { %v2307_v36 = vadd.f32 %v2306_v39, %v2236_v54  ;;  %v5761_v3 = vpop.f32.mrb[19].mxu1  ;;  %v10043_v54 = vld [vmem:[#allocation27_spill] sm:$0xff]  ;;  %v10045_v39 = vld [vmem:[#allocation28_spill] sm:$0xff] }
0x11fb   :  { %v10047_v3 = vld [vmem:[#allocation81_spill] sm:$0xff] }
0x11fc   :  { %v2310_v59 = vadd.f32 %v9069_v60, %v2307_v36  ;;  %v10046_v36 = vld [vmem:[#allocation29_spill] sm:$0xff] }
0x11fe   :  { %v2311_v27 = vmax.f32 %v2310_v59, 0.0  ;;  %v10048_v59 = vld [vmem:[#allocation30_spill] sm:$0xff] }
0x1200   :  { %2377 = vmatmul.mubr.f32.vlgmr.msra.gmra.mrb[14].mxu0 %v2311_v27  ;;  %5795 = vmatmul.mubr.f32.vlgmr.msra.gmra.mrb[20].mxu1 %v2311_v27  ;;  %v10049_v27 = vld [vmem:[#allocation31_spill] sm:$0xff] }
0x1201   :  { %6899 = vmatpush3.bf16.msra.mxu0 %v10035_v13  ;;  %6924 = vmatpush1.bf16.msra.mxu1 %v10036_v46 }
0x1202   :  { %6900 = vmatprep.subr.bf16.mxu0 %v9907_v10  ;;  %6926 = vmatprep.subr.bf16.mxu1 %v10037_v57 }
0x1203   :  { %5829 = vmatprep.mubr.msk.f32.mxu0 %vm7698_vm3, %v9913_v2  ;;  %2655 = vmatprep.mubr.f32.mxu1 %v9913_v2 }
0x1205   :  { %6902 = vmatpush3.bf16.msra.mxu0 %v10038_v31  ;;  %6928 = vmatpush1.bf16.msra.mxu1 %v10039_v19 }
0x1206   :  { %6903 = vmatprep.subr.bf16.mxu0 %v9907_v10  ;;  %6930 = vmatprep.subr.bf16.mxu1 %v10040_v26 }
0x1209   :  { %6905 = vmatpush3.bf16.msra.mxu0 %v10041_v58  ;;  %6932 = vmatpush1.bf16.msra.mxu1 %v10042_v34  ;;  %v10050_v34 = vld [vmem:[#allocation82_spill] sm:$0xff]  ;;  %v10051_v58 = vld [vmem:[#allocation32_spill] sm:$0xff] }
0x120a   :  { %6906 = vmatprep.subr.bf16.mxu0 %v9907_v10  ;;  %6934 = vmatprep.subr.bf16.mxu1 %v10043_v54  ;;  %v10054_v54 = vld [vmem:[#allocation34_spill] sm:$0xff] }
0x120d   :  { %6908 = vmatpush3.bf16.msra.mxu0 %v10044_v49  ;;  %6936 = vmatpush1.bf16.msra.mxu1 %v10045_v39  ;;  %v10052_v49 = vld [vmem:[#allocation33_spill] sm:$0xff]  ;;  %v10053_v39 = vld [vmem:[#allocation83_spill] sm:$0xff] }
0x120e   :  { %6909 = vmatprep.subr.bf16.mxu0 %v9907_v10  ;;  %6938 = vmatprep.subr.bf16.mxu1 %v10046_v36  ;;  %v10057_v36 = vld [vmem:[#allocation36_spill] sm:$0xff] }
0x1211   :  { %6911 = vmatpush3.bf16.msra.mxu0 %v10047_v3  ;;  %6940 = vmatpush1.bf16.msra.mxu1 %v10048_v59  ;;  %v10055_v3 = vld [vmem:[#allocation35_spill] sm:$0xff]  ;;  %v10056_v59 = vld [vmem:[#allocation84_spill] sm:$0xff] }
0x1212   :  { %6912 = vmatprep.subr.bf16.mxu0 %v9907_v10  ;;  %6942 = vmatprep.subr.bf16.mxu1 %v10049_v27  ;;  %v10058_v27 = vld [vmem:[#allocation3_spill] sm:$0xff] }
0x1215   :  { %6914 = vmatpush3.bf16.msra.mxu0 %v10050_v34  ;;  %6944 = vmatpush1.bf16.msra.mxu1 %v10051_v58 }
0x1216   :  { %6915 = vmatprep.subr.bf16.mxu0 %v9907_v10  ;;  %6946 = vmatprep.subr.bf16.mxu1 %v10052_v49 }
0x1219   :  { %6917 = vmatpush3.bf16.msra.mxu0 %v10053_v39  ;;  %6948 = vmatpush1.bf16.msra.mxu1 %v10054_v54 }
0x121a   :  { %6918 = vmatprep.subr.bf16.mxu0 %v9907_v10  ;;  %6950 = vmatprep.subr.bf16.mxu1 %v10055_v3 }
0x121d   :  { %6920 = vmatpush3.bf16.msra.mxu0 %v10056_v59  ;;  %6952 = vmatpush1.bf16.msra.mxu1 %v10057_v36 }
0x121e   :  { %6954 = vmatprep.subr.bf16.mxu0 %v10058_v27  ;;  %6985 = vmatprep.subr.bf16.mxu1 %v9907_v10  ;;  %v1972_v27 = vadd.f32 %v8983_v28, %v8720_v17  ;;  %v10060_v28 = vld [vmem:[#allocation40_spill] sm:$0xff] }
0x12d3   :  { %v2378_v58 = vpop.f32.mrb[14].mxu0  ;;  %v2449_v34 = vpop.f32.mrb[20].mxu1 }
0x12d4   :  { %v7542_v49 = vadd.f32 %v8712_v16, %v2378_v58  ;;  %v2380_v26 = vpop.f32.mrb[15].mxu0  ;;  %v5796_v39 = vpop.f32.mrb[21].mxu1  ;;  %v2450_v13 = vadd.f32 %v2449_v34, %v8722_v30  ;;  %v10064_v34 = vld [vmem:[#allocation12_spill] sm:$0xff] }
0x12d5   :  { %v7544_v54 = vadd.f32 %v8714_v63, %v2380_v26 }
0x12d6   :  { %v4868_v19 = vmul.f32 -1.442695, %v7542_v49 }
0x12d7   :  { %v4869_v31 = vmul.f32 -1.442695, %v7544_v54 }
0x12d8   :  { %7621 = vpow2.f32 %v4868_v19 }
0x12d9   :  { %7623 = vpow2.f32 %v4869_v31 }
0x12e2   :  { %v7622_v3 = vpop.eup %7621 }
0x12e3   :  { %v2457_v59 = vadd.f32 1.0, %v7622_v3  ;;  %v7624_v36 = vpop.eup %7623 }
0x12e4   :  { %v2464_v57 = vadd.f32 1.0, %v7624_v36  ;;  %v10065_v36 = vld [vmem:[#allocation13_spill] sm:$0xff] }
0x12e5   :  { %7625 = vrcp.f32 %v2457_v59  ;;  %v10066_v59 = vld [vmem:[#allocation42_spill] sm:$0xff] }
0x12e6   :  { %7627 = vrcp.f32 %v2464_v57  ;;  %v10063_v57 = vld [vmem:[#allocation41_spill] sm:$0xff] }
0x12ef   :  { %v7626_v46 = vpop.eup %7625 }
0x12f0   :  { %v2467_v58 = vmul.f32 %v7626_v46, %v1972_v27  ;;  %v7628_v49 = vpop.eup %7627  ;;  %v10062_v46 = vld [vmem:[#allocation11_spill] sm:$0xff]  ;;  %v10067_v27 = vld [vmem:[#allocation14_spill] sm:$0xff] }
0x12f1   :  { %v2470_v26 = vsub.f32 1.0, %v7628_v49  ;;  %v2472_v31 = vmul.f32 %v7628_v49, %v8925_v62  ;;  %v10059_v62 = vld [vmem:[#allocation9_spill] sm:$0xff]  ;;  %v10070_v49 = vld [vmem:[#allocation44_spill] sm:$0xff] }
0x12f2   :  { %v2468_v39 = vadd.f32 %v2467_v58, %v2450_v13  ;;  %v10061_v13 = vld [vmem:[#allocation10_spill] sm:$0xff]  ;;  %v10068_v58 = vld [vmem:[#allocation43_spill] sm:$0xff] }
0x12f4   :  { %7629 = vtanh.f32 %v2468_v39  ;;  %v10069_v39 = vld [vmem:[#allocation56_spill] sm:$0xff] }
0x12fe   :  { %v7630_v19 = vpop.eup %7629 }
0x12ff   :  { %v2471_v54 = vmul.f32 %v7630_v19, %v2470_v26  ;;  %v10071_v26 = vld [vmem:[#allocation45_spill] sm:$0xff]  ;;  %v10072_v19 = vld [vmem:[#allocation46_spill] sm:$0xff] }
0x1301   :  { %v9113_v3 = vadd.f32 %v2472_v31, %v2471_v54  ;;  %v10073_v54 = vld [vmem:[#allocation47_spill] sm:$0xff] }
0x1303   :  { %5830 = vmatmul.mubr.f32.vlgmr.msra.gmra.mrb[18].mxu0 %v9113_v3  ;;  %2656 = vmatmul.mubr.f32.vlgmr.msra.gmra.mrb[22].mxu1 %v9113_v3 }
0x1304   :  { %6956 = vmatpush1.bf16.msra.mxu0 %v7793_v8  ;;  %2726 = vmatprep.mubr.f32.mxu0 %v9913_v2 }
0x1305   :  { %6958 = vmatprep.subr.bf16.mxu0 %v7795_v9  ;;  %6987 = vmatpush3.bf16.msra.mxu1 %v8151_v50 }
0x1306   :  { %6988 = vmatprep.subr.bf16.mxu1 %v9907_v10  ;;  %5864 = vmatprep.mubr.msk.f32.mxu1 %vm7698_vm3, %v9913_v2 }
0x1308   :  { %6960 = vmatpush1.bf16.msra.mxu0 %v7811_v14 }
0x1309   :  { %6962 = vmatprep.subr.bf16.mxu0 %v7814_v15  ;;  %6990 = vmatpush3.bf16.msra.mxu1 %v8162_v1 }
0x130a   :  { %6991 = vmatprep.subr.bf16.mxu1 %v9907_v10 }
0x130c   :  { %6964 = vmatpush1.bf16.msra.mxu0 %v7829_v20 }
0x130d   :  { %6966 = vmatprep.subr.bf16.mxu0 %v7832_v21  ;;  %6993 = vmatpush3.bf16.msra.mxu1 %v8174_v11 }
0x130e   :  { %6994 = vmatprep.subr.bf16.mxu1 %v9907_v10 }
0x1310   :  { %6968 = vmatpush1.bf16.msra.mxu0 %v7860_v29 }
0x1311   :  { %6970 = vmatprep.subr.bf16.mxu0 %v7865_v32  ;;  %6996 = vmatpush3.bf16.msra.mxu1 %v8184_v25 }
0x1312   :  { %6997 = vmatprep.subr.bf16.mxu1 %v9907_v10 }
0x1314   :  { %6972 = vmatpush1.bf16.msra.mxu0 %v7881_v38 }
0x1315   :  { %6974 = vmatprep.subr.bf16.mxu0 %v10059_v62  ;;  %6999 = vmatpush3.bf16.msra.mxu1 %v10060_v28 }
0x1316   :  { %7000 = vmatprep.subr.bf16.mxu1 %v9907_v10 }
0x1318   :  { %6976 = vmatpush1.bf16.msra.mxu0 %v10061_v13 }
0x1319   :  { %6978 = vmatprep.subr.bf16.mxu0 %v10062_v46  ;;  %7002 = vmatpush3.bf16.msra.mxu1 %v10063_v57  ;;  %v10077_v57 = vld [vmem:[#allocation17_spill] sm:$0xff]  ;;  %v10078_v46 = vld [vmem:[#allocation16_spill] sm:$0xff] }
0x131a   :  { %7003 = vmatprep.subr.bf16.mxu1 %v9907_v10 }
0x131c   :  { %6980 = vmatpush1.bf16.msra.mxu0 %v10064_v34 }
0x131d   :  { %6982 = vmatprep.subr.bf16.mxu0 %v10065_v36  ;;  %7005 = vmatpush3.bf16.msra.mxu1 %v10066_v59  ;;  %v10076_v36 = vld [vmem:[#allocation15_spill] sm:$0xff] }
0x131e   :  { %7006 = vmatprep.subr.bf16.mxu1 %v9907_v10 }
0x1320   :  { %6984 = vmatpush1.bf16.msra.mxu0 %v10067_v27 }
0x1321   :  { %7008 = vmatpush3.bf16.msra.mxu1 %v10068_v58  ;;  %7009 = vmatprep.subr.bf16.mxu0 %v9907_v10 }
0x1322   :  { %7046 = vmatprep.subr.bf16.mxu1 %v10069_v39 }
0x1323   :  { %2727 = vmatmul.mubr.f32.vlgmr.msra.gmra.mrb[20].mxu0 %v9113_v3 }
0x1324   :  { %7011 = vmatpush3.bf16.msra.mxu0 %v10070_v49  ;;  %5883 = vmatprep.mubr.msk.f32.mxu0 %vm7698_vm3, %v9913_v2  ;;  %v9166_v49 = vld [vmem:[%s9693_s12] ss:$0 sm:$0xff] }
0x1325   :  { %7012 = vmatprep.subr.bf16.mxu0 %v9907_v10  ;;  %10074 = vst [vmem:[#allocation19_spill] sm:$0xff] %v9166_v49 }
0x1328   :  { %7014 = vmatpush3.bf16.msra.mxu0 %v10071_v26  ;;  %v10075_v26 = vld [vmem:[#allocation25_spill] sm:$0xff] }
0x1329   :  { %7015 = vmatprep.subr.bf16.mxu0 %v9907_v10 }
0x132c   :  { %7017 = vmatpush3.bf16.msra.mxu0 %v10072_v19 }
0x132d   :  { %7018 = vmatprep.subr.bf16.mxu0 %v9907_v10 }
0x1330   :  { %7020 = vmatpush3.bf16.msra.mxu0 %v10073_v54 }
0x1331   :  { %7021 = vmatprep.subr.bf16.mxu0 %v9907_v10 }
0x13d6   :  { %v2540_v31 = vpop.f32.mrb[18].mxu0 }
0x13d7   :  { %v2541_v39 = vadd.f32 %v9166_v49, %v2540_v31  ;;  %v5831_v58 = vpop.f32.mrb[19].mxu0 }
0x13d9   :  { %v2551_v27 = vrot.slane %v2541_v39, %v10075_v26  ;;  %v2571_v31 = vsel %vm1056_vm5, %v2541_v39, -inf }
0x13db   :  { %v2552_v59 = vcombine.high %v2551_v27, %v2551_v27  ;;  %4870 = vst.sshfl [vmem:[%s9685_s13 + $0x3] sm:$0x1 pattern:$0x73625140] %v2551_v27 }
0x13dd   :  { %4871 = vst.sshfl [vmem:[%s9685_s13 + $0xb] sm:$0x1 pattern:$0x73625140] %v2552_v59 }
0x13f6   :  { %v9176_v54 = vpop.f32.mrb[20].mxu0 }
0x13f7   :  { %v2730_v19 = vpop.f32.mrb[21].mxu0 }
0x13f8   :  { %v2731_v34 = vadd.f32 %v2730_v19, %v10076_v36 }
0x13fa   :  { %2735 = vperm.xlu1 %7575, %v2731_v34  }
0x141e   :  { %2572 = vmax.xlane.f32.xlu1 %v2571_v31 }
0x1479   :  { %v2736_v58 = vpop.permute.xlu1 %2735 }
0x147a   :  { %v2740_v26 = vrot.slane %v2736_v58, %v7950_v5  ;;  %v2744_v49 = vrot.slane %v2736_v58, %v7953_v6 }
0x147c   :  { %v2747_v27 = vadd.f32 %v2740_v26, %v10077_v57  ;;  %v2748_v13 = vadd.f32 %v2744_v49, %v10078_v46 }
0x147e   :  { %2752 = vperm.xlu0 %7576, %v2747_v27  }
0x1482   :  { %2755 = vperm.xlu0 %7576, %v2748_v13  }
0x14ab   :  { %v2573_v59 = vpop.xlane.xlu1 %2572 }
0x14ac   :  { %vm2574_vm12 = vcmp.eq.f32.partialorder %v2541_v39, %v2573_v59 }
0x14ad   :  { %v2575_v28 = vsel %vm2574_vm12, %v9959_v48, 128 }
0x14ae   :  { %v2576_v34 = vsel %vm1056_vm5, %v2575_v28, 2147483647 }
0x14af   :  { %v2578_v19 = vshra.s32 %v2576_v34, 16  ;;  %v2577_v46 = vand.u32 65535, %v2576_v34 }
0x14b1   :  { %v2580_v36 = vcvt.s32.f32 %v2578_v19  ;;  %v2579_v59 = vcvt.s32.f32 %v2577_v46 }
0x14b3   :  { %2581 = vmin.xlane.f32.xlu0 %v2580_v36 }
0x14fd   :  { %v2753_v31 = vpop.permute.xlu0 %2752 }
0x14fe   :  { %v2760_v38 = vrot.slane %v2753_v31, %v9960_v55 }
0x1501   :  { %v2756_v62 = vpop.permute.xlu0 %2755 }
0x1502   :  { %v2764_v58 = vrot.slane %v2756_v62, %v9960_v55 }
0x1504   :  { %v2765_v26 = vsel %vm466_vm1, %v2764_v58, %v2760_v38 }
0x1505   :  { %v2767_v49 = vsel %vm469_vm2, %v2765_v26, -inf }
0x1506   :  { %2768 = vmax.xlane.f32.xlu1 %v2767_v49  ;;  %v10084_v49 = vld [vmem:[#allocation69_spill] sm:$0xff] }
0x1540   :  { %v2582_v39 = vpop.xlane.xlu0 %2581 }
0x1541   :  { %vm2583_vm13 = vcmp.eq.f32.partialorder %v2580_v36, %v2582_v39  ;;  %v2588_v34 = vcvt.f32.s32 %v2582_v39  ;;  %v10085_v39 = vld [vmem:[#allocation71_spill] sm:$0xff] }
0x1542   :  { %v2584_v57 = vsel %vm2583_vm13, %v2579_v59, inf  ;;  %v10086_v59 = vld [vmem:[#allocation72_spill] sm:$0xff] }
0x1543   :  { %2585 = vmin.xlane.f32.xlu1 %v2584_v57  ;;  %v2589_v36 = vshll.u32 %v2588_v34, 16 }
0x1593   :  { %v2769_v28 = vpop.xlane.xlu1 %2768 }
0x1594   :  { %v2774_v19 = vrot.slane %v2769_v28, %v7950_v5  ;;  %v2778_v25 = vrot.slane %v2769_v28, %v7953_v6  ;;  %v10087_v28 = vld [vmem:[#allocation74_spill] sm:$0xff] }
0x1596   :  { %v2781_v32 = vsub.f32 %v2747_v27, %v2774_v19  ;;  %v2782_v31 = vsub.f32 %v2748_v13, %v2778_v25  ;;  %v10081_v25 = vld [vmem:[#allocation65_spill] sm:$0xff]  ;;  %v10082_v13 = vld [vmem:[#allocation66_spill] sm:$0xff]  ;;  %v10083_v27 = vld [vmem:[#allocation68_spill] sm:$0xff] }
0x1597   :  { %v10088_v19 = vld [vmem:[#allocation75_spill] sm:$0xff] }
0x1598   :  { %v2783_v29 = vmul.f32 1.442695, %v2781_v32  ;;  %v2785_v62 = vmul.f32 1.442695, %v2782_v31  ;;  %v10080_v32 = vld [vmem:[#allocation63_spill] sm:$0xff] }
0x159a   :  { %7631 = vpow2.f32 %v2783_v29  ;;  %v10079_v29 = vld [vmem:[#allocation62_spill] sm:$0xff] }
0x159b   :  { %7633 = vpow2.f32 %v2785_v62 }
0x15a4   :  { %v7632_v38 = vpop.eup %7631 }
0x15a5   :  { %2790 = vperm.xlu1 %7575, %v7632_v38   ;;  %v7634_v58 = vpop.eup %7633 }
0x15a9   :  { %2793 = vperm.xlu1 %7575, %v7634_v58  }
0x15d0   :  { %v2586_v46 = vpop.xlane.xlu1 %2585 }
0x15d1   :  { %v2587_v26 = vcvt.f32.s32 %v2586_v46 }
0x15d3   :  { %v2590_v57 = vadd.s32 %v2589_v36, %v2587_v26 }
0x15d5   :  { %vm2849_vm14 = vcmp.eq.s32.totalorder %v9959_v48, %v2590_v57 }
0x15d6   :  { %5865 = vmatmul.mubr.msk.f32.vlgmr.msra.gmra.mrb[24].mxu1 %vm2849_vm14, %v9961_v18 }
0x15d7   :  { %7048 = vmatpush1.bf16.msra.mxu1 %v8393_v22  ;;  %3133 = vmatprep.mubr.f32.mxu1 %v9913_v2 }
0x15d8   :  { %7050 = vmatprep.subr.bf16.mxu1 %v8407_v42 }
0x15db   :  { %7052 = vmatpush1.bf16.msra.mxu1 %v8420_v61 }
0x15dc   :  { %7054 = vmatprep.subr.bf16.mxu1 %v8435_v23 }
0x15df   :  { %7056 = vmatpush1.bf16.msra.mxu1 %v9962_v51 }
0x15e0   :  { %7058 = vmatprep.subr.bf16.mxu1 %v10079_v29 }
0x15e3   :  { %7060 = vmatpush1.bf16.msra.mxu1 %v10080_v32 }
0x15e4   :  { %7062 = vmatprep.subr.bf16.mxu1 %v10081_v25 }
0x15e7   :  { %7064 = vmatpush1.bf16.msra.mxu1 %v10082_v13 }
0x15e8   :  { %7066 = vmatprep.subr.bf16.mxu1 %v10083_v27 }
0x15eb   :  { %7068 = vmatpush1.bf16.msra.mxu1 %v10084_v49 }
0x15ec   :  { %7070 = vmatprep.subr.bf16.mxu1 %v10085_v39 }
0x15ef   :  { %7072 = vmatpush1.bf16.msra.mxu1 %v10086_v59 }
0x15f0   :  { %7074 = vmatprep.subr.bf16.mxu1 %v10087_v28 }
0x15f3   :  { %7076 = vmatpush1.bf16.msra.mxu1 %v10088_v19 }
0x15f4   :  { %7101 = vmatprep.subr.bf16.mxu1 %v9907_v10 }
0x1624   :  { %v2791_v31 = vpop.permute.xlu1 %2790 }
0x1625   :  { %v2798_v34 = vrot.slane %v2791_v31, %v9960_v55 }
0x1628   :  { %v2794_v62 = vpop.permute.xlu1 %2793 }
0x1629   :  { %v2802_v46 = vrot.slane %v2794_v62, %v9960_v55 }
0x162b   :  { %v2803_v36 = vsel %vm466_vm1, %v2802_v46, %v2798_v34  ;;  %v9220_v46 = vld [vmem:[%s9681_s0] sm:$0xff] }
0x162c   :  { %v2805_v26 = vsel %vm469_vm2, %v2803_v36, 0.0  ;;  %10089 = vst [vmem:[#allocation48_spill] sm:$0xff] %v9220_v46 }
0x162d   :  { %2806 = vadd.xlane.f32.xlu0 %v2805_v26 }
0x16a9   :  { %v2918_v57 = vpop.f32.mrb[24].mxu1 }
0x16aa   :  { %v5866_v39 = vpop.f32.mrb[25].mxu1 }
0x16ba   :  { %v2807_v59 = vpop.xlane.xlu0 %2806 }
0x16bb   :  { %v2812_v28 = vrot.slane %v2807_v59, %v7950_v5  ;;  %v2816_v19 = vrot.slane %v2807_v59, %v7953_v6  ;;  %v9226_v59 = vld [vmem:[%s9681_s0 + $0x8] sm:$0xff] }
0x16bd   :  { %7635 = vrcp.f32 %v2812_v28 }
0x16be   :  { %7637 = vrcp.f32 %v2816_v19 }
0x16c7   :  { %v7636_v49 = vpop.eup %7635 }
0x16c8   :  { %v7638_v27 = vpop.eup %7637  ;;  %v2820_v13 = vmul.f32 %v7636_v49, %v7632_v38 }
0x16c9   :  { %v2822_v31 = vmul.f32 %v7638_v27, %v7634_v58 }
0x16ca   :  { %2825 = vperm.xlu1 %7575, %v2820_v13  }
0x16cb   :  { %2830 = vperm.xlu0 %7576, %v2822_v31  }
0x1749   :  { %v2826_v62 = vpop.permute.xlu1 %2825 }
0x174a   :  { %v2831_v34 = vpop.permute.xlu0 %2830  ;;  %v2833_v39 = vmul.f32 %v9220_v46, %v2826_v62 }
0x174b   :  { %v2834_v28 = vmul.f32 %v9226_v59, %v2831_v34 }
0x174c   :  { %v2835_v38 = vsel %vm89_vm0, %v2833_v39, 0.0  ;;  %v10090_v39 = vld [vmem:[#allocation77_spill] sm:$0xff] }
0x174d   :  { %v2842_v58 = vsel %vm89_vm0, %v2834_v28, 0.0  ;;  %v2836_v13 = vrot.slane %v2835_v38, 4  ;;  %v10091_v28 = vld [vmem:[#allocation21_spill] sm:$0xff] }
0x174e   :  { %v2843_v27 = vrot.slane %v2842_v58, 4 }
0x174f   :  { %v2837_v49 = vadd.f32 %v2836_v13, %v2835_v38  ;;  %v10092_v38 = vld [vmem:[#allocation22_spill] sm:$0xff]  ;;  %v10094_v13 = vld [vmem:[#allocation23_spill] sm:$0xff] }
0x1750   :  { %v2844_v19 = vadd.f32 %v2843_v27, %v2842_v58  ;;  %v10093_v58 = vld [vmem:[#allocation78_spill] sm:$0xff]  ;;  %v10096_v27 = vld [vmem:[#allocation79_spill] sm:$0xff] }
0x1751   :  { %v2838_v36 = vrot.slane %v2837_v49, 2 }
0x1752   :  { %v2845_v26 = vrot.slane %v2844_v19, 2 }
0x1753   :  { %v2839_v31 = vadd.f32 %v2838_v36, %v2837_v49  ;;  %v10097_v49 = vld [vmem:[#allocation26_spill] sm:$0xff]  ;;  %v10099_v36 = vld [vmem:[#allocation80_spill] sm:$0xff] }
0x1754   :  { %v2846_v25 = vadd.f32 %v2845_v26, %v2844_v19  ;;  %v10098_v19 = vld [vmem:[#allocation27_spill] sm:$0xff]  ;;  %v10100_v26 = vld [vmem:[#allocation28_spill] sm:$0xff] }
0x1755   :  { %v2840_v62 = vrot.slane %v2839_v31, 1 }
0x1756   :  { %v2847_v46 = vrot.slane %v2846_v25, 1 }
0x1757   :  { %v2841_v32 = vadd.f32 %v2840_v62, %v2839_v31  ;;  %v10101_v31 = vld [vmem:[#allocation29_spill] sm:$0xff] }
0x1758   :  { %v2848_v29 = vadd.f32 %v2847_v46, %v2846_v25  ;;  %v10102_v62 = vld [vmem:[#allocation81_spill] sm:$0xff] }
0x175a   :  { %v2924_v51 = vsel %vm466_vm1, %v2848_v29, %v2841_v32 }
0x175b   :  { %5884 = vmatmul.mubr.msk.f32.vlgmr.msra.gmra.mrb[22].mxu0 %vm89_vm0, %v2924_v51 }
0x175c   :  { %7023 = vmatpush3.bf16.msra.mxu0 %v9970_v53  ;;  %5918 = vmatprep.mubr.msk.f32.mxu0 %vm7698_vm3, %v9913_v2 }
0x175d   :  { %7024 = vmatprep.subr.bf16.mxu0 %v9907_v10 }
0x1760   :  { %7026 = vmatpush3.bf16.msra.mxu0 %v9971_v0 }
0x1761   :  { %7027 = vmatprep.subr.bf16.mxu0 %v9907_v10 }
0x1764   :  { %7029 = vmatpush3.bf16.msra.mxu0 %v9972_v56 }
0x1765   :  { %7030 = vmatprep.subr.bf16.mxu0 %v9907_v10 }
0x1768   :  { %7032 = vmatpush3.bf16.msra.mxu0 %v9973_v4 }
0x1769   :  { %7033 = vmatprep.subr.bf16.mxu0 %v9907_v10 }
0x176c   :  { %7035 = vmatpush3.bf16.msra.mxu0 %v9974_v12 }
0x176d   :  { %7036 = vmatprep.subr.bf16.mxu0 %v9907_v10 }
0x1770   :  { %7038 = vmatpush3.bf16.msra.mxu0 %v9975_v24 }
0x1771   :  { %7039 = vmatprep.subr.bf16.mxu0 %v9907_v10 }
0x1774   :  { %7041 = vmatpush3.bf16.msra.mxu0 %v9976_v41 }
0x1775   :  { %7042 = vmatprep.subr.bf16.mxu0 %v9907_v10 }
0x1778   :  { %7044 = vmatpush3.bf16.msra.mxu0 %v9977_v35 }
0x1779   :  { %7077 = vmatprep.subr.bf16.mxu0 %v9907_v10 }
0x177b   :  { %5919 = vmatmul.mubr.f32.vlgmr.msra.gmra.mrb[24].mxu0 %v2918_v57 }
0x177c   :  { %7079 = vmatpush3.bf16.msra.mxu0 %v9978_v7  ;;  %5953 = vmatprep.mubr.msk.f32.mxu0 %vm7698_vm3, %v9913_v2 }
0x177d   :  { %7080 = vmatprep.subr.bf16.mxu0 %v9907_v10 }
0x1780   :  { %7082 = vmatpush3.bf16.msra.mxu0 %v9979_v44 }
0x1781   :  { %7083 = vmatprep.subr.bf16.mxu0 %v9907_v10 }
0x1784   :  { %7085 = vmatpush3.bf16.msra.mxu0 %v10030_v52 }
0x1785   :  { %7086 = vmatprep.subr.bf16.mxu0 %v9907_v10 }
0x1788   :  { %7088 = vmatpush3.bf16.msra.mxu0 %v10031_v43 }
0x1789   :  { %7089 = vmatprep.subr.bf16.mxu0 %v9907_v10 }
0x178c   :  { %7091 = vmatpush3.bf16.msra.mxu0 %v10032_v40 }
0x178d   :  { %7092 = vmatprep.subr.bf16.mxu0 %v9907_v10 }
0x1790   :  { %7094 = vmatpush3.bf16.msra.mxu0 %v9983_v33 }
0x1791   :  { %7095 = vmatprep.subr.bf16.mxu0 %v9907_v10 }
0x1794   :  { %7097 = vmatpush3.bf16.msra.mxu0 %v9984_v47 }
0x1795   :  { %7098 = vmatprep.subr.bf16.mxu0 %v9907_v10 }
0x1798   :  { %7100 = vmatpush3.bf16.msra.mxu0 %v10033_v45 }
0x1799   :  { %7126 = vmatprep.subr.bf16.mxu0 %v10034_v37 }
0x182e   :  { %v2993_v51 = vpop.f32.mrb[22].mxu0 }
0x182f   :  { %v5885_v29 = vpop.f32.mrb[23].mxu0 }
0x1830   :  { %v10104_v29 = vld [vmem:[#allocation31_spill] sm:$0xff] }
0x184e   :  { %v3063_v32 = vpop.f32.mrb[24].mxu0 }
0x184f   :  { %v3064_v25 = vadd.f32 %v3063_v32, %v2993_v51  ;;  %v5920_v57 = vpop.f32.mrb[25].mxu0  ;;  %v10103_v51 = vld [vmem:[#allocation30_spill] sm:$0xff] }
0x1850   :  { %v10105_v32 = vld [vmem:[#allocation82_spill] sm:$0xff]  ;;  %v10107_v57 = vld [vmem:[#allocation33_spill] sm:$0xff] }
0x1851   :  { %v3067_v34 = vadd.f32 %v9069_v60, %v3064_v25  ;;  %v10095_v60 = vld [vmem:[#allocation24_spill] sm:$0xff] }
0x1852   :  { %v10106_v25 = vld [vmem:[#allocation32_spill] sm:$0xff] }
0x1853   :  { %v3068_v46 = vmax.f32 %v3067_v34, 0.0  ;;  %v10108_v34 = vld [vmem:[#allocation83_spill] sm:$0xff] }
0x1855   :  { %3134 = vmatmul.mubr.f32.vlgmr.msra.gmra.mrb[22].mxu1 %v3068_v46  ;;  %5954 = vmatmul.mubr.f32.vlgmr.msra.gmra.mrb[26].mxu0 %v3068_v46  ;;  %v10109_v46 = vld [vmem:[#allocation34_spill] sm:$0xff] }
0x1856   :  { %7103 = vmatpush3.bf16.msra.mxu1 %v10090_v39  ;;  %7128 = vmatpush1.bf16.msra.mxu0 %v10091_v28 }
0x1857   :  { %7104 = vmatprep.subr.bf16.mxu1 %v9907_v10  ;;  %7130 = vmatprep.subr.bf16.mxu0 %v10092_v38 }
0x1858   :  { %5988 = vmatprep.mubr.msk.f32.mxu1 %vm7698_vm3, %v9913_v2  ;;  %3412 = vmatprep.mubr.f32.mxu0 %v9913_v2 }
0x185a   :  { %7106 = vmatpush3.bf16.msra.mxu1 %v10093_v58  ;;  %7132 = vmatpush1.bf16.msra.mxu0 %v10094_v13 }
0x185b   :  { %7107 = vmatprep.subr.bf16.mxu1 %v9907_v10  ;;  %7134 = vmatprep.subr.bf16.mxu0 %v10095_v60 }
0x185e   :  { %7109 = vmatpush3.bf16.msra.mxu1 %v10096_v27  ;;  %7136 = vmatpush1.bf16.msra.mxu0 %v10097_v49 }
0x185f   :  { %7110 = vmatprep.subr.bf16.mxu1 %v9907_v10  ;;  %7138 = vmatprep.subr.bf16.mxu0 %v10098_v19 }
0x1862   :  { %7112 = vmatpush3.bf16.msra.mxu1 %v10099_v36  ;;  %7140 = vmatpush1.bf16.msra.mxu0 %v10100_v26 }
0x1863   :  { %7113 = vmatprep.subr.bf16.mxu1 %v9907_v10  ;;  %7142 = vmatprep.subr.bf16.mxu0 %v10101_v31  ;;  %v10112_v31 = vld [vmem:[#allocation36_spill] sm:$0xff] }
0x1866   :  { %7115 = vmatpush3.bf16.msra.mxu1 %v10102_v62  ;;  %7144 = vmatpush1.bf16.msra.mxu0 %v10103_v51  ;;  %v10110_v62 = vld [vmem:[#allocation35_spill] sm:$0xff]  ;;  %v10111_v51 = vld [vmem:[#allocation84_spill] sm:$0xff] }
0x1867   :  { %7116 = vmatprep.subr.bf16.mxu1 %v9907_v10  ;;  %7146 = vmatprep.subr.bf16.mxu0 %v10104_v29  ;;  %v10113_v29 = vld [vmem:[#allocation3_spill] sm:$0xff] }
0x186a   :  { %7118 = vmatpush3.bf16.msra.mxu1 %v10105_v32  ;;  %7148 = vmatpush1.bf16.msra.mxu0 %v10106_v25 }
0x186b   :  { %7119 = vmatprep.subr.bf16.mxu1 %v9907_v10  ;;  %7150 = vmatprep.subr.bf16.mxu0 %v10107_v57 }
0x186e   :  { %7121 = vmatpush3.bf16.msra.mxu1 %v10108_v34  ;;  %7152 = vmatpush1.bf16.msra.mxu0 %v10109_v46 }
0x186f   :  { %7122 = vmatprep.subr.bf16.mxu1 %v9907_v10  ;;  %7154 = vmatprep.subr.bf16.mxu0 %v10110_v62 }
0x1872   :  { %7124 = vmatpush3.bf16.msra.mxu1 %v10111_v51  ;;  %7156 = vmatpush1.bf16.msra.mxu0 %v10112_v31 }
0x1873   :  { %7158 = vmatprep.subr.bf16.mxu1 %v10113_v29  ;;  %7189 = vmatprep.subr.bf16.mxu0 %v9907_v10  ;;  %v2729_v29 = vadd.f32 %v9176_v54, %v8720_v17  ;;  %v10115_v54 = vld [vmem:[#allocation7_spill] sm:$0xff] }
0x1928   :  { %v3135_v25 = vpop.f32.mrb[22].mxu1  ;;  %v3206_v32 = vpop.f32.mrb[26].mxu0 }
0x1929   :  { %v7546_v57 = vadd.f32 %v8712_v16, %v3135_v25  ;;  %v3137_v26 = vpop.f32.mrb[23].mxu1  ;;  %v5955_v34 = vpop.f32.mrb[27].mxu0  ;;  %v3207_v60 = vadd.f32 %v3206_v32, %v8722_v30  ;;  %v10122_v32 = vld [vmem:[#allocation41_spill] sm:$0xff] }
0x192a   :  { %v7548_v46 = vadd.f32 %v8714_v63, %v3137_v26 }
0x192b   :  { %v4875_v36 = vmul.f32 -1.442695, %v7546_v57 }
0x192c   :  { %v4876_v19 = vmul.f32 -1.442695, %v7548_v46 }
0x192d   :  { %7639 = vpow2.f32 %v4875_v36 }
0x192e   :  { %7641 = vpow2.f32 %v4876_v19 }
0x1937   :  { %v7640_v62 = vpop.eup %7639 }
0x1938   :  { %v3214_v51 = vadd.f32 1.0, %v7640_v62  ;;  %v7642_v31 = vpop.eup %7641 }
0x1939   :  { %v3221_v49 = vadd.f32 1.0, %v7642_v31  ;;  %v10119_v31 = vld [vmem:[#allocation40_spill] sm:$0xff] }
0x193a   :  { %7643 = vrcp.f32 %v3214_v51  ;;  %v10120_v51 = vld [vmem:[#allocation10_spill] sm:$0xff] }
0x193b   :  { %7645 = vrcp.f32 %v3221_v49  ;;  %v10118_v49 = vld [vmem:[#allocation9_spill] sm:$0xff] }
0x1944   :  { %v7644_v27 = vpop.eup %7643 }
0x1945   :  { %v3224_v25 = vmul.f32 %v7644_v27, %v2729_v29  ;;  %v7646_v57 = vpop.eup %7645  ;;  %v10117_v27 = vld [vmem:[#allocation8_spill] sm:$0xff]  ;;  %v10121_v29 = vld [vmem:[#allocation11_spill] sm:$0xff] }
0x1946   :  { %v3227_v26 = vsub.f32 1.0, %v7646_v57  ;;  %v3229_v19 = vmul.f32 %v7646_v57, %v9113_v3  ;;  %v10114_v3 = vld [vmem:[#allocation6_spill] sm:$0xff] }
0x1947   :  { %v3225_v34 = vadd.f32 %v3224_v25, %v3207_v60  ;;  %v10116_v60 = vld [vmem:[#allocation39_spill] sm:$0xff]  ;;  %v10123_v25 = vld [vmem:[#allocation12_spill] sm:$0xff]  ;;  %v10125_v57 = vld [vmem:[#allocation42_spill] sm:$0xff] }
0x1949   :  { %7647 = vtanh.f32 %v3225_v34  ;;  %v10124_v34 = vld [vmem:[#allocation13_spill] sm:$0xff] }
0x1953   :  { %v7648_v36 = vpop.eup %7647 }
0x1954   :  { %v3228_v46 = vmul.f32 %v7648_v36, %v3227_v26  ;;  %v10126_v26 = vld [vmem:[#allocation14_spill] sm:$0xff]  ;;  %v10127_v36 = vld [vmem:[#allocation43_spill] sm:$0xff] }
0x1956   :  { %v9311_v62 = vadd.f32 %v3229_v19, %v3228_v46  ;;  %v10128_v46 = vld [vmem:[#allocation56_spill] sm:$0xff] }
0x1957   :  { %v10129_v19 = vld [vmem:[#allocation44_spill] sm:$0xff] }
0x1958   :  { %5989 = vmatmul.mubr.f32.vlgmr.msra.gmra.mrb[26].mxu1 %v9311_v62  ;;  %3413 = vmatmul.mubr.f32.vlgmr.msra.gmra.mrb[28].mxu0 %v9311_v62 }
0x1959   :  { %7160 = vmatpush1.bf16.msra.mxu1 %v7793_v8  ;;  %3483 = vmatprep.mubr.f32.mxu1 %v9913_v2 }
0x195a   :  { %7162 = vmatprep.subr.bf16.mxu1 %v7795_v9  ;;  %7191 = vmatpush3.bf16.msra.mxu0 %v8151_v50 }
0x195b   :  { %7192 = vmatprep.subr.bf16.mxu0 %v9907_v10  ;;  %6023 = vmatprep.mubr.msk.f32.mxu0 %vm7698_vm3, %v9913_v2 }
0x195d   :  { %7164 = vmatpush1.bf16.msra.mxu1 %v7811_v14 }
0x195e   :  { %7166 = vmatprep.subr.bf16.mxu1 %v7814_v15  ;;  %7194 = vmatpush3.bf16.msra.mxu0 %v8162_v1 }
0x195f   :  { %7195 = vmatprep.subr.bf16.mxu0 %v9907_v10 }
0x1961   :  { %7168 = vmatpush1.bf16.msra.mxu1 %v7829_v20 }
0x1962   :  { %7170 = vmatprep.subr.bf16.mxu1 %v7832_v21  ;;  %7197 = vmatpush3.bf16.msra.mxu0 %v8174_v11 }
0x1963   :  { %7198 = vmatprep.subr.bf16.mxu0 %v9907_v10 }
0x1965   :  { %7172 = vmatpush1.bf16.msra.mxu1 %v10114_v3 }
0x1966   :  { %7174 = vmatprep.subr.bf16.mxu1 %v10115_v54  ;;  %7200 = vmatpush3.bf16.msra.mxu0 %v10116_v60 }
0x1967   :  { %7201 = vmatprep.subr.bf16.mxu0 %v9907_v10 }
0x1969   :  { %7176 = vmatpush1.bf16.msra.mxu1 %v10117_v27  ;;  %v10137_v27 = vld [vmem:[#allocation16_spill] sm:$0xff] }
0x196a   :  { %7178 = vmatprep.subr.bf16.mxu1 %v10118_v49  ;;  %7203 = vmatpush3.bf16.msra.mxu0 %v10119_v31  ;;  %v10136_v49 = vld [vmem:[#allocation17_spill] sm:$0xff] }
0x196b   :  { %7204 = vmatprep.subr.bf16.mxu0 %v9907_v10 }
0x196d   :  { %7180 = vmatpush1.bf16.msra.mxu1 %v10120_v51 }
0x196e   :  { %7182 = vmatprep.subr.bf16.mxu1 %v10121_v29  ;;  %7206 = vmatpush3.bf16.msra.mxu0 %v10122_v32  ;;  %v10134_v32 = vld [vmem:[#allocation25_spill] sm:$0xff] }
0x196f   :  { %7207 = vmatprep.subr.bf16.mxu0 %v9907_v10 }
0x1971   :  { %7184 = vmatpush1.bf16.msra.mxu1 %v10123_v25 }
0x1972   :  { %7186 = vmatprep.subr.bf16.mxu1 %v10124_v34  ;;  %7209 = vmatpush3.bf16.msra.mxu0 %v10125_v57  ;;  %v10130_v57 = vld [vmem:[#allocation45_spill] sm:$0xff]  ;;  %v10133_v34 = vld [vmem:[#allocation19_spill] sm:$0xff] }
0x1973   :  { %7210 = vmatprep.subr.bf16.mxu0 %v9907_v10 }
0x1975   :  { %7188 = vmatpush1.bf16.msra.mxu1 %v10126_v26  ;;  %v10131_v26 = vld [vmem:[#allocation46_spill] sm:$0xff] }
0x1976   :  { %7212 = vmatpush3.bf16.msra.mxu0 %v10127_v36  ;;  %7213 = vmatprep.subr.bf16.mxu1 %v9907_v10  ;;  %v10132_v36 = vld [vmem:[#allocation47_spill] sm:$0xff] }
0x1977   :  { %7250 = vmatprep.subr.bf16.mxu0 %v10128_v46 }
0x1978   :  { %3484 = vmatmul.mubr.f32.vlgmr.msra.gmra.mrb[28].mxu1 %v9311_v62 }
0x1979   :  { %7215 = vmatpush3.bf16.msra.mxu1 %v10129_v19  ;;  %6042 = vmatprep.mubr.msk.f32.mxu1 %vm7698_vm3, %v9913_v2 }
0x197a   :  { %7216 = vmatprep.subr.bf16.mxu1 %v9907_v10 }
0x197d   :  { %7218 = vmatpush3.bf16.msra.mxu1 %v10130_v57  ;;  %v10135_v57 = vld [vmem:[#allocation15_spill] sm:$0xff] }
0x197e   :  { %7219 = vmatprep.subr.bf16.mxu1 %v9907_v10 }
0x1981   :  { %7221 = vmatpush3.bf16.msra.mxu1 %v10131_v26 }
0x1982   :  { %7222 = vmatprep.subr.bf16.mxu1 %v9907_v10 }
0x1985   :  { %7224 = vmatpush3.bf16.msra.mxu1 %v10132_v36 }
0x1986   :  { %7225 = vmatprep.subr.bf16.mxu1 %v9907_v10 }
0x1a2b   :  { %v3297_v46 = vpop.f32.mrb[26].mxu1 }
0x1a2c   :  { %v3298_v19 = vadd.f32 %v10133_v34, %v3297_v46  ;;  %v5990_v25 = vpop.f32.mrb[27].mxu1 }
0x1a2e   :  { %v3308_v29 = vrot.slane %v3298_v19, %v10134_v32  ;;  %v3328_v34 = vsel %vm1056_vm5, %v3298_v19, -inf }
0x1a30   :  { %v3309_v51 = vcombine.high %v3308_v29, %v3308_v29  ;;  %4877 = vst.sshfl [vmem:[%s9685_s13 + $0x4] sm:$0x1 pattern:$0x73625140] %v3308_v29 }
0x1a32   :  { %4878 = vst.sshfl [vmem:[%s9685_s13 + $0xc] sm:$0x1 pattern:$0x73625140] %v3309_v51 }
0x1a4b   :  { %v9369_v26 = vpop.f32.mrb[28].mxu1 }
0x1a4c   :  { %v3487_v36 = vpop.f32.mrb[29].mxu1 }
0x1a4d   :  { %v3488_v31 = vadd.f32 %v3487_v36, %v10135_v57 }
0x1a4f   :  { %3492 = vperm.xlu1 %7575, %v3488_v31  }
0x1a73   :  { %3329 = vmax.xlane.f32.xlu1 %v3328_v34 }
0x1ace   :  { %v3493_v25 = vpop.permute.xlu1 %3492 }
0x1acf   :  { %v3497_v46 = vrot.slane %v3493_v25, %v7950_v5  ;;  %v3501_v32 = vrot.slane %v3493_v25, %v7953_v6 }
0x1ad1   :  { %v3504_v29 = vadd.f32 %v3497_v46, %v10136_v49  ;;  %v3505_v60 = vadd.f32 %v3501_v32, %v10137_v27 }
0x1ad3   :  { %3509 = vperm.xlu0 %7576, %v3504_v29  }
0x1ad7   :  { %3512 = vperm.xlu0 %7576, %v3505_v60  }
0x1b00   :  { %v3330_v51 = vpop.xlane.xlu1 %3329 }
0x1b01   :  { %vm3331_vm15 = vcmp.eq.f32.partialorder %v3298_v19, %v3330_v51 }
0x1b02   :  { %v3332_v54 = vsel %vm3331_vm15, %v9959_v48, 128 }
0x1b03   :  { %v3333_v31 = vsel %vm1056_vm5, %v3332_v54, 2147483647 }
0x1b04   :  { %v3335_v36 = vshra.s32 %v3333_v31, 16  ;;  %v3334_v27 = vand.u32 65535, %v3333_v31 }
0x1b06   :  { %v3337_v57 = vcvt.s32.f32 %v3335_v36  ;;  %v3336_v51 = vcvt.s32.f32 %v3334_v27 }
0x1b08   :  { %3338 = vmin.xlane.f32.xlu0 %v3337_v57 }
0x1b52   :  { %v3510_v34 = vpop.permute.xlu0 %3509 }
0x1b53   :  { %v3517_v11 = vrot.slane %v3510_v34, %v9960_v55 }
0x1b56   :  { %v3513_v3 = vpop.permute.xlu0 %3512 }
0x1b57   :  { %v3521_v25 = vrot.slane %v3513_v3, %v9960_v55 }
0x1b59   :  { %v3522_v46 = vsel %vm466_vm1, %v3521_v25, %v3517_v11 }
0x1b5a   :  { %v3524_v32 = vsel %vm469_vm2, %v3522_v46, -inf }
0x1b5b   :  { %3525 = vmax.xlane.f32.xlu1 %v3524_v32  ;;  %v10143_v32 = vld [vmem:[#allocation68_spill] sm:$0xff] }
0x1b95   :  { %v3339_v19 = vpop.xlane.xlu0 %3338 }
0x1b96   :  { %vm3340_vm4 = vcmp.eq.f32.partialorder %v3337_v57, %v3339_v19  ;;  %v3345_v31 = vcvt.f32.s32 %v3339_v19  ;;  %v10144_v19 = vld [vmem:[#allocation69_spill] sm:$0xff] }
0x1b97   :  { %v3341_v49 = vsel %vm3340_vm4, %v3336_v51, inf  ;;  %v10145_v51 = vld [vmem:[#allocation71_spill] sm:$0xff] }
0x1b98   :  { %3342 = vmin.xlane.f32.xlu1 %v3341_v49  ;;  %v3346_v57 = vshll.u32 %v3345_v31, 16 }
0x1be8   :  { %v3526_v54 = vpop.xlane.xlu1 %3525 }
0x1be9   :  { %v3531_v36 = vrot.slane %v3526_v54, %v7950_v5  ;;  %v3535_v21 = vrot.slane %v3526_v54, %v7953_v6  ;;  %v10146_v54 = vld [vmem:[#allocation72_spill] sm:$0xff] }
0x1beb   :  { %v3538_v20 = vsub.f32 %v3504_v29, %v3531_v36  ;;  %v3539_v34 = vsub.f32 %v3505_v60, %v3535_v21  ;;  %v10139_v21 = vld [vmem:[#allocation62_spill] sm:$0xff]  ;;  %v10141_v60 = vld [vmem:[#allocation65_spill] sm:$0xff] }
0x1bec   :  { %v10142_v29 = vld [vmem:[#allocation66_spill] sm:$0xff] }
0x1bed   :  { %v3540_v1 = vmul.f32 1.442695, %v3538_v20  ;;  %v3542_v3 = vmul.f32 1.442695, %v3539_v34  ;;  %v10138_v20 = vld [vmem:[#allocation60_spill] sm:$0xff]  ;;  %v10147_v36 = vld [vmem:[#allocation74_spill] sm:$0xff] }
0x1bee   :  { %v10148_v34 = vld [vmem:[#allocation75_spill] sm:$0xff] }
0x1bef   :  { %7649 = vpow2.f32 %v3540_v1  ;;  %v10140_v1 = vld [vmem:[#allocation63_spill] sm:$0xff] }
0x1bf0   :  { %7651 = vpow2.f32 %v3542_v3 }
0x1bf9   :  { %v7650_v11 = vpop.eup %7649 }
0x1bfa   :  { %v7652_v25 = vpop.eup %7651  ;;  %3547 = vperm.xlu1 %7575, %v7650_v11  }
0x1bfb   :  { %3550 = vperm.xlu0 %7576, %v7652_v25  }
0x1c25   :  { %v3343_v27 = vpop.xlane.xlu1 %3342 }
0x1c26   :  { %v3344_v46 = vcvt.f32.s32 %v3343_v27 }
0x1c28   :  { %v3347_v49 = vadd.s32 %v3346_v57, %v3344_v46 }
0x1c2a   :  { %vm3606_vm6 = vcmp.eq.s32.totalorder %v9959_v48, %v3347_v49 }
0x1c2b   :  { %6024 = vmatmul.mubr.msk.f32.vlgmr.msra.gmra.mrb[30].mxu0 %vm3606_vm6, %v9961_v18 }
0x1c2c   :  { %7252 = vmatpush1.bf16.msra.mxu0 %v8393_v22  ;;  %3890 = vmatprep.mubr.f32.mxu0 %v9913_v2 }
0x1c2d   :  { %7254 = vmatprep.subr.bf16.mxu0 %v8407_v42 }
0x1c30   :  { %7256 = vmatpush1.bf16.msra.mxu0 %v8420_v61 }
0x1c31   :  { %7258 = vmatprep.subr.bf16.mxu0 %v8435_v23 }
0x1c34   :  { %7260 = vmatpush1.bf16.msra.mxu0 %v10138_v20 }
0x1c35   :  { %7262 = vmatprep.subr.bf16.mxu0 %v10139_v21 }
0x1c38   :  { %7264 = vmatpush1.bf16.msra.mxu0 %v10140_v1 }
0x1c39   :  { %7266 = vmatprep.subr.bf16.mxu0 %v10141_v60 }
0x1c3c   :  { %7268 = vmatpush1.bf16.msra.mxu0 %v10142_v29 }
0x1c3d   :  { %7270 = vmatprep.subr.bf16.mxu0 %v10143_v32 }
0x1c40   :  { %7272 = vmatpush1.bf16.msra.mxu0 %v10144_v19 }
0x1c41   :  { %7274 = vmatprep.subr.bf16.mxu0 %v10145_v51 }
0x1c44   :  { %7276 = vmatpush1.bf16.msra.mxu0 %v10146_v54 }
0x1c45   :  { %7278 = vmatprep.subr.bf16.mxu0 %v10147_v36 }
0x1c48   :  { %7280 = vmatpush1.bf16.msra.mxu0 %v10148_v34 }
0x1c49   :  { %7305 = vmatprep.subr.bf16.mxu0 %v9907_v10 }
0x1c79   :  { %v3548_v3 = vpop.permute.xlu1 %3547 }
0x1c7a   :  { %v3551_v31 = vpop.permute.xlu0 %3550  ;;  %v3555_v27 = vrot.slane %v3548_v3, %v9960_v55 }
0x1c7b   :  { %v3559_v57 = vrot.slane %v3551_v31, %v9960_v55 }
0x1c7d   :  { %v3560_v46 = vsel %vm466_vm1, %v3559_v57, %v3555_v27  ;;  %v10149_v27 = vld [vmem:[#allocation48_spill] sm:$0xff] }
0x1c7e   :  { %v3562_v49 = vsel %vm469_vm2, %v3560_v46, 0.0 }
0x1c7f   :  { %3563 = vadd.xlane.f32.xlu1 %v3562_v49 }
0x1cfe   :  { %v3675_v51 = vpop.f32.mrb[30].mxu0 }
0x1cff   :  { %v6025_v19 = vpop.f32.mrb[31].mxu0 }
0x1d0c   :  { %v3564_v54 = vpop.xlane.xlu1 %3563 }
0x1d0d   :  { %v3569_v36 = vrot.slane %v3564_v54, %v7950_v5  ;;  %v3573_v34 = vrot.slane %v3564_v54, %v7953_v6 }
0x1d0f   :  { %7653 = vrcp.f32 %v3569_v36 }
0x1d10   :  { %7655 = vrcp.f32 %v3573_v34 }
0x1d19   :  { %v7654_v32 = vpop.eup %7653 }
0x1d1a   :  { %v3577_v29 = vmul.f32 %v7654_v32, %v7650_v11  ;;  %v7656_v60 = vpop.eup %7655 }
0x1d1b   :  { %v3579_v3 = vmul.f32 %v7656_v60, %v7652_v25 }
0x1d1c   :  { %3582 = vperm.xlu0 %7576, %v3577_v29  }
0x1d20   :  { %3587 = vperm.xlu0 %7576, %v3579_v3  }
0x1d9b   :  { %v3583_v31 = vpop.permute.xlu0 %3582 }
0x1d9c   :  { %v3590_v57 = vmul.f32 %v10149_v27, %v3583_v31 }
0x1d9e   :  { %v3592_v46 = vsel %vm89_vm0, %v3590_v57, 0.0 }
0x1d9f   :  { %v3593_v49 = vrot.slane %v3592_v46, 4  ;;  %v3588_v19 = vpop.permute.xlu0 %3587 }
0x1da0   :  { %v3591_v1 = vmul.f32 %v9226_v59, %v3588_v19  ;;  %v10155_v19 = vld [vmem:[#allocation28_spill] sm:$0xff] }
0x1da1   :  { %v3594_v21 = vadd.f32 %v3593_v49, %v3592_v46  ;;  %v10151_v46 = vld [vmem:[#allocation79_spill] sm:$0xff]  ;;  %v10154_v49 = vld [vmem:[#allocation80_spill] sm:$0xff] }
0x1da2   :  { %v3599_v54 = vsel %vm89_vm0, %v3591_v1, 0.0 }
0x1da3   :  { %v3595_v36 = vrot.slane %v3594_v21, 2  ;;  %v3600_v34 = vrot.slane %v3599_v54, 4 }
0x1da5   :  { %v3596_v20 = vadd.f32 %v3595_v36, %v3594_v21  ;;  %v3601_v11 = vadd.f32 %v3600_v34, %v3599_v54  ;;  %v10156_v54 = vld [vmem:[#allocation29_spill] sm:$0xff]  ;;  %v10158_v36 = vld [vmem:[#allocation30_spill] sm:$0xff]  ;;  %v10159_v34 = vld [vmem:[#allocation31_spill] sm:$0xff] }
0x1da7   :  { %v3602_v32 = vrot.slane %v3601_v11, 2  ;;  %v3597_v29 = vrot.slane %v3596_v20, 1 }
0x1da9   :  { %v3603_v25 = vadd.f32 %v3602_v32, %v3601_v11  ;;  %v3598_v3 = vadd.f32 %v3597_v29, %v3596_v20  ;;  %v10160_v11 = vld [vmem:[#allocation82_spill] sm:$0xff]  ;;  %v10161_v32 = vld [vmem:[#allocation32_spill] sm:$0xff]  ;;  %v10162_v29 = vld [vmem:[#allocation33_spill] sm:$0xff] }
0x1dab   :  { %v3604_v60 = vrot.slane %v3603_v25, 1 }
0x1dad   :  { %v3605_v23 = vadd.f32 %v3604_v60, %v3603_v25  ;;  %v10163_v25 = vld [vmem:[#allocation83_spill] sm:$0xff]  ;;  %v10164_v60 = vld [vmem:[#allocation34_spill] sm:$0xff] }
0x1daf   :  { %v3681_v31 = vsel %vm466_vm1, %v3605_v23, %v3598_v3  ;;  %v10165_v3 = vld [vmem:[#allocation35_spill] sm:$0xff] }
0x1db0   :  { %6043 = vmatmul.mubr.msk.f32.vlgmr.msra.gmra.mrb[30].mxu1 %vm89_vm0, %v3681_v31  ;;  %v10166_v31 = vld [vmem:[#allocation84_spill] sm:$0xff] }
0x1db1   :  { %7227 = vmatpush3.bf16.msra.mxu1 %v9970_v53  ;;  %6077 = vmatprep.mubr.msk.f32.mxu1 %vm7698_vm3, %v9913_v2 }
0x1db2   :  { %7228 = vmatprep.subr.bf16.mxu1 %v9907_v10 }
0x1db5   :  { %7230 = vmatpush3.bf16.msra.mxu1 %v9971_v0 }
0x1db6   :  { %7231 = vmatprep.subr.bf16.mxu1 %v9907_v10 }
0x1db9   :  { %7233 = vmatpush3.bf16.msra.mxu1 %v9972_v56 }
0x1dba   :  { %7234 = vmatprep.subr.bf16.mxu1 %v9907_v10 }
0x1dbd   :  { %7236 = vmatpush3.bf16.msra.mxu1 %v9973_v4 }
0x1dbe   :  { %7237 = vmatprep.subr.bf16.mxu1 %v9907_v10 }
0x1dc1   :  { %7239 = vmatpush3.bf16.msra.mxu1 %v9974_v12 }
0x1dc2   :  { %7240 = vmatprep.subr.bf16.mxu1 %v9907_v10 }
0x1dc5   :  { %7242 = vmatpush3.bf16.msra.mxu1 %v9975_v24 }
0x1dc6   :  { %7243 = vmatprep.subr.bf16.mxu1 %v9907_v10 }
0x1dc9   :  { %7245 = vmatpush3.bf16.msra.mxu1 %v9976_v41 }
0x1dca   :  { %7246 = vmatprep.subr.bf16.mxu1 %v9907_v10 }
0x1dcd   :  { %7248 = vmatpush3.bf16.msra.mxu1 %v9977_v35 }
0x1dce   :  { %7281 = vmatprep.subr.bf16.mxu1 %v9907_v10 }
0x1dd0   :  { %6078 = vmatmul.mubr.f32.vlgmr.msra.gmra.mrb[32].mxu1 %v3675_v51  ;;  %v9455_v51 = vld [vmem:[%s9690_s6] ss:$0 sm:$0xff] }
0x1dd1   :  { %7283 = vmatpush3.bf16.msra.mxu1 %v9978_v7  ;;  %6112 = vmatprep.mubr.msk.f32.mxu1 %vm7698_vm3, %v9913_v2 }
0x1dd2   :  { %7284 = vmatprep.subr.bf16.mxu1 %v9907_v10 }
0x1dd5   :  { %7286 = vmatpush3.bf16.msra.mxu1 %v9979_v44 }
0x1dd6   :  { %7287 = vmatprep.subr.bf16.mxu1 %v9907_v10 }
0x1dd9   :  { %7289 = vmatpush3.bf16.msra.mxu1 %v10030_v52 }
0x1dda   :  { %7290 = vmatprep.subr.bf16.mxu1 %v9907_v10 }
0x1ddd   :  { %7292 = vmatpush3.bf16.msra.mxu1 %v10031_v43 }
0x1dde   :  { %7293 = vmatprep.subr.bf16.mxu1 %v9907_v10 }
0x1de1   :  { %7295 = vmatpush3.bf16.msra.mxu1 %v10032_v40 }
0x1de2   :  { %7296 = vmatprep.subr.bf16.mxu1 %v9907_v10 }
0x1de5   :  { %7298 = vmatpush3.bf16.msra.mxu1 %v9983_v33 }
0x1de6   :  { %7299 = vmatprep.subr.bf16.mxu1 %v9907_v10 }
0x1de9   :  { %7301 = vmatpush3.bf16.msra.mxu1 %v9984_v47 }
0x1dea   :  { %7302 = vmatprep.subr.bf16.mxu1 %v9907_v10 }
0x1ded   :  { %7304 = vmatpush3.bf16.msra.mxu1 %v10033_v45 }
0x1dee   :  { %7330 = vmatprep.subr.bf16.mxu1 %v10034_v37  ;;  %v10150_v37 = vld [vmem:[#allocation24_spill] sm:$0xff] }
0x1e83   :  { %v3750_v23 = vpop.f32.mrb[30].mxu1 }
0x1e84   :  { %v6044_v59 = vpop.f32.mrb[31].mxu1 }
0x1e85   :  { %v10168_v59 = vld [vmem:[#allocation3_spill] sm:$0xff] }
0x1ea3   :  { %v3820_v20 = vpop.f32.mrb[32].mxu1 }
0x1ea4   :  { %v3821_v21 = vadd.f32 %v3820_v20, %v3750_v23  ;;  %v6079_v1 = vpop.f32.mrb[33].mxu1  ;;  %v10167_v23 = vld [vmem:[#allocation36_spill] sm:$0xff] }
0x1ea6   :  { %v3824_v27 = vadd.f32 %v9455_v51, %v3821_v21 }
0x1ea8   :  { %v3825_v57 = vmax.f32 %v3824_v27, 0.0 }
0x1eaa   :  { %3891 = vmatmul.mubr.f32.vlgmr.msra.gmra.mrb[28].mxu0 %v3825_v57  ;;  %6113 = vmatmul.mubr.f32.vlgmr.msra.gmra.mrb[34].mxu1 %v3825_v57 }
0x1eab   :  { %7307 = vmatpush3.bf16.msra.mxu0 %v10090_v39  ;;  %7332 = vmatpush1.bf16.msra.mxu1 %v10091_v28  ;;  %v10152_v28 = vld [vmem:[#allocation26_spill] sm:$0xff] }
0x1eac   :  { %7308 = vmatprep.subr.bf16.mxu0 %v9907_v10  ;;  %7334 = vmatprep.subr.bf16.mxu1 %v10092_v38  ;;  %v10153_v38 = vld [vmem:[#allocation27_spill] sm:$0xff] }
0x1ead   :  { %6147 = vmatprep.mubr.msk.f32.mxu0 %vm7698_vm3, %v9913_v2  ;;  %4169 = vmatprep.mubr.f32.mxu1 %v9913_v2 }
0x1eaf   :  { %7310 = vmatpush3.bf16.msra.mxu0 %v10093_v58  ;;  %7336 = vmatpush1.bf16.msra.mxu1 %v10094_v13  ;;  %v10157_v13 = vld [vmem:[#allocation81_spill] sm:$0xff] }
0x1eb0   :  { %7311 = vmatprep.subr.bf16.mxu0 %v9907_v10  ;;  %7338 = vmatprep.subr.bf16.mxu1 %v10150_v37 }
0x1eb3   :  { %7313 = vmatpush3.bf16.msra.mxu0 %v10151_v46  ;;  %7340 = vmatpush1.bf16.msra.mxu1 %v10152_v28 }
0x1eb4   :  { %7314 = vmatprep.subr.bf16.mxu0 %v9907_v10  ;;  %7342 = vmatprep.subr.bf16.mxu1 %v10153_v38 }
0x1eb7   :  { %7316 = vmatpush3.bf16.msra.mxu0 %v10154_v49  ;;  %7344 = vmatpush1.bf16.msra.mxu1 %v10155_v19 }
0x1eb8   :  { %7317 = vmatprep.subr.bf16.mxu0 %v9907_v10  ;;  %7346 = vmatprep.subr.bf16.mxu1 %v10156_v54 }
0x1ebb   :  { %7319 = vmatpush3.bf16.msra.mxu0 %v10157_v13  ;;  %7348 = vmatpush1.bf16.msra.mxu1 %v10158_v36 }
0x1ebc   :  { %7320 = vmatprep.subr.bf16.mxu0 %v9907_v10  ;;  %7350 = vmatprep.subr.bf16.mxu1 %v10159_v34 }
0x1ebf   :  { %7322 = vmatpush3.bf16.msra.mxu0 %v10160_v11  ;;  %7352 = vmatpush1.bf16.msra.mxu1 %v10161_v32  ;;  %v3486_v32 = vadd.f32 %v9369_v26, %v8720_v17  ;;  %v10171_v26 = vld [vmem:[#allocation5_spill] sm:$0xff] }
0x1ec0   :  { %7323 = vmatprep.subr.bf16.mxu0 %v9907_v10  ;;  %7354 = vmatprep.subr.bf16.mxu1 %v10162_v29 }
0x1ec3   :  { %7325 = vmatpush3.bf16.msra.mxu0 %v10163_v25  ;;  %7356 = vmatpush1.bf16.msra.mxu1 %v10164_v60 }
0x1ec4   :  { %7326 = vmatprep.subr.bf16.mxu0 %v9907_v10  ;;  %7358 = vmatprep.subr.bf16.mxu1 %v10165_v3 }
0x1ec7   :  { %7328 = vmatpush3.bf16.msra.mxu0 %v10166_v31  ;;  %7360 = vmatpush1.bf16.msra.mxu1 %v10167_v23 }
0x1ec8   :  { %7362 = vmatprep.subr.bf16.mxu0 %v10168_v59  ;;  %7393 = vmatprep.subr.bf16.mxu1 %v9907_v10 }
0x1f7d   :  { %v3892_v20 = vpop.f32.mrb[28].mxu0  ;;  %v3963_v21 = vpop.f32.mrb[34].mxu1 }
0x1f7e   :  { %v7550_v1 = vadd.f32 %v8712_v16, %v3892_v20  ;;  %v3894_v27 = vpop.f32.mrb[29].mxu0  ;;  %v6114_v57 = vpop.f32.mrb[35].mxu1  ;;  %v3964_v60 = vadd.f32 %v3963_v21, %v8722_v30  ;;  %v10174_v21 = vld [vmem:[#allocation7_spill] sm:$0xff] }
0x1f7f   :  { %v7552_v28 = vadd.f32 %v8714_v63, %v3894_v27 }
0x1f80   :  { %v4882_v37 = vmul.f32 -1.442695, %v7550_v1 }
0x1f81   :  { %v4883_v38 = vmul.f32 -1.442695, %v7552_v28  ;;  %v10175_v28 = vld [vmem:[#allocation39_spill] sm:$0xff] }
0x1f82   :  { %7657 = vpow2.f32 %v4882_v37 }
0x1f83   :  { %7659 = vpow2.f32 %v4883_v38  ;;  %v10178_v38 = vld [vmem:[#allocation40_spill] sm:$0xff] }
0x1f8c   :  { %v7658_v19 = vpop.eup %7657 }
0x1f8d   :  { %v3971_v54 = vadd.f32 1.0, %v7658_v19  ;;  %v7660_v36 = vpop.eup %7659  ;;  %v10179_v19 = vld [vmem:[#allocation10_spill] sm:$0xff] }
0x1f8e   :  { %v3978_v34 = vadd.f32 1.0, %v7660_v36  ;;  %v10181_v36 = vld [vmem:[#allocation41_spill] sm:$0xff] }
0x1f8f   :  { %7661 = vrcp.f32 %v3971_v54  ;;  %v10180_v54 = vld [vmem:[#allocation11_spill] sm:$0xff] }
0x1f90   :  { %7663 = vrcp.f32 %v3978_v34  ;;  %v10182_v34 = vld [vmem:[#allocation12_spill] sm:$0xff] }
0x1f99   :  { %v7662_v29 = vpop.eup %7661 }
0x1f9a   :  { %v3981_v3 = vmul.f32 %v7662_v29, %v3486_v32  ;;  %v7664_v59 = vpop.eup %7663  ;;  %v10183_v32 = vld [vmem:[#allocation13_spill] sm:$0xff]  ;;  %v10184_v29 = vld [vmem:[#allocation42_spill] sm:$0xff] }
0x1f9b   :  { %v3984_v20 = vsub.f32 1.0, %v7664_v59  ;;  %v3986_v57 = vmul.f32 %v7664_v59, %v9311_v62  ;;  %v10169_v62 = vld [vmem:[#allocation37_spill] sm:$0xff]  ;;  %v10188_v59 = vld [vmem:[#allocation44_spill] sm:$0xff] }
0x1f9c   :  { %v3982_v23 = vadd.f32 %v3981_v3, %v3964_v60  ;;  %v10185_v60 = vld [vmem:[#allocation14_spill] sm:$0xff]  ;;  %v10186_v3 = vld [vmem:[#allocation43_spill] sm:$0xff] }
0x1f9e   :  { %7665 = vtanh.f32 %v3982_v23  ;;  %v10187_v23 = vld [vmem:[#allocation56_spill] sm:$0xff] }
0x1fa8   :  { %v7666_v1 = vpop.eup %7665 }
0x1fa9   :  { %v3985_v27 = vmul.f32 %v7666_v1, %v3984_v20  ;;  %v10189_v20 = vld [vmem:[#allocation45_spill] sm:$0xff]  ;;  %v10190_v1 = vld [vmem:[#allocation46_spill] sm:$0xff] }
0x1fab   :  { %v9499_v37 = vadd.f32 %v3986_v57, %v3985_v27  ;;  %v10191_v27 = vld [vmem:[#allocation47_spill] sm:$0xff] }
0x1fad   :  { %6148 = vmatmul.mubr.f32.vlgmr.msra.gmra.mrb[32].mxu0 %v9499_v37  ;;  %4170 = vmatmul.mubr.f32.vlgmr.msra.gmra.mrb[36].mxu1 %v9499_v37 }
0x1fae   :  { %7364 = vmatpush1.bf16.msra.mxu0 %v7793_v8  ;;  %4240 = vmatprep.mubr.f32.mxu0 %v9913_v2  ;;  %v10170_v8 = vld [vmem:[#allocation4_spill] sm:$0xff] }
0x1faf   :  { %7366 = vmatprep.subr.bf16.mxu0 %v7795_v9  ;;  %7395 = vmatpush3.bf16.msra.mxu1 %v8151_v50  ;;  %v10172_v9 = vld [vmem:[#allocation38_spill] sm:$0xff] }
0x1fb0   :  { %7396 = vmatprep.subr.bf16.mxu1 %v9907_v10  ;;  %6182 = vmatprep.mubr.msk.f32.mxu1 %vm7698_vm3, %v9913_v2  ;;  %v10173_v50 = vld [vmem:[#allocation6_spill] sm:$0xff] }
0x1fb2   :  { %7368 = vmatpush1.bf16.msra.mxu0 %v7811_v14  ;;  %v10176_v14 = vld [vmem:[#allocation8_spill] sm:$0xff] }
0x1fb3   :  { %7370 = vmatprep.subr.bf16.mxu0 %v7814_v15  ;;  %7398 = vmatpush3.bf16.msra.mxu1 %v10169_v62  ;;  %v10177_v15 = vld [vmem:[#allocation9_spill] sm:$0xff]  ;;  %v9552_v62 = vld [vmem:[%s9693_s12] ss:$0 sm:$0xff] }
0x1fb4   :  { %7399 = vmatprep.subr.bf16.mxu1 %v9907_v10 }
0x1fb6   :  { %7372 = vmatpush1.bf16.msra.mxu0 %v10170_v8 }
0x1fb7   :  { %7374 = vmatprep.subr.bf16.mxu0 %v10171_v26  ;;  %7401 = vmatpush3.bf16.msra.mxu1 %v10172_v9  ;;  %v10192_v9 = vld [vmem:[#allocation25_spill] sm:$0xff] }
0x1fb8   :  { %7402 = vmatprep.subr.bf16.mxu1 %v9907_v10 }
0x1fba   :  { %7376 = vmatpush1.bf16.msra.mxu0 %v10173_v50 }
0x1fbb   :  { %7378 = vmatprep.subr.bf16.mxu0 %v10174_v21  ;;  %7404 = vmatpush3.bf16.msra.mxu1 %v10175_v28 }
0x1fbc   :  { %7405 = vmatprep.subr.bf16.mxu1 %v9907_v10 }
0x1fbe   :  { %7380 = vmatpush1.bf16.msra.mxu0 %v10176_v14 }
0x1fbf   :  { %7382 = vmatprep.subr.bf16.mxu0 %v10177_v15  ;;  %7407 = vmatpush3.bf16.msra.mxu1 %v10178_v38  ;;  %v10193_v15 = vld [vmem:[#allocation15_spill] sm:$0xff] }
0x1fc0   :  { %7408 = vmatprep.subr.bf16.mxu1 %v9907_v10 }
0x1fc2   :  { %7384 = vmatpush1.bf16.msra.mxu0 %v10179_v19 }
0x1fc3   :  { %7386 = vmatprep.subr.bf16.mxu0 %v10180_v54  ;;  %7410 = vmatpush3.bf16.msra.mxu1 %v10181_v36 }
0x1fc4   :  { %7411 = vmatprep.subr.bf16.mxu1 %v9907_v10 }
0x1fc6   :  { %7388 = vmatpush1.bf16.msra.mxu0 %v10182_v34 }
0x1fc7   :  { %7390 = vmatprep.subr.bf16.mxu0 %v10183_v32  ;;  %7413 = vmatpush3.bf16.msra.mxu1 %v10184_v29  ;;  %v10194_v32 = vld [vmem:[#allocation17_spill] sm:$0xff] }
0x1fc8   :  { %7414 = vmatprep.subr.bf16.mxu1 %v9907_v10 }
0x1fca   :  { %7392 = vmatpush1.bf16.msra.mxu0 %v10185_v60  ;;  %v10195_v60 = vld [vmem:[#allocation16_spill] sm:$0xff] }
0x1fcb   :  { %7416 = vmatpush3.bf16.msra.mxu1 %v10186_v3  ;;  %7417 = vmatprep.subr.bf16.mxu0 %v9907_v10 }
0x1fcc   :  { %7454 = vmatprep.subr.bf16.mxu1 %v10187_v23 }
0x1fcd   :  { %4241 = vmatmul.mubr.f32.vlgmr.msra.gmra.mrb[34].mxu0 %v9499_v37 }
0x1fce   :  { %7419 = vmatpush3.bf16.msra.mxu0 %v10188_v59  ;;  %6201 = vmatprep.mubr.msk.f32.mxu0 %vm7698_vm3, %v9913_v2 }
0x1fcf   :  { %7420 = vmatprep.subr.bf16.mxu0 %v9907_v10 }
0x1fd2   :  { %7422 = vmatpush3.bf16.msra.mxu0 %v10189_v20 }
0x1fd3   :  { %7423 = vmatprep.subr.bf16.mxu0 %v9907_v10 }
0x1fd6   :  { %7425 = vmatpush3.bf16.msra.mxu0 %v10190_v1 }
0x1fd7   :  { %7426 = vmatprep.subr.bf16.mxu0 %v9907_v10 }
0x1fda   :  { %7428 = vmatpush3.bf16.msra.mxu0 %v10191_v27 }
0x1fdb   :  { %7429 = vmatprep.subr.bf16.mxu0 %v9907_v10 }
0x2080   :  { %v4054_v57 = vpop.f32.mrb[32].mxu0 }
0x2081   :  { %v4055_v8 = vadd.f32 %v9552_v62, %v4054_v57  ;;  %v6149_v26 = vpop.f32.mrb[33].mxu0 }
0x2083   :  { %v4065_v50 = vrot.slane %v4055_v8, %v10192_v9  ;;  %v4085_v19 = vsel %vm1056_vm5, %v4055_v8, -inf }
0x2085   :  { %v4066_v21 = vcombine.high %v4065_v50, %v4065_v50  ;;  %4884 = vst.sshfl [vmem:[%s9685_s13 + $0x5] sm:$0x1 pattern:$0x73625140] %v4065_v50 }
0x2087   :  { %4885 = vst.sshfl [vmem:[%s9685_s13 + $0xd] sm:$0x1 pattern:$0x73625140] %v4066_v21 }
0x20a0   :  { %v9562_v28 = vpop.f32.mrb[34].mxu0 }
0x20a1   :  { %v4244_v14 = vpop.f32.mrb[35].mxu0 }
0x20a2   :  { %v4245_v38 = vadd.f32 %v4244_v14, %v10193_v15 }
0x20a4   :  { %4249 = vperm.xlu0 %7576, %v4245_v38  }
0x20c3   :  { %4086 = vmax.xlane.f32.xlu0 %v4085_v19 }
0x2123   :  { %v4250_v54 = vpop.permute.xlu0 %4249 }
0x2124   :  { %v4254_v36 = vrot.slane %v4250_v54, %v7950_v5  ;;  %v4258_v34 = vrot.slane %v4250_v54, %v7953_v6 }
0x2126   :  { %v4261_v29 = vadd.f32 %v4254_v36, %v10194_v32  ;;  %v4262_v3 = vadd.f32 %v4258_v34, %v10195_v60 }
0x2128   :  { %4266 = vperm.xlu1 %7575, %v4261_v29  }
0x212c   :  { %4269 = vperm.xlu1 %7575, %v4262_v3  }
0x2150   :  { %v4087_v23 = vpop.xlane.xlu0 %4086 }
0x2151   :  { %vm4088_vm7 = vcmp.eq.f32.partialorder %v4055_v8, %v4087_v23 }
0x2152   :  { %v4089_v59 = vsel %vm4088_vm7, %v9959_v48, 128 }
0x2153   :  { %v4090_v20 = vsel %vm1056_vm5, %v4089_v59, 2147483647 }
0x2154   :  { %v4092_v1 = vshra.s32 %v4090_v20, 16  ;;  %v4091_v38 = vand.u32 65535, %v4090_v20 }
0x2156   :  { %v4094_v27 = vcvt.s32.f32 %v4092_v1  ;;  %v4093_v19 = vcvt.s32.f32 %v4091_v38  ;;  %v10199_v38 = vld [vmem:[#allocation63_spill] sm:$0xff] }
0x2158   :  { %4095 = vmin.xlane.f32.xlu1 %v4094_v27 }
0x21a7   :  { %v4267_v57 = vpop.permute.xlu1 %4266 }
0x21a8   :  { %v4274_v50 = vrot.slane %v4267_v57, %v9960_v55 }
0x21ab   :  { %v4270_v26 = vpop.permute.xlu1 %4269 }
0x21ac   :  { %v4278_v21 = vrot.slane %v4270_v26, %v9960_v55 }
0x21ae   :  { %v4279_v14 = vsel %vm466_vm1, %v4278_v21, %v4274_v50 }
0x21af   :  { %v4281_v15 = vsel %vm469_vm2, %v4279_v14, -inf }
0x21b0   :  { %4282 = vmax.xlane.f32.xlu0 %v4281_v15  ;;  %v10198_v15 = vld [vmem:[#allocation62_spill] sm:$0xff] }
0x21e5   :  { %v4096_v8 = vpop.xlane.xlu1 %4095 }
0x21e6   :  { %vm4097_vm8 = vcmp.eq.f32.partialorder %v4094_v27, %v4096_v8  ;;  %v4102_v20 = vcvt.f32.s32 %v4096_v8  ;;  %v10200_v8 = vld [vmem:[#allocation65_spill] sm:$0xff] }
0x21e7   :  { %v4098_v54 = vsel %vm4097_vm8, %v4093_v19, inf  ;;  %v10204_v19 = vld [vmem:[#allocation71_spill] sm:$0xff] }
0x21e8   :  { %4099 = vmin.xlane.f32.xlu0 %v4098_v54  ;;  %v4103_v27 = vshll.u32 %v4102_v20, 16  ;;  %v10207_v54 = vld [vmem:[#allocation75_spill] sm:$0xff] }
0x223d   :  { %v4283_v36 = vpop.xlane.xlu0 %4282 }
0x223e   :  { %v4288_v34 = vrot.slane %v4283_v36, %v7950_v5  ;;  %v4292_v32 = vrot.slane %v4283_v36, %v7953_v6 }
0x2240   :  { %v4295_v60 = vsub.f32 %v4261_v29, %v4288_v34  ;;  %v4296_v23 = vsub.f32 %v4262_v3, %v4292_v32  ;;  %v10196_v29 = vld [vmem:[#allocation59_spill] sm:$0xff]  ;;  %v10197_v3 = vld [vmem:[#allocation60_spill] sm:$0xff] }
0x2242   :  { %v4297_v59 = vmul.f32 1.442695, %v4295_v60  ;;  %v4299_v1 = vmul.f32 1.442695, %v4296_v23 }
0x2244   :  { %7667 = vpow2.f32 %v4297_v59 }
0x2245   :  { %7669 = vpow2.f32 %v4299_v1 }
0x224e   :  { %v7668_v57 = vpop.eup %7667 }
0x224f   :  { %4304 = vperm.xlu0 %7576, %v7668_v57   ;;  %v7670_v26 = vpop.eup %7669 }
0x2253   :  { %4307 = vperm.xlu0 %7576, %v7670_v26  }
0x2275   :  { %v4100_v50 = vpop.xlane.xlu0 %4099 }
0x2276   :  { %v4101_v21 = vcvt.f32.s32 %v4100_v50 }
0x2278   :  { %v4104_v14 = vadd.s32 %v4103_v27, %v4101_v21 }
0x227a   :  { %vm4363_vm5 = vcmp.eq.s32.totalorder %v9959_v48, %v4104_v14  ;;  %v10201_v48 = vld [vmem:[#allocation66_spill] sm:$0xff] }
0x227b   :  { %6183 = vmatmul.mubr.msk.f32.vlgmr.msra.gmra.mrb[38].mxu1 %vm4363_vm5, %v9961_v18  ;;  %v10202_v18 = vld [vmem:[#allocation68_spill] sm:$0xff] }
0x227c   :  { %7456 = vmatpush1.bf16.msra.mxu1 %v8393_v22  ;;  %4647 = vmatprep.mubr.f32.mxu1 %v9913_v2  ;;  %v10203_v22 = vld [vmem:[#allocation69_spill] sm:$0xff] }
0x227d   :  { %7458 = vmatprep.subr.bf16.mxu1 %v8407_v42  ;;  %v10205_v42 = vld [vmem:[#allocation72_spill] sm:$0xff] }
0x2280   :  { %7460 = vmatpush1.bf16.msra.mxu1 %v8420_v61  ;;  %v10206_v61 = vld [vmem:[#allocation74_spill] sm:$0xff] }
0x2281   :  { %7462 = vmatprep.subr.bf16.mxu1 %v10196_v29 }
0x2284   :  { %7464 = vmatpush1.bf16.msra.mxu1 %v10197_v3 }
0x2285   :  { %7466 = vmatprep.subr.bf16.mxu1 %v10198_v15 }
0x2288   :  { %7468 = vmatpush1.bf16.msra.mxu1 %v10199_v38  ;;  %v7693_v38 = vld [vmem:[%s9681_s0] sm:$0xff] }
0x2289   :  { %7470 = vmatprep.subr.bf16.mxu1 %v10200_v8 }
0x228c   :  { %7472 = vmatpush1.bf16.msra.mxu1 %v10201_v48 }
0x228d   :  { %7474 = vmatprep.subr.bf16.mxu1 %v10202_v18 }
0x2290   :  { %7476 = vmatpush1.bf16.msra.mxu1 %v10203_v22 }
0x2291   :  { %7478 = vmatprep.subr.bf16.mxu1 %v10204_v19 }
0x2294   :  { %7480 = vmatpush1.bf16.msra.mxu1 %v10205_v42 }
0x2295   :  { %7482 = vmatprep.subr.bf16.mxu1 %v10206_v61 }
0x2298   :  { %7484 = vmatpush1.bf16.msra.mxu1 %v10207_v54 }
0x2299   :  { %7509 = vmatprep.subr.bf16.mxu1 %v9907_v10 }
0x22ce   :  { %v4305_v36 = vpop.permute.xlu0 %4304 }
0x22cf   :  { %v4312_v32 = vrot.slane %v4305_v36, %v9960_v55 }
0x22d2   :  { %v4308_v34 = vpop.permute.xlu0 %4307 }
0x22d3   :  { %v4316_v60 = vrot.slane %v4308_v34, %v9960_v55 }
0x22d5   :  { %v4317_v23 = vsel %vm466_vm1, %v4316_v60, %v4312_v32 }
0x22d6   :  { %v4319_v59 = vsel %vm469_vm2, %v4317_v23, 0.0 }
0x22d7   :  { %4320 = vadd.xlane.f32.xlu0 %v4319_v59 }
0x234e   :  { %v4432_v1 = vpop.f32.mrb[38].mxu1 }
0x234f   :  { %v6184_v20 = vpop.f32.mrb[39].mxu1 }
0x2364   :  { %v4321_v50 = vpop.xlane.xlu0 %4320 }
0x2365   :  { %v4326_v27 = vrot.slane %v4321_v50, %v7950_v5  ;;  %v4330_v21 = vrot.slane %v4321_v50, %v7953_v6  ;;  %v7694_v6 = vld [vmem:[%s9681_s0 + $0x8] sm:$0xff] }
0x2367   :  { %7671 = vrcp.f32 %v4326_v27 }
0x2368   :  { %7673 = vrcp.f32 %v4330_v21 }
0x2371   :  { %v7672_v14 = vpop.eup %7671 }
0x2372   :  { %v4334_v29 = vmul.f32 %v7672_v14, %v7668_v57  ;;  %v7674_v3 = vpop.eup %7673 }
0x2373   :  { %v4336_v15 = vmul.f32 %v7674_v3, %v7670_v26 }
0x2374   :  { %4339 = vperm.xlu1 %7575, %v4334_v29  }
0x2378   :  { %4344 = vperm.xlu1 %7575, %v4336_v15  }
0x23f3   :  { %v4340_v55 = vpop.permute.xlu1 %4339 }
0x23f4   :  { %v4347_v8 = vmul.f32 %v7693_v38, %v4340_v55 }
0x23f6   :  { %v4349_v48 = vsel %vm89_vm0, %v4347_v8, 0.0 }
0x23f7   :  { %v4350_v18 = vrot.slane %v4349_v48, 4  ;;  %v4345_v5 = vpop.permute.xlu1 %4344 }
0x23f8   :  { %v4348_v22 = vmul.f32 %v7694_v6, %v4345_v5 }
0x23f9   :  { %v4351_v57 = vadd.f32 %v4350_v18, %v4349_v48 }
0x23fa   :  { %v4356_v19 = vsel %vm89_vm0, %v4348_v22, 0.0 }
0x23fb   :  { %v4352_v26 = vrot.slane %v4351_v57, 2  ;;  %v4357_v42 = vrot.slane %v4356_v19, 4 }
0x23fd   :  { %v4353_v61 = vadd.f32 %v4352_v26, %v4351_v57  ;;  %v4358_v54 = vadd.f32 %v4357_v42, %v4356_v19 }
0x23ff   :  { %v4359_v36 = vrot.slane %v4358_v54, 2  ;;  %v4354_v34 = vrot.slane %v4353_v61, 1 }
0x2401   :  { %v4360_v32 = vadd.f32 %v4359_v36, %v4358_v54  ;;  %v4355_v23 = vadd.f32 %v4354_v34, %v4353_v61 }
0x2403   :  { %v4361_v60 = vrot.slane %v4360_v32, 1 }
0x2405   :  { %v4362_v59 = vadd.f32 %v4361_v60, %v4360_v32 }
0x2407   :  { %v4438_v20 = vsel %vm466_vm1, %v4362_v59, %v4355_v23 }
0x2408   :  { %6202 = vmatmul.mubr.msk.f32.vlgmr.msra.gmra.mrb[36].mxu0 %vm89_vm0, %v4438_v20 }
0x2409   :  { %7431 = vmatpush3.bf16.msra.mxu0 %v9970_v53  ;;  %6236 = vmatprep.mubr.msk.f32.mxu0 %vm7698_vm3, %v9913_v2 }
0x240a   :  { %7432 = vmatprep.subr.bf16.mxu0 %v9907_v10 }
0x240d   :  { %7434 = vmatpush3.bf16.msra.mxu0 %v9971_v0 }
0x240e   :  { %7435 = vmatprep.subr.bf16.mxu0 %v9907_v10 }
0x2411   :  { %7437 = vmatpush3.bf16.msra.mxu0 %v9972_v56 }
0x2412   :  { %7438 = vmatprep.subr.bf16.mxu0 %v9907_v10 }
0x2415   :  { %7440 = vmatpush3.bf16.msra.mxu0 %v9973_v4 }
0x2416   :  { %7441 = vmatprep.subr.bf16.mxu0 %v9907_v10 }
0x2419   :  { %7443 = vmatpush3.bf16.msra.mxu0 %v9974_v12 }
0x241a   :  { %7444 = vmatprep.subr.bf16.mxu0 %v9907_v10 }
0x241d   :  { %7446 = vmatpush3.bf16.msra.mxu0 %v9975_v24 }
0x241e   :  { %7447 = vmatprep.subr.bf16.mxu0 %v9907_v10 }
0x2421   :  { %7449 = vmatpush3.bf16.msra.mxu0 %v9976_v41 }
0x2422   :  { %7450 = vmatprep.subr.bf16.mxu0 %v9907_v10 }
0x2425   :  { %7452 = vmatpush3.bf16.msra.mxu0 %v9977_v35 }
0x2426   :  { %7485 = vmatprep.subr.bf16.mxu0 %v9907_v10 }
0x2428   :  { %6237 = vmatmul.mubr.f32.vlgmr.msra.gmra.mrb[38].mxu0 %v4432_v1 }
0x2429   :  { %7487 = vmatpush3.bf16.msra.mxu0 %v9978_v7  ;;  %6271 = vmatprep.mubr.msk.f32.mxu0 %vm7698_vm3, %v9913_v2 }
0x242a   :  { %7488 = vmatprep.subr.bf16.mxu0 %v9907_v10 }
0x242d   :  { %7490 = vmatpush3.bf16.msra.mxu0 %v9979_v44 }
0x242e   :  { %7491 = vmatprep.subr.bf16.mxu0 %v9907_v10 }
0x2431   :  { %7493 = vmatpush3.bf16.msra.mxu0 %v10030_v52 }
0x2432   :  { %7494 = vmatprep.subr.bf16.mxu0 %v9907_v10 }
0x2435   :  { %7496 = vmatpush3.bf16.msra.mxu0 %v10031_v43 }
0x2436   :  { %7497 = vmatprep.subr.bf16.mxu0 %v9907_v10 }
0x2439   :  { %7499 = vmatpush3.bf16.msra.mxu0 %v10032_v40 }
0x243a   :  { %7500 = vmatprep.subr.bf16.mxu0 %v9907_v10 }
0x243d   :  { %7502 = vmatpush3.bf16.msra.mxu0 %v9983_v33 }
0x243e   :  { %7503 = vmatprep.subr.bf16.mxu0 %v9907_v10 }
0x2441   :  { %7505 = vmatpush3.bf16.msra.mxu0 %v9984_v47 }
0x2442   :  { %7506 = vmatprep.subr.bf16.mxu0 %v9907_v10 }
0x2445   :  { %7508 = vmatpush3.bf16.msra.mxu0 %v10033_v45 }
0x24db   :  { %v4507_v53 = vpop.f32.mrb[36].mxu0 }
0x24dc   :  { %v6203_v0 = vpop.f32.mrb[37].mxu0 }
0x24fb   :  { %v4577_v56 = vpop.f32.mrb[38].mxu0 }
0x24fc   :  { %v4578_v4 = vadd.f32 %v4577_v56, %v4507_v53  ;;  %v6238_v12 = vpop.f32.mrb[39].mxu0 }
0x24fe   :  { %v4581_v24 = vadd.f32 %v9455_v51, %v4578_v4 }
0x2500   :  { %v4582_v41 = vmax.f32 %v4581_v24, 0.0 }
0x2502   :  { %4648 = vmatmul.mubr.f32.vlgmr.msra.gmra.mrb[36].mxu1 %v4582_v41  ;;  %6272 = vmatmul.mubr.f32.vlgmr.msra.gmra.mrb[40].mxu0 %v4582_v41 }
0x2503   :  { %7511 = vmatpush3.bf16.msra.mxu1 %v10090_v39  ;;  %6306 = vmatprep.mubr.msk.f32.mxu1 %vm7698_vm3, %v9913_v2 }
0x2504   :  { %7512 = vmatprep.subr.bf16.mxu1 %v9907_v10 }
0x2507   :  { %7514 = vmatpush3.bf16.msra.mxu1 %v10093_v58 }
0x2508   :  { %7515 = vmatprep.subr.bf16.mxu1 %v9907_v10 }
0x250b   :  { %7517 = vmatpush3.bf16.msra.mxu1 %v10151_v46 }
0x250c   :  { %7518 = vmatprep.subr.bf16.mxu1 %v9907_v10 }
0x250f   :  { %7520 = vmatpush3.bf16.msra.mxu1 %v10154_v49 }
0x2510   :  { %7521 = vmatprep.subr.bf16.mxu1 %v9907_v10 }
0x2513   :  { %7523 = vmatpush3.bf16.msra.mxu1 %v10157_v13 }
0x2514   :  { %7524 = vmatprep.subr.bf16.mxu1 %v9907_v10 }
0x2517   :  { %7526 = vmatpush3.bf16.msra.mxu1 %v10160_v11 }
0x2518   :  { %7527 = vmatprep.subr.bf16.mxu1 %v9907_v10 }
0x251b   :  { %7529 = vmatpush3.bf16.msra.mxu1 %v10163_v25 }
0x251c   :  { %7530 = vmatprep.subr.bf16.mxu1 %v9907_v10  ;;  %v4243_v10 = vadd.f32 %v9562_v28, %v8720_v17 }
0x251f   :  { %7532 = vmatpush3.bf16.msra.mxu1 %v10166_v31 }
0x25d5   :  { %v4649_v2 = vpop.f32.mrb[36].mxu1  ;;  %v4720_v35 = vpop.f32.mrb[40].mxu0 }
0x25d6   :  { %v7554_v7 = vadd.f32 %v8712_v16, %v4649_v2  ;;  %v4651_v44 = vpop.f32.mrb[37].mxu1  ;;  %v6273_v33 = vpop.f32.mrb[41].mxu0  ;;  %v4721_v46 = vadd.f32 %v4720_v35, %v8722_v30 }
0x25d7   :  { %v7556_v52 = vadd.f32 %v8714_v63, %v4651_v44 }
0x25d8   :  { %v4889_v47 = vmul.f32 -1.442695, %v7554_v7 }
0x25d9   :  { %v4890_v43 = vmul.f32 -1.442695, %v7556_v52 }
0x25da   :  { %7675 = vpow2.f32 %v4889_v47 }
0x25db   :  { %7677 = vpow2.f32 %v4890_v43 }
0x25e4   :  { %v7676_v40 = vpop.eup %7675 }
0x25e5   :  { %v4728_v45 = vadd.f32 1.0, %v7676_v40  ;;  %v7678_v39 = vpop.eup %7677 }
0x25e6   :  { %v4735_v58 = vadd.f32 1.0, %v7678_v39 }
0x25e7   :  { %7679 = vrcp.f32 %v4728_v45 }
0x25e8   :  { %7681 = vrcp.f32 %v4735_v58 }
0x25f1   :  { %v7680_v51 = vpop.eup %7679 }
0x25f2   :  { %v4738_v16 = vmul.f32 %v7680_v51, %v4243_v10  ;;  %v7682_v13 = vpop.eup %7681 }
0x25f3   :  { %v4741_v63 = vsub.f32 1.0, %v7682_v13  ;;  %v4743_v31 = vmul.f32 %v7682_v13, %v9499_v37 }
0x25f4   :  { %v4739_v49 = vadd.f32 %v4738_v16, %v4721_v46 }
0x25f6   :  { %7683 = vtanh.f32 %v4739_v49 }
0x2600   :  { %v7684_v11 = vpop.eup %7683 }
0x2601   :  { %v4742_v25 = vmul.f32 %v7684_v11, %v4741_v63 }
0x2603   :  { %v4744_v1 = vadd.f32 %v4743_v31, %v4742_v25 }
0x2605   :  { %6307 = vmatmul.mubr.f32.vlgmr.msra.gmra.mrb[40].mxu1 %v4744_v1 }
0x26d8   :  { %v4811_v50 = vpop.f32.mrb[40].mxu1 }
0x26d9   :  { %v4812_v27 = vadd.f32 %v9552_v62, %v4811_v50  ;;  %v6308_v21 = vpop.f32.mrb[41].mxu1 }
0x26db   :  { %v4822_v17 = vrot.slane %v4812_v27, %v10192_v9 }
0x26dd   :  { %v4823_v28 = vcombine.high %v4822_v17, %v4822_v17  ;;  %4891 = vst.sshfl [vmem:[%s9685_s13 + $0x6] sm:$0x1 pattern:$0x73625140] %v4822_v17 }
0x26df   :  { %4892 = vst.sshfl [vmem:[%s9685_s13 + $0xe] sm:$0x1 pattern:$0x73625140] %v4823_v28 }

</bundles_post_ra>
